<compile_context>
chip_gen: v5e
topology: v5e:2x2
jax: 0.10.0
libtpu: 0.0.40
codegen_flags: <defaults>
</compile_context>

<pallas_src>
import jax
import jax.numpy as jnp
from jax.experimental import pallas as pl
from jax.experimental.pallas import tpu as pltpu

INPUT_SIZE = 128      # vocab size (ASCII codes)
EMB_SIZE = 100
HIDDEN_SIZE = 100
HIDDEN_PAD = 128      # lane-aligned hidden size
NUM_LAYERS = 2
NUM_DIRECTION = 1
NUM_CLASS = 8


def _gru_fc_kernel(x_ref, len_ref, embp_ref, bhn0_ref, wf_ref, b1_ref,
                   fcw_ref, fcb_ref, y_ref, gi0_ref):
    """Embedding + 2-layer GRU recurrence + final FC; single block in VMEM.

    x_ref   : (T*B, 1) int32   time-major char codes (row = t*B + b)
    len_ref : (B, 1) f32       sequence lengths (0 for padded batch rows)
    embp_ref: (V, 3*HP) f32    per-character table  embedding @ W_ih0 + biases
    bhn0_ref: (1, HP) f32      layer-0 b_hh_n (stays inside the r*(...) term)
    wf_ref  : (2*HP, 7*HP) bf16 fused per-step weight:
              cols [0,3HP)  = whh0 gates (bottom HP rows zero)
              cols [3HP,7HP)= layer-1 fused [r | z | n_x | n_h]
    b1_ref  : (1, 4*HP) f32    [b_ir+b_hr | b_iz+b_hz | b_in | b_hn] (layer 1)
    fcw_ref : (HP, NC) bf16    fcb_ref: (1, NC) f32
    y_ref   : (2*B, NC) f32    rows [0,B) = fc(h_layer0), rows [B,2B) = fc(h_layer1)
    gi0_ref : (T*B, 3*HP) f32  VMEM scratch for the hoisted input projection
    """
    TB = x_ref.shape[0]
    B = len_ref.shape[0]
    T = TB // B
    V = embp_ref.shape[0]
    HP = bhn0_ref.shape[1]

    # ---- embedding + layer-0 input projection: single one-hot matmul ----
    lane = jax.lax.broadcasted_iota(jnp.int32, (TB, V), 1)
    onehot = (lane == x_ref[...]).astype(jnp.float32)
    gi0_ref[...] = jnp.dot(onehot, embp_ref[...],
                           preferred_element_type=jnp.float32)

    # Loop-invariant operands / hoisted broadcasts.
    len_f = len_ref[...]                                   # (B, 1)
    bhn0 = jnp.broadcast_to(bhn0_ref[...], (B, HP))
    b1 = jnp.broadcast_to(b1_ref[...], (B, 4 * HP))

    # Hidden states live in vregs.  Padded lanes (H..HP-1) stay exactly 0:
    # padded weight/bias columns are 0 => n=0 there => (1-z)*0 + z*0 = 0.
    h1 = jnp.zeros((B, HP), jnp.float32)

    def cell0(gi0_t, gh0, h_prev, valid):
        r = jax.nn.sigmoid(gi0_t[:, 0:HP] + gh0[:, 0:HP])
        z = jax.nn.sigmoid(gi0_t[:, HP:2 * HP] + gh0[:, HP:2 * HP])
        n = jnp.tanh(gi0_t[:, 2 * HP:3 * HP]
                     + r * (gh0[:, 2 * HP:3 * HP] + bhn0))
        return jnp.where(valid, (1.0 - z) * n + z * h_prev, h_prev)

    def cell1(g1, h_prev, valid):
        r = jax.nn.sigmoid(g1[:, 0:HP])
        z = jax.nn.sigmoid(g1[:, HP:2 * HP])
        n = jnp.tanh(g1[:, 2 * HP:3 * HP] + r * g1[:, 3 * HP:4 * HP])
        return jnp.where(valid, (1.0 - z) * n + z * h_prev, h_prev)

    # ---- peeled step-0 layer-0 (h0_prev = 0 -> recurrent gates are 0) ----
    gi00 = gi0_ref[0:B, :]
    r0 = jax.nn.sigmoid(gi00[:, 0:HP])
    z0 = jax.nn.sigmoid(gi00[:, HP:2 * HP])
    n0 = jnp.tanh(gi00[:, 2 * HP:3 * HP] + r0 * bhn0)
    h0 = jnp.where(len_f > 0.0, (1.0 - z0) * n0, 0.0)      # h0[0]

    # ---- skewed steady state: ONE bf16 MXU op per step ----
    # At iteration t the fused matmul on [h0[t] | h1[t-1]] yields layer-1's
    # gates for step t and layer-0's recurrent gates for step t+1.
    for t in range(T - 1):
        lhs = jnp.concatenate([h0, h1], axis=1).astype(jnp.bfloat16)
        fused = jnp.dot(lhs, wf_ref[...], preferred_element_type=jnp.float32)
        h1 = cell1(fused[:, 3 * HP:7 * HP] + b1, h1, len_f > float(t))
        h0 = cell0(gi0_ref[(t + 1) * B:(t + 2) * B, :], fused[:, 0:3 * HP],
                   h0, len_f > float(t + 1))

    # ---- peeled last layer-1 step (t = T-1) ----
    lhs = jnp.concatenate([h0, h1], axis=1).astype(jnp.bfloat16)
    fused = jnp.dot(lhs, wf_ref[...], preferred_element_type=jnp.float32)
    h1 = cell1(fused[:, 3 * HP:7 * HP] + b1, h1, len_f > float(T - 1))

    # ---- final FC on both layers' hidden: one matmul, one store ----
    hcat = jnp.concatenate([h0, h1], axis=0).astype(jnp.bfloat16)   # (2B, HP)
    y_ref[...] = (jnp.dot(hcat, fcw_ref[...], preferred_element_type=jnp.float32)
                  + fcb_ref[...])


@jax.jit
def model_forward(kp, x_idx, lengths):
    """x_idx: (B, T) int32 char codes (0-padded); lengths: (B,) int32."""
    B, T = x_idx.shape
    HP = HIDDEN_PAD
    B_pad = ((B + 7) // 8) * 8                # fill all 8 f32 sublanes
    pad = B_pad - B

    x_p = jnp.pad(x_idx.astype(jnp.int32), ((0, pad), (0, 0)))
    len_p = jnp.pad(lengths.astype(jnp.int32), (0, pad))   # padded rows: len 0

    # time-major integer indices, row = t*B_pad + b
    x_flat = jnp.transpose(x_p, (1, 0)).reshape(T * B_pad, 1)
    len_col = len_p.astype(jnp.float32).reshape(B_pad, 1)

    y2 = pl.pallas_call(
        _gru_fc_kernel,
        out_shape=jax.ShapeDtypeStruct((NUM_LAYERS * B_pad, NUM_CLASS),
                                       jnp.float32),
        scratch_shapes=[pltpu.VMEM((T * B_pad, 3 * HP), jnp.float32)],
    )(x_flat, len_col, kp["emb_proj"], kp["b_hn0"], kp["w_fused"],
      kp["b1"], kp["fc_w"], kp["fc_b"])

    # torch forward applies fc to the full hiddenn tensor (num_layers, B, H).
    y2 = y2.reshape(NUM_LAYERS * NUM_DIRECTION, B_pad, NUM_CLASS)
    return y2[:, :B, :]


def init_natural_params(key):
    """Parameters in natural torch layout (W: (3H, in), b: (3H,), fc: (C, H))."""
    ks = jax.random.split(key, 12)
    s = 0.1
    H, E, NC = HIDDEN_SIZE, EMB_SIZE, NUM_CLASS
    return {
        "embedding": s * jax.random.normal(ks[0], (INPUT_SIZE, E), jnp.float32),
        "w_ih0": s * jax.random.normal(ks[1], (3 * H, E), jnp.float32),
        "w_hh0": s * jax.random.normal(ks[2], (3 * H, H), jnp.float32),
        "b_ih0": s * jax.random.normal(ks[3], (3 * H,), jnp.float32),
        "b_hh0": s * jax.random.normal(ks[4], (3 * H,), jnp.float32),
        "w_ih1": s * jax.random.normal(ks[5], (3 * H, H), jnp.float32),
        "w_hh1": s * jax.random.normal(ks[6], (3 * H, H), jnp.float32),
        "b_ih1": s * jax.random.normal(ks[7], (3 * H,), jnp.float32),
        "b_hh1": s * jax.random.normal(ks[8], (3 * H,), jnp.float32),
        "fc_w": s * jax.random.normal(ks[9], (NC, H), jnp.float32),
        "fc_b": s * jax.random.normal(ks[10], (NC,), jnp.float32),
    }


def prepare_params(nat):
    """Repack torch-layout params into padded, gate-aligned kernel operands."""
    H, HP, NC = HIDDEN_SIZE, HIDDEN_PAD, NUM_CLASS

    def gate(w, g):                       # (3H, in) -> (in, H) for gate g=(r,z,n)
        return w[g * H:(g + 1) * H, :].T

    def pad_cols(m, cols):
        return jnp.pad(m, ((0, 0), (0, cols - m.shape[1])))

    def pad_rows(m, rows):
        return jnp.pad(m, ((0, rows - m.shape[0]), (0, 0)))

    def pad_vec(v):
        return jnp.pad(v, (0, HP - H))

    # --- layer-0 input path folded into a per-character table (param-only) ---
    w_ih0 = jnp.concatenate(
        [pad_cols(gate(nat["w_ih0"], g), HP) for g in range(3)], axis=1)   # (E,3HP)
    gi0_bias = jnp.concatenate([
        pad_vec(nat["b_ih0"][0:H] + nat["b_hh0"][0:H]),
        pad_vec(nat["b_ih0"][H:2 * H] + nat["b_hh0"][H:2 * H]),
        pad_vec(nat["b_ih0"][2 * H:3 * H]),
    ])                                                                     # (3HP,)
    emb_proj = nat["embedding"] @ w_ih0 + gi0_bias[None, :]                # (V,3HP)
    b_hn0 = pad_vec(nat["b_hh0"][2 * H:3 * H]).reshape(1, HP)

    # --- fused per-step recurrent weight (2HP, 7HP) ---
    w_hh0 = pad_rows(jnp.concatenate(
        [pad_cols(gate(nat["w_hh0"], g), HP) for g in range(3)], axis=1), HP)
    whh0_ext = jnp.concatenate(
        [w_hh0, jnp.zeros((HP, 3 * HP), jnp.float32)], axis=0)             # (2HP,3HP)

    zeros_h = jnp.zeros((H, HP), jnp.float32)
    top = jnp.concatenate([pad_cols(gate(nat["w_ih1"], 0), HP),
                           pad_cols(gate(nat["w_ih1"], 1), HP),
                           pad_cols(gate(nat["w_ih1"], 2), HP),
                           zeros_h], axis=1)                               # (H,4HP)
    bot = jnp.concatenate([pad_cols(gate(nat["w_hh1"], 0), HP),
                           pad_cols(gate(nat["w_hh1"], 1), HP),
                           zeros_h,
                           pad_cols(gate(nat["w_hh1"], 2), HP)], axis=1)
    w1 = jnp.concatenate([pad_rows(top, HP), pad_rows(bot, HP)], axis=0)   # (2HP,4HP)
    w_fused = jnp.concatenate([whh0_ext, w1], axis=1).astype(jnp.bfloat16)

    b1 = jnp.concatenate([
        pad_vec(nat["b_ih1"][0:H] + nat["b_hh1"][0:H]),
        pad_vec(nat["b_ih1"][H:2 * H] + nat["b_hh1"][H:2 * H]),
        pad_vec(nat["b_ih1"][2 * H:3 * H]),
        pad_vec(nat["b_hh1"][2 * H:3 * H]),
    ]).reshape(1, 4 * HP)

    fc_w = pad_rows(nat["fc_w"].T, HP).astype(jnp.bfloat16)                # (HP,NC)
    fc_b = nat["fc_b"].reshape(1, NC)

    return {"emb_proj": emb_proj, "b_hn0": b_hn0, "w_fused": w_fused,
            "b1": b1, "fc_w": fc_w, "fc_b": fc_b}


def reference_forward(nat, x_idx, lengths):
    """Pure-JAX f32 reference with torch.nn.GRU semantics (unpadded, H=100)."""
    H = HIDDEN_SIZE
    emb = jnp.take(nat["embedding"], x_idx, axis=0)
    emb = jnp.transpose(emb, (1, 0, 2)).astype(jnp.float32)
    T, B, _ = emb.shape

    def cell(x, h, w_ih, w_hh, b_ih, b_hh):
        gi = x @ w_ih.T + b_ih
        gh = h @ w_hh.T + b_hh
        r = jax.nn.sigmoid(gi[:, 0:H] + gh[:, 0:H])
        z = jax.nn.sigmoid(gi[:, H:2 * H] + gh[:, H:2 * H])
        n = jnp.tanh(gi[:, 2 * H:] + r * gh[:, 2 * H:])
        return (1.0 - z) * n + z * h

    h0 = jnp.zeros((B, H), jnp.float32)
    h1 = jnp.zeros((B, H), jnp.float32)
    for t in range(T):
        m = (lengths > t)[:, None]
        h0 = jnp.where(m, cell(emb[t], h0, nat["w_ih0"], nat["w_hh0"],
                               nat["b_ih0"], nat["b_hh0"]), h0)
        h1 = jnp.where(m, cell(h0, h1, nat["w_ih1"], nat["w_hh1"],
                               nat["b_ih1"], nat["b_hh1"]), h1)
    hid = jnp.stack([h0, h1], axis=0)                         # (2, B, H)
    return hid @ nat["fc_w"].T + nat["fc_b"]


if __name__ == "__main__":
    key = jax.random.PRNGKey(0)
    nat = init_natural_params(key)
    kp = prepare_params(nat)

    # Small batch of "names": (B=4, T=8) char codes, lengths sorted descending
    # (as produced by make_tensors), 0-padded.
    B, T = 4, 8
    lengths = jnp.array([8, 5, 3, 2], dtype=jnp.int32)
    kx = jax.random.fold_in(key, 1)
    x = jax.random.randint(kx, (B, T), 1, INPUT_SIZE, dtype=jnp.int32)
    pad_mask = jnp.arange(T)[None, :] < lengths[:, None]
    x = jnp.where(pad_mask, x, 0)

    y = model_forward(kp, x, lengths)
    jax.block_until_ready(y)
    assert y.shape == (NUM_LAYERS * NUM_DIRECTION, B, NUM_CLASS)
    assert jnp.all(jnp.isfinite(y))

    # Verify against the pure-JAX torch-semantics reference.  The kernel's
    # matmul operands are bf16 (MXU-native), so tolerance is the standard
    # bf16 matmul tolerance rather than the f32 1e-3.
    y_ref = reference_forward(nat, x, lengths)
    assert jnp.allclose(y, y_ref, atol=2e-2, rtol=2e-2), \
        float(jnp.max(jnp.abs(y - y_ref)))

    print("KERNEL_OK")
</pallas_src>

<mosaic_0001>
module attributes {stable_mosaic.version = 11 : i64} {
  func.func @_gru_fc_kernel(%arg0: memref<64x1xi32, #tpu.memory_space<vmem>>, %arg1: memref<8x1xf32, #tpu.memory_space<vmem>>, %arg2: memref<128x384xf32, #tpu.memory_space<vmem>>, %arg3: memref<1x128xf32, #tpu.memory_space<vmem>>, %arg4: memref<256x896xbf16, #tpu.memory_space<vmem>>, %arg5: memref<1x512xf32, #tpu.memory_space<vmem>>, %arg6: memref<128x8xbf16, #tpu.memory_space<vmem>>, %arg7: memref<1x8xf32, #tpu.memory_space<vmem>>, %arg8: memref<16x8xf32, #tpu.memory_space<vmem>>, %arg9: memref<64x384xf32, #tpu.memory_space<vmem>>) attributes {dimension_semantics = [], scalar_prefetch = 0 : i64, scratch_operands = 1 : i64, tpu.core_type = #tpu.core_type<tc>} {
    %0 = tpu.iota {dimensions = array<i32: 1>} : vector<64x128xi32>
    %c0 = arith.constant 0 : index
    %c0_0 = arith.constant 0 : index
    %1 = vector.load %arg0[%c0, %c0_0] : memref<64x1xi32, #tpu.memory_space<vmem>>, vector<64x1xi32>
    %2 = vector.broadcast %1 : vector<64x1xi32> to vector<64x128xi32>
    %3 = arith.cmpi eq, %0, %2 : vector<64x128xi32>
    %4 = arith.extui %3 : vector<64x128xi1> to vector<64x128xi32>
    %5 = arith.sitofp %4 : vector<64x128xi32> to vector<64x128xf32>
    %c0_1 = arith.constant 0 : index
    %c0_2 = arith.constant 0 : index
    %6 = vector.load %arg2[%c0_1, %c0_2] : memref<128x384xf32, #tpu.memory_space<vmem>>, vector<128x384xf32>
    %cst = arith.constant dense<0.000000e+00> : vector<64x384xf32>
    %7 = tpu.matmul %5, %6, %cst {dimension_numbers = #tpu.dot_dimension_numbers<[1], [0], [0], [1], [0, 0, 1, 1], [], []>} : vector<64x128xf32>, vector<128x384xf32>, vector<64x384xf32> -> vector<64x384xf32>
    %c0_3 = arith.constant 0 : index
    %c0_4 = arith.constant 0 : index
    %8 = vector.load %arg9[%c0_3, %c0_4] : memref<64x384xf32, #tpu.memory_space<vmem>>, vector<64x384xf32>
    tpu.vector_store %arg9[%c0_3, %c0_4], %7 {strides = array<i32>} : memref<64x384xf32, #tpu.memory_space<vmem>>, vector<64x384xf32>,
    %c0_5 = arith.constant 0 : index
    %c0_6 = arith.constant 0 : index
    %9 = vector.load %arg1[%c0_5, %c0_6] : memref<8x1xf32, #tpu.memory_space<vmem>>, vector<8x1xf32>
    %c0_7 = arith.constant 0 : index
    %c0_8 = arith.constant 0 : index
    %10 = vector.load %arg3[%c0_7, %c0_8] : memref<1x128xf32, #tpu.memory_space<vmem>>, vector<1x128xf32>
    %11 = vector.shape_cast %10 : vector<1x128xf32> to vector<1x128xf32>
    %12 = vector.broadcast %11 : vector<1x128xf32> to vector<8x128xf32>
    %c0_9 = arith.constant 0 : index
    %c0_10 = arith.constant 0 : index
    %13 = vector.load %arg5[%c0_9, %c0_10] : memref<1x512xf32, #tpu.memory_space<vmem>>, vector<1x512xf32>
    %14 = vector.shape_cast %13 : vector<1x512xf32> to vector<1x512xf32>
    %15 = vector.broadcast %14 : vector<1x512xf32> to vector<8x512xf32>
    %cst_11 = arith.constant 0.000000e+00 : f32
    %16 = vector.broadcast %cst_11 : f32 to vector<8x128xf32>
    %c0_12 = arith.constant 0 : index
    %c0_13 = arith.constant 0 : index
    %17 = vector.load %arg9[%c0_12, %c0_13] : memref<64x384xf32, #tpu.memory_space<vmem>>, vector<8x384xf32>
    %18 = vector.extract_strided_slice %17 {offsets = [0, 0], sizes = [8, 128], strides = [1, 1]} : vector<8x384xf32> to vector<8x128xf32>
    %19 = arith.negf %18 : vector<8x128xf32>
    %20 = math.exp %19 : vector<8x128xf32>
    %cst_14 = arith.constant 1.000000e+00 : f32
    %21 = vector.broadcast %cst_14 : f32 to vector<8x128xf32>
    %22 = arith.addf %21, %20 : vector<8x128xf32>
    %23 = arith.divf %21, %22 : vector<8x128xf32>
    %24 = vector.extract_strided_slice %17 {offsets = [0, 128], sizes = [8, 128], strides = [1, 1]} : vector<8x384xf32> to vector<8x128xf32>
    %25 = arith.negf %24 : vector<8x128xf32>
    %26 = math.exp %25 : vector<8x128xf32>
    %cst_15 = arith.constant 1.000000e+00 : f32
    %27 = vector.broadcast %cst_15 : f32 to vector<8x128xf32>
    %28 = arith.addf %27, %26 : vector<8x128xf32>
    %29 = arith.divf %27, %28 : vector<8x128xf32>
    %30 = vector.extract_strided_slice %17 {offsets = [0, 256], sizes = [8, 128], strides = [1, 1]} : vector<8x384xf32> to vector<8x128xf32>
    %31 = arith.mulf %23, %12 : vector<8x128xf32>
    %32 = arith.addf %30, %31 : vector<8x128xf32>
    %33 = math.tanh %32 : vector<8x128xf32>
    %cst_16 = arith.constant 0.000000e+00 : f32
    %34 = vector.broadcast %cst_16 : f32 to vector<8x1xf32>
    %35 = arith.cmpf ogt, %9, %34 : vector<8x1xf32>
    %cst_17 = arith.constant 1.000000e+00 : f32
    %36 = vector.broadcast %cst_17 : f32 to vector<8x128xf32>
    %37 = arith.subf %36, %29 : vector<8x128xf32>
    %38 = arith.mulf %37, %33 : vector<8x128xf32>
    %cst_18 = arith.constant 0.000000e+00 : f32
    %39 = vector.shape_cast %35 : vector<8x1xi1> to vector<8x1xi1>
    %40 = vector.broadcast %39 : vector<8x1xi1> to vector<8x128xi1>
    %41 = vector.broadcast %cst_18 : f32 to vector<8x128xf32>
    %42 = arith.select %40, %38, %41 : vector<8x128xi1>, vector<8x128xf32>
    %43 = tpu.concatenate %42, %16 in 1 : vector<8x128xf32>, vector<8x128xf32> -> vector<8x256xf32>
    %44 = arith.truncf %43 : vector<8x256xf32> to vector<8x256xbf16>
    %c0_19 = arith.constant 0 : index
    %c0_20 = arith.constant 0 : index
    %45 = vector.load %arg4[%c0_19, %c0_20] : memref<256x896xbf16, #tpu.memory_space<vmem>>, vector<256x896xbf16>
    %cst_21 = arith.constant dense<0.000000e+00> : vector<8x896xf32>
    %46 = tpu.matmul %44, %45, %cst_21 {dimension_numbers = #tpu.dot_dimension_numbers<[1], [0], [0], [1], [0, 0, 1, 1], [], []>} : vector<8x256xbf16>, vector<256x896xbf16>, vector<8x896xf32> -> vector<8x896xf32>
    %47 = vector.extract_strided_slice %46 {offsets = [0, 384], sizes = [8, 512], strides = [1, 1]} : vector<8x896xf32> to vector<8x512xf32>
    %48 = arith.addf %47, %15 : vector<8x512xf32>
    %cst_22 = arith.constant 0.000000e+00 : f32
    %49 = vector.broadcast %cst_22 : f32 to vector<8x1xf32>
    %50 = arith.cmpf ogt, %9, %49 : vector<8x1xf32>
    %51 = vector.extract_strided_slice %48 {offsets = [0, 0], sizes = [8, 128], strides = [1, 1]} : vector<8x512xf32> to vector<8x128xf32>
    %52 = arith.negf %51 : vector<8x128xf32>
    %53 = math.exp %52 : vector<8x128xf32>
    %cst_23 = arith.constant 1.000000e+00 : f32
    %54 = vector.broadcast %cst_23 : f32 to vector<8x128xf32>
    %55 = arith.addf %54, %53 : vector<8x128xf32>
    %56 = arith.divf %54, %55 : vector<8x128xf32>
    %57 = vector.extract_strided_slice %48 {offsets = [0, 128], sizes = [8, 128], strides = [1, 1]} : vector<8x512xf32> to vector<8x128xf32>
    %58 = arith.negf %57 : vector<8x128xf32>
    %59 = math.exp %58 : vector<8x128xf32>
    %cst_24 = arith.constant 1.000000e+00 : f32
    %60 = vector.broadcast %cst_24 : f32 to vector<8x128xf32>
    %61 = arith.addf %60, %59 : vector<8x128xf32>
    %62 = arith.divf %60, %61 : vector<8x128xf32>
    %63 = vector.extract_strided_slice %48 {offsets = [0, 256], sizes = [8, 128], strides = [1, 1]} : vector<8x512xf32> to vector<8x128xf32>
    %64 = vector.extract_strided_slice %48 {offsets = [0, 384], sizes = [8, 128], strides = [1, 1]} : vector<8x512xf32> to vector<8x128xf32>
    %65 = arith.mulf %56, %64 : vector<8x128xf32>
    %66 = arith.addf %63, %65 : vector<8x128xf32>
    %67 = math.tanh %66 : vector<8x128xf32>
    %cst_25 = arith.constant 1.000000e+00 : f32
    %68 = vector.broadcast %cst_25 : f32 to vector<8x128xf32>
    %69 = arith.subf %68, %62 : vector<8x128xf32>
    %70 = arith.mulf %69, %67 : vector<8x128xf32>
    %71 = arith.mulf %62, %16 : vector<8x128xf32>
    %72 = arith.addf %70, %71 : vector<8x128xf32>
    %73 = vector.shape_cast %50 : vector<8x1xi1> to vector<8x1xi1>
    %74 = vector.broadcast %73 : vector<8x1xi1> to vector<8x128xi1>
    %75 = arith.select %74, %72, %16 : vector<8x128xi1>, vector<8x128xf32>
    %c8 = arith.constant 8 : index
    %c0_26 = arith.constant 0 : index
    %76 = vector.load %arg9[%c8, %c0_26] : memref<64x384xf32, #tpu.memory_space<vmem>>, vector<8x384xf32>
    %77 = vector.extract_strided_slice %46 {offsets = [0, 0], sizes = [8, 384], strides = [1, 1]} : vector<8x896xf32> to vector<8x384xf32>
    %cst_27 = arith.constant 1.000000e+00 : f32
    %78 = vector.broadcast %cst_27 : f32 to vector<8x1xf32>
    %79 = arith.cmpf ogt, %9, %78 : vector<8x1xf32>
    %80 = vector.extract_strided_slice %76 {offsets = [0, 0], sizes = [8, 128], strides = [1, 1]} : vector<8x384xf32> to vector<8x128xf32>
    %81 = vector.extract_strided_slice %77 {offsets = [0, 0], sizes = [8, 128], strides = [1, 1]} : vector<8x384xf32> to vector<8x128xf32>
    %82 = arith.addf %80, %81 : vector<8x128xf32>
    %83 = arith.negf %82 : vector<8x128xf32>
    %84 = math.exp %83 : vector<8x128xf32>
    %cst_28 = arith.constant 1.000000e+00 : f32
    %85 = vector.broadcast %cst_28 : f32 to vector<8x128xf32>
    %86 = arith.addf %85, %84 : vector<8x128xf32>
    %87 = arith.divf %85, %86 : vector<8x128xf32>
    %88 = vector.extract_strided_slice %76 {offsets = [0, 128], sizes = [8, 128], strides = [1, 1]} : vector<8x384xf32> to vector<8x128xf32>
    %89 = vector.extract_strided_slice %77 {offsets = [0, 128], sizes = [8, 128], strides = [1, 1]} : vector<8x384xf32> to vector<8x128xf32>
    %90 = arith.addf %88, %89 : vector<8x128xf32>
    %91 = arith.negf %90 : vector<8x128xf32>
    %92 = math.exp %91 : vector<8x128xf32>
    %cst_29 = arith.constant 1.000000e+00 : f32
    %93 = vector.broadcast %cst_29 : f32 to vector<8x128xf32>
    %94 = arith.addf %93, %92 : vector<8x128xf32>
    %95 = arith.divf %93, %94 : vector<8x128xf32>
    %96 = vector.extract_strided_slice %76 {offsets = [0, 256], sizes = [8, 128], strides = [1, 1]} : vector<8x384xf32> to vector<8x128xf32>
    %97 = vector.extract_strided_slice %77 {offsets = [0, 256], sizes = [8, 128], strides = [1, 1]} : vector<8x384xf32> to vector<8x128xf32>
    %98 = arith.addf %97, %12 : vector<8x128xf32>
    %99 = arith.mulf %87, %98 : vector<8x128xf32>
    %100 = arith.addf %96, %99 : vector<8x128xf32>
    %101 = math.tanh %100 : vector<8x128xf32>
    %cst_30 = arith.constant 1.000000e+00 : f32
    %102 = vector.broadcast %cst_30 : f32 to vector<8x128xf32>
    %103 = arith.subf %102, %95 : vector<8x128xf32>
    %104 = arith.mulf %103, %101 : vector<8x128xf32>
    %105 = arith.mulf %95, %42 : vector<8x128xf32>
    %106 = arith.addf %104, %105 : vector<8x128xf32>
    %107 = vector.shape_cast %79 : vector<8x1xi1> to vector<8x1xi1>
    %108 = vector.broadcast %107 : vector<8x1xi1> to vector<8x128xi1>
    %109 = arith.select %108, %106, %42 : vector<8x128xi1>, vector<8x128xf32>
    %110 = tpu.concatenate %109, %75 in 1 : vector<8x128xf32>, vector<8x128xf32> -> vector<8x256xf32>
    %111 = arith.truncf %110 : vector<8x256xf32> to vector<8x256xbf16>
    %c0_31 = arith.constant 0 : index
    %c0_32 = arith.constant 0 : index
    %112 = vector.load %arg4[%c0_31, %c0_32] : memref<256x896xbf16, #tpu.memory_space<vmem>>, vector<256x896xbf16>
    %cst_33 = arith.constant dense<0.000000e+00> : vector<8x896xf32>
    %113 = tpu.matmul %111, %112, %cst_33 {dimension_numbers = #tpu.dot_dimension_numbers<[1], [0], [0], [1], [0, 0, 1, 1], [], []>} : vector<8x256xbf16>, vector<256x896xbf16>, vector<8x896xf32> -> vector<8x896xf32>
    %114 = vector.extract_strided_slice %113 {offsets = [0, 384], sizes = [8, 512], strides = [1, 1]} : vector<8x896xf32> to vector<8x512xf32>
    %115 = arith.addf %114, %15 : vector<8x512xf32>
    %cst_34 = arith.constant 1.000000e+00 : f32
    %116 = vector.broadcast %cst_34 : f32 to vector<8x1xf32>
    %117 = arith.cmpf ogt, %9, %116 : vector<8x1xf32>
    %118 = vector.extract_strided_slice %115 {offsets = [0, 0], sizes = [8, 128], strides = [1, 1]} : vector<8x512xf32> to vector<8x128xf32>
    %119 = arith.negf %118 : vector<8x128xf32>
    %120 = math.exp %119 : vector<8x128xf32>
    %cst_35 = arith.constant 1.000000e+00 : f32
    %121 = vector.broadcast %cst_35 : f32 to vector<8x128xf32>
    %122 = arith.addf %121, %120 : vector<8x128xf32>
    %123 = arith.divf %121, %122 : vector<8x128xf32>
    %124 = vector.extract_strided_slice %115 {offsets = [0, 128], sizes = [8, 128], strides = [1, 1]} : vector<8x512xf32> to vector<8x128xf32>
    %125 = arith.negf %124 : vector<8x128xf32>
    %126 = math.exp %125 : vector<8x128xf32>
    %cst_36 = arith.constant 1.000000e+00 : f32
    %127 = vector.broadcast %cst_36 : f32 to vector<8x128xf32>
    %128 = arith.addf %127, %126 : vector<8x128xf32>
    %129 = arith.divf %127, %128 : vector<8x128xf32>
    %130 = vector.extract_strided_slice %115 {offsets = [0, 256], sizes = [8, 128], strides = [1, 1]} : vector<8x512xf32> to vector<8x128xf32>
    %131 = vector.extract_strided_slice %115 {offsets = [0, 384], sizes = [8, 128], strides = [1, 1]} : vector<8x512xf32> to vector<8x128xf32>
    %132 = arith.mulf %123, %131 : vector<8x128xf32>
    %133 = arith.addf %130, %132 : vector<8x128xf32>
    %134 = math.tanh %133 : vector<8x128xf32>
    %cst_37 = arith.constant 1.000000e+00 : f32
    %135 = vector.broadcast %cst_37 : f32 to vector<8x128xf32>
    %136 = arith.subf %135, %129 : vector<8x128xf32>
    %137 = arith.mulf %136, %134 : vector<8x128xf32>
    %138 = arith.mulf %129, %75 : vector<8x128xf32>
    %139 = arith.addf %137, %138 : vector<8x128xf32>
    %140 = vector.shape_cast %117 : vector<8x1xi1> to vector<8x1xi1>
    %141 = vector.broadcast %140 : vector<8x1xi1> to vector<8x128xi1>
    %142 = arith.select %141, %139, %75 : vector<8x128xi1>, vector<8x128xf32>
    %c16 = arith.constant 16 : index
    %c0_38 = arith.constant 0 : index
    %143 = vector.load %arg9[%c16, %c0_38] : memref<64x384xf32, #tpu.memory_space<vmem>>, vector<8x384xf32>
    %144 = vector.extract_strided_slice %113 {offsets = [0, 0], sizes = [8, 384], strides = [1, 1]} : vector<8x896xf32> to vector<8x384xf32>
    %cst_39 = arith.constant 2.000000e+00 : f32
    %145 = vector.broadcast %cst_39 : f32 to vector<8x1xf32>
    %146 = arith.cmpf ogt, %9, %145 : vector<8x1xf32>
    %147 = vector.extract_strided_slice %143 {offsets = [0, 0], sizes = [8, 128], strides = [1, 1]} : vector<8x384xf32> to vector<8x128xf32>
    %148 = vector.extract_strided_slice %144 {offsets = [0, 0], sizes = [8, 128], strides = [1, 1]} : vector<8x384xf32> to vector<8x128xf32>
    %149 = arith.addf %147, %148 : vector<8x128xf32>
    %150 = arith.negf %149 : vector<8x128xf32>
    %151 = math.exp %150 : vector<8x128xf32>
    %cst_40 = arith.constant 1.000000e+00 : f32
    %152 = vector.broadcast %cst_40 : f32 to vector<8x128xf32>
    %153 = arith.addf %152, %151 : vector<8x128xf32>
    %154 = arith.divf %152, %153 : vector<8x128xf32>
    %155 = vector.extract_strided_slice %143 {offsets = [0, 128], sizes = [8, 128], strides = [1, 1]} : vector<8x384xf32> to vector<8x128xf32>
    %156 = vector.extract_strided_slice %144 {offsets = [0, 128], sizes = [8, 128], strides = [1, 1]} : vector<8x384xf32> to vector<8x128xf32>
    %157 = arith.addf %155, %156 : vector<8x128xf32>
    %158 = arith.negf %157 : vector<8x128xf32>
    %159 = math.exp %158 : vector<8x128xf32>
    %cst_41 = arith.constant 1.000000e+00 : f32
    %160 = vector.broadcast %cst_41 : f32 to vector<8x128xf32>
    %161 = arith.addf %160, %159 : vector<8x128xf32>
    %162 = arith.divf %160, %161 : vector<8x128xf32>
    %163 = vector.extract_strided_slice %143 {offsets = [0, 256], sizes = [8, 128], strides = [1, 1]} : vector<8x384xf32> to vector<8x128xf32>
    %164 = vector.extract_strided_slice %144 {offsets = [0, 256], sizes = [8, 128], strides = [1, 1]} : vector<8x384xf32> to vector<8x128xf32>
    %165 = arith.addf %164, %12 : vector<8x128xf32>
    %166 = arith.mulf %154, %165 : vector<8x128xf32>
    %167 = arith.addf %163, %166 : vector<8x128xf32>
    %168 = math.tanh %167 : vector<8x128xf32>
    %cst_42 = arith.constant 1.000000e+00 : f32
    %169 = vector.broadcast %cst_42 : f32 to vector<8x128xf32>
    %170 = arith.subf %169, %162 : vector<8x128xf32>
    %171 = arith.mulf %170, %168 : vector<8x128xf32>
    %172 = arith.mulf %162, %109 : vector<8x128xf32>
    %173 = arith.addf %171, %172 : vector<8x128xf32>
    %174 = vector.shape_cast %146 : vector<8x1xi1> to vector<8x1xi1>
    %175 = vector.broadcast %174 : vector<8x1xi1> to vector<8x128xi1>
    %176 = arith.select %175, %173, %109 : vector<8x128xi1>, vector<8x128xf32>
    %177 = tpu.concatenate %176, %142 in 1 : vector<8x128xf32>, vector<8x128xf32> -> vector<8x256xf32>
    %178 = arith.truncf %177 : vector<8x256xf32> to vector<8x256xbf16>
    %c0_43 = arith.constant 0 : index
    %c0_44 = arith.constant 0 : index
    %179 = vector.load %arg4[%c0_43, %c0_44] : memref<256x896xbf16, #tpu.memory_space<vmem>>, vector<256x896xbf16>
    %cst_45 = arith.constant dense<0.000000e+00> : vector<8x896xf32>
    %180 = tpu.matmul %178, %179, %cst_45 {dimension_numbers = #tpu.dot_dimension_numbers<[1], [0], [0], [1], [0, 0, 1, 1], [], []>} : vector<8x256xbf16>, vector<256x896xbf16>, vector<8x896xf32> -> vector<8x896xf32>
    %181 = vector.extract_strided_slice %180 {offsets = [0, 384], sizes = [8, 512], strides = [1, 1]} : vector<8x896xf32> to vector<8x512xf32>
    %182 = arith.addf %181, %15 : vector<8x512xf32>
    %cst_46 = arith.constant 2.000000e+00 : f32
    %183 = vector.broadcast %cst_46 : f32 to vector<8x1xf32>
    %184 = arith.cmpf ogt, %9, %183 : vector<8x1xf32>
    %185 = vector.extract_strided_slice %182 {offsets = [0, 0], sizes = [8, 128], strides = [1, 1]} : vector<8x512xf32> to vector<8x128xf32>
    %186 = arith.negf %185 : vector<8x128xf32>
    %187 = math.exp %186 : vector<8x128xf32>
    %cst_47 = arith.constant 1.000000e+00 : f32
    %188 = vector.broadcast %cst_47 : f32 to vector<8x128xf32>
    %189 = arith.addf %188, %187 : vector<8x128xf32>
    %190 = arith.divf %188, %189 : vector<8x128xf32>
    %191 = vector.extract_strided_slice %182 {offsets = [0, 128], sizes = [8, 128], strides = [1, 1]} : vector<8x512xf32> to vector<8x128xf32>
    %192 = arith.negf %191 : vector<8x128xf32>
    %193 = math.exp %192 : vector<8x128xf32>
    %cst_48 = arith.constant 1.000000e+00 : f32
    %194 = vector.broadcast %cst_48 : f32 to vector<8x128xf32>
    %195 = arith.addf %194, %193 : vector<8x128xf32>
    %196 = arith.divf %194, %195 : vector<8x128xf32>
    %197 = vector.extract_strided_slice %182 {offsets = [0, 256], sizes = [8, 128], strides = [1, 1]} : vector<8x512xf32> to vector<8x128xf32>
    %198 = vector.extract_strided_slice %182 {offsets = [0, 384], sizes = [8, 128], strides = [1, 1]} : vector<8x512xf32> to vector<8x128xf32>
    %199 = arith.mulf %190, %198 : vector<8x128xf32>
    %200 = arith.addf %197, %199 : vector<8x128xf32>
    %201 = math.tanh %200 : vector<8x128xf32>
    %cst_49 = arith.constant 1.000000e+00 : f32
    %202 = vector.broadcast %cst_49 : f32 to vector<8x128xf32>
    %203 = arith.subf %202, %196 : vector<8x128xf32>
    %204 = arith.mulf %203, %201 : vector<8x128xf32>
    %205 = arith.mulf %196, %142 : vector<8x128xf32>
    %206 = arith.addf %204, %205 : vector<8x128xf32>
    %207 = vector.shape_cast %184 : vector<8x1xi1> to vector<8x1xi1>
    %208 = vector.broadcast %207 : vector<8x1xi1> to vector<8x128xi1>
    %209 = arith.select %208, %206, %142 : vector<8x128xi1>, vector<8x128xf32>
    %c24 = arith.constant 24 : index
    %c0_50 = arith.constant 0 : index
    %210 = vector.load %arg9[%c24, %c0_50] : memref<64x384xf32, #tpu.memory_space<vmem>>, vector<8x384xf32>
    %211 = vector.extract_strided_slice %180 {offsets = [0, 0], sizes = [8, 384], strides = [1, 1]} : vector<8x896xf32> to vector<8x384xf32>
    %cst_51 = arith.constant 3.000000e+00 : f32
    %212 = vector.broadcast %cst_51 : f32 to vector<8x1xf32>
    %213 = arith.cmpf ogt, %9, %212 : vector<8x1xf32>
    %214 = vector.extract_strided_slice %210 {offsets = [0, 0], sizes = [8, 128], strides = [1, 1]} : vector<8x384xf32> to vector<8x128xf32>
    %215 = vector.extract_strided_slice %211 {offsets = [0, 0], sizes = [8, 128], strides = [1, 1]} : vector<8x384xf32> to vector<8x128xf32>
    %216 = arith.addf %214, %215 : vector<8x128xf32>
    %217 = arith.negf %216 : vector<8x128xf32>
    %218 = math.exp %217 : vector<8x128xf32>
    %cst_52 = arith.constant 1.000000e+00 : f32
    %219 = vector.broadcast %cst_52 : f32 to vector<8x128xf32>
    %220 = arith.addf %219, %218 : vector<8x128xf32>
    %221 = arith.divf %219, %220 : vector<8x128xf32>
    %222 = vector.extract_strided_slice %210 {offsets = [0, 128], sizes = [8, 128], strides = [1, 1]} : vector<8x384xf32> to vector<8x128xf32>
    %223 = vector.extract_strided_slice %211 {offsets = [0, 128], sizes = [8, 128], strides = [1, 1]} : vector<8x384xf32> to vector<8x128xf32>
    %224 = arith.addf %222, %223 : vector<8x128xf32>
    %225 = arith.negf %224 : vector<8x128xf32>
    %226 = math.exp %225 : vector<8x128xf32>
    %cst_53 = arith.constant 1.000000e+00 : f32
    %227 = vector.broadcast %cst_53 : f32 to vector<8x128xf32>
    %228 = arith.addf %227, %226 : vector<8x128xf32>
    %229 = arith.divf %227, %228 : vector<8x128xf32>
    %230 = vector.extract_strided_slice %210 {offsets = [0, 256], sizes = [8, 128], strides = [1, 1]} : vector<8x384xf32> to vector<8x128xf32>
    %231 = vector.extract_strided_slice %211 {offsets = [0, 256], sizes = [8, 128], strides = [1, 1]} : vector<8x384xf32> to vector<8x128xf32>
    %232 = arith.addf %231, %12 : vector<8x128xf32>
    %233 = arith.mulf %221, %232 : vector<8x128xf32>
    %234 = arith.addf %230, %233 : vector<8x128xf32>
    %235 = math.tanh %234 : vector<8x128xf32>
    %cst_54 = arith.constant 1.000000e+00 : f32
    %236 = vector.broadcast %cst_54 : f32 to vector<8x128xf32>
    %237 = arith.subf %236, %229 : vector<8x128xf32>
    %238 = arith.mulf %237, %235 : vector<8x128xf32>
    %239 = arith.mulf %229, %176 : vector<8x128xf32>
    %240 = arith.addf %238, %239 : vector<8x128xf32>
    %241 = vector.shape_cast %213 : vector<8x1xi1> to vector<8x1xi1>
    %242 = vector.broadcast %241 : vector<8x1xi1> to vector<8x128xi1>
    %243 = arith.select %242, %240, %176 : vector<8x128xi1>, vector<8x128xf32>
    %244 = tpu.concatenate %243, %209 in 1 : vector<8x128xf32>, vector<8x128xf32> -> vector<8x256xf32>
    %245 = arith.truncf %244 : vector<8x256xf32> to vector<8x256xbf16>
    %c0_55 = arith.constant 0 : index
    %c0_56 = arith.constant 0 : index
    %246 = vector.load %arg4[%c0_55, %c0_56] : memref<256x896xbf16, #tpu.memory_space<vmem>>, vector<256x896xbf16>
    %cst_57 = arith.constant dense<0.000000e+00> : vector<8x896xf32>
    %247 = tpu.matmul %245, %246, %cst_57 {dimension_numbers = #tpu.dot_dimension_numbers<[1], [0], [0], [1], [0, 0, 1, 1], [], []>} : vector<8x256xbf16>, vector<256x896xbf16>, vector<8x896xf32> -> vector<8x896xf32>
    %248 = vector.extract_strided_slice %247 {offsets = [0, 384], sizes = [8, 512], strides = [1, 1]} : vector<8x896xf32> to vector<8x512xf32>
    %249 = arith.addf %248, %15 : vector<8x512xf32>
    %cst_58 = arith.constant 3.000000e+00 : f32
    %250 = vector.broadcast %cst_58 : f32 to vector<8x1xf32>
    %251 = arith.cmpf ogt, %9, %250 : vector<8x1xf32>
    %252 = vector.extract_strided_slice %249 {offsets = [0, 0], sizes = [8, 128], strides = [1, 1]} : vector<8x512xf32> to vector<8x128xf32>
    %253 = arith.negf %252 : vector<8x128xf32>
    %254 = math.exp %253 : vector<8x128xf32>
    %cst_59 = arith.constant 1.000000e+00 : f32
    %255 = vector.broadcast %cst_59 : f32 to vector<8x128xf32>
    %256 = arith.addf %255, %254 : vector<8x128xf32>
    %257 = arith.divf %255, %256 : vector<8x128xf32>
    %258 = vector.extract_strided_slice %249 {offsets = [0, 128], sizes = [8, 128], strides = [1, 1]} : vector<8x512xf32> to vector<8x128xf32>
    %259 = arith.negf %258 : vector<8x128xf32>
    %260 = math.exp %259 : vector<8x128xf32>
    %cst_60 = arith.constant 1.000000e+00 : f32
    %261 = vector.broadcast %cst_60 : f32 to vector<8x128xf32>
    %262 = arith.addf %261, %260 : vector<8x128xf32>
    %263 = arith.divf %261, %262 : vector<8x128xf32>
    %264 = vector.extract_strided_slice %249 {offsets = [0, 256], sizes = [8, 128], strides = [1, 1]} : vector<8x512xf32> to vector<8x128xf32>
    %265 = vector.extract_strided_slice %249 {offsets = [0, 384], sizes = [8, 128], strides = [1, 1]} : vector<8x512xf32> to vector<8x128xf32>
    %266 = arith.mulf %257, %265 : vector<8x128xf32>
    %267 = arith.addf %264, %266 : vector<8x128xf32>
    %268 = math.tanh %267 : vector<8x128xf32>
    %cst_61 = arith.constant 1.000000e+00 : f32
    %269 = vector.broadcast %cst_61 : f32 to vector<8x128xf32>
    %270 = arith.subf %269, %263 : vector<8x128xf32>
    %271 = arith.mulf %270, %268 : vector<8x128xf32>
    %272 = arith.mulf %263, %209 : vector<8x128xf32>
    %273 = arith.addf %271, %272 : vector<8x128xf32>
    %274 = vector.shape_cast %251 : vector<8x1xi1> to vector<8x1xi1>
    %275 = vector.broadcast %274 : vector<8x1xi1> to vector<8x128xi1>
    %276 = arith.select %275, %273, %209 : vector<8x128xi1>, vector<8x128xf32>
    %c32 = arith.constant 32 : index
    %c0_62 = arith.constant 0 : index
    %277 = vector.load %arg9[%c32, %c0_62] : memref<64x384xf32, #tpu.memory_space<vmem>>, vector<8x384xf32>
    %278 = vector.extract_strided_slice %247 {offsets = [0, 0], sizes = [8, 384], strides = [1, 1]} : vector<8x896xf32> to vector<8x384xf32>
    %cst_63 = arith.constant 4.000000e+00 : f32
    %279 = vector.broadcast %cst_63 : f32 to vector<8x1xf32>
    %280 = arith.cmpf ogt, %9, %279 : vector<8x1xf32>
    %281 = vector.extract_strided_slice %277 {offsets = [0, 0], sizes = [8, 128], strides = [1, 1]} : vector<8x384xf32> to vector<8x128xf32>
    %282 = vector.extract_strided_slice %278 {offsets = [0, 0], sizes = [8, 128], strides = [1, 1]} : vector<8x384xf32> to vector<8x128xf32>
    %283 = arith.addf %281, %282 : vector<8x128xf32>
    %284 = arith.negf %283 : vector<8x128xf32>
    %285 = math.exp %284 : vector<8x128xf32>
    %cst_64 = arith.constant 1.000000e+00 : f32
    %286 = vector.broadcast %cst_64 : f32 to vector<8x128xf32>
    %287 = arith.addf %286, %285 : vector<8x128xf32>
    %288 = arith.divf %286, %287 : vector<8x128xf32>
    %289 = vector.extract_strided_slice %277 {offsets = [0, 128], sizes = [8, 128], strides = [1, 1]} : vector<8x384xf32> to vector<8x128xf32>
    %290 = vector.extract_strided_slice %278 {offsets = [0, 128], sizes = [8, 128], strides = [1, 1]} : vector<8x384xf32> to vector<8x128xf32>
    %291 = arith.addf %289, %290 : vector<8x128xf32>
    %292 = arith.negf %291 : vector<8x128xf32>
    %293 = math.exp %292 : vector<8x128xf32>
    %cst_65 = arith.constant 1.000000e+00 : f32
    %294 = vector.broadcast %cst_65 : f32 to vector<8x128xf32>
    %295 = arith.addf %294, %293 : vector<8x128xf32>
    %296 = arith.divf %294, %295 : vector<8x128xf32>
    %297 = vector.extract_strided_slice %277 {offsets = [0, 256], sizes = [8, 128], strides = [1, 1]} : vector<8x384xf32> to vector<8x128xf32>
    %298 = vector.extract_strided_slice %278 {offsets = [0, 256], sizes = [8, 128], strides = [1, 1]} : vector<8x384xf32> to vector<8x128xf32>
    %299 = arith.addf %298, %12 : vector<8x128xf32>
    %300 = arith.mulf %288, %299 : vector<8x128xf32>
    %301 = arith.addf %297, %300 : vector<8x128xf32>
    %302 = math.tanh %301 : vector<8x128xf32>
    %cst_66 = arith.constant 1.000000e+00 : f32
    %303 = vector.broadcast %cst_66 : f32 to vector<8x128xf32>
    %304 = arith.subf %303, %296 : vector<8x128xf32>
    %305 = arith.mulf %304, %302 : vector<8x128xf32>
    %306 = arith.mulf %296, %243 : vector<8x128xf32>
    %307 = arith.addf %305, %306 : vector<8x128xf32>
    %308 = vector.shape_cast %280 : vector<8x1xi1> to vector<8x1xi1>
    %309 = vector.broadcast %308 : vector<8x1xi1> to vector<8x128xi1>
    %310 = arith.select %309, %307, %243 : vector<8x128xi1>, vector<8x128xf32>
    %311 = tpu.concatenate %310, %276 in 1 : vector<8x128xf32>, vector<8x128xf32> -> vector<8x256xf32>
    %312 = arith.truncf %311 : vector<8x256xf32> to vector<8x256xbf16>
    %c0_67 = arith.constant 0 : index
    %c0_68 = arith.constant 0 : index
    %313 = vector.load %arg4[%c0_67, %c0_68] : memref<256x896xbf16, #tpu.memory_space<vmem>>, vector<256x896xbf16>
    %cst_69 = arith.constant dense<0.000000e+00> : vector<8x896xf32>
    %314 = tpu.matmul %312, %313, %cst_69 {dimension_numbers = #tpu.dot_dimension_numbers<[1], [0], [0], [1], [0, 0, 1, 1], [], []>} : vector<8x256xbf16>, vector<256x896xbf16>, vector<8x896xf32> -> vector<8x896xf32>
    %315 = vector.extract_strided_slice %314 {offsets = [0, 384], sizes = [8, 512], strides = [1, 1]} : vector<8x896xf32> to vector<8x512xf32>
    %316 = arith.addf %315, %15 : vector<8x512xf32>
    %cst_70 = arith.constant 4.000000e+00 : f32
    %317 = vector.broadcast %cst_70 : f32 to vector<8x1xf32>
    %318 = arith.cmpf ogt, %9, %317 : vector<8x1xf32>
    %319 = vector.extract_strided_slice %316 {offsets = [0, 0], sizes = [8, 128], strides = [1, 1]} : vector<8x512xf32> to vector<8x128xf32>
    %320 = arith.negf %319 : vector<8x128xf32>
    %321 = math.exp %320 : vector<8x128xf32>
    %cst_71 = arith.constant 1.000000e+00 : f32
    %322 = vector.broadcast %cst_71 : f32 to vector<8x128xf32>
    %323 = arith.addf %322, %321 : vector<8x128xf32>
    %324 = arith.divf %322, %323 : vector<8x128xf32>
    %325 = vector.extract_strided_slice %316 {offsets = [0, 128], sizes = [8, 128], strides = [1, 1]} : vector<8x512xf32> to vector<8x128xf32>
    %326 = arith.negf %325 : vector<8x128xf32>
    %327 = math.exp %326 : vector<8x128xf32>
    %cst_72 = arith.constant 1.000000e+00 : f32
    %328 = vector.broadcast %cst_72 : f32 to vector<8x128xf32>
    %329 = arith.addf %328, %327 : vector<8x128xf32>
    %330 = arith.divf %328, %329 : vector<8x128xf32>
    %331 = vector.extract_strided_slice %316 {offsets = [0, 256], sizes = [8, 128], strides = [1, 1]} : vector<8x512xf32> to vector<8x128xf32>
    %332 = vector.extract_strided_slice %316 {offsets = [0, 384], sizes = [8, 128], strides = [1, 1]} : vector<8x512xf32> to vector<8x128xf32>
    %333 = arith.mulf %324, %332 : vector<8x128xf32>
    %334 = arith.addf %331, %333 : vector<8x128xf32>
    %335 = math.tanh %334 : vector<8x128xf32>
    %cst_73 = arith.constant 1.000000e+00 : f32
    %336 = vector.broadcast %cst_73 : f32 to vector<8x128xf32>
    %337 = arith.subf %336, %330 : vector<8x128xf32>
    %338 = arith.mulf %337, %335 : vector<8x128xf32>
    %339 = arith.mulf %330, %276 : vector<8x128xf32>
    %340 = arith.addf %338, %339 : vector<8x128xf32>
    %341 = vector.shape_cast %318 : vector<8x1xi1> to vector<8x1xi1>
    %342 = vector.broadcast %341 : vector<8x1xi1> to vector<8x128xi1>
    %343 = arith.select %342, %340, %276 : vector<8x128xi1>, vector<8x128xf32>
    %c40 = arith.constant 40 : index
    %c0_74 = arith.constant 0 : index
    %344 = vector.load %arg9[%c40, %c0_74] : memref<64x384xf32, #tpu.memory_space<vmem>>, vector<8x384xf32>
    %345 = vector.extract_strided_slice %314 {offsets = [0, 0], sizes = [8, 384], strides = [1, 1]} : vector<8x896xf32> to vector<8x384xf32>
    %cst_75 = arith.constant 5.000000e+00 : f32
    %346 = vector.broadcast %cst_75 : f32 to vector<8x1xf32>
    %347 = arith.cmpf ogt, %9, %346 : vector<8x1xf32>
    %348 = vector.extract_strided_slice %344 {offsets = [0, 0], sizes = [8, 128], strides = [1, 1]} : vector<8x384xf32> to vector<8x128xf32>
    %349 = vector.extract_strided_slice %345 {offsets = [0, 0], sizes = [8, 128], strides = [1, 1]} : vector<8x384xf32> to vector<8x128xf32>
    %350 = arith.addf %348, %349 : vector<8x128xf32>
    %351 = arith.negf %350 : vector<8x128xf32>
    %352 = math.exp %351 : vector<8x128xf32>
    %cst_76 = arith.constant 1.000000e+00 : f32
    %353 = vector.broadcast %cst_76 : f32 to vector<8x128xf32>
    %354 = arith.addf %353, %352 : vector<8x128xf32>
    %355 = arith.divf %353, %354 : vector<8x128xf32>
    %356 = vector.extract_strided_slice %344 {offsets = [0, 128], sizes = [8, 128], strides = [1, 1]} : vector<8x384xf32> to vector<8x128xf32>
    %357 = vector.extract_strided_slice %345 {offsets = [0, 128], sizes = [8, 128], strides = [1, 1]} : vector<8x384xf32> to vector<8x128xf32>
    %358 = arith.addf %356, %357 : vector<8x128xf32>
    %359 = arith.negf %358 : vector<8x128xf32>
    %360 = math.exp %359 : vector<8x128xf32>
    %cst_77 = arith.constant 1.000000e+00 : f32
    %361 = vector.broadcast %cst_77 : f32 to vector<8x128xf32>
    %362 = arith.addf %361, %360 : vector<8x128xf32>
    %363 = arith.divf %361, %362 : vector<8x128xf32>
    %364 = vector.extract_strided_slice %344 {offsets = [0, 256], sizes = [8, 128], strides = [1, 1]} : vector<8x384xf32> to vector<8x128xf32>
    %365 = vector.extract_strided_slice %345 {offsets = [0, 256], sizes = [8, 128], strides = [1, 1]} : vector<8x384xf32> to vector<8x128xf32>
    %366 = arith.addf %365, %12 : vector<8x128xf32>
    %367 = arith.mulf %355, %366 : vector<8x128xf32>
    %368 = arith.addf %364, %367 : vector<8x128xf32>
    %369 = math.tanh %368 : vector<8x128xf32>
    %cst_78 = arith.constant 1.000000e+00 : f32
    %370 = vector.broadcast %cst_78 : f32 to vector<8x128xf32>
    %371 = arith.subf %370, %363 : vector<8x128xf32>
    %372 = arith.mulf %371, %369 : vector<8x128xf32>
    %373 = arith.mulf %363, %310 : vector<8x128xf32>
    %374 = arith.addf %372, %373 : vector<8x128xf32>
    %375 = vector.shape_cast %347 : vector<8x1xi1> to vector<8x1xi1>
    %376 = vector.broadcast %375 : vector<8x1xi1> to vector<8x128xi1>
    %377 = arith.select %376, %374, %310 : vector<8x128xi1>, vector<8x128xf32>
    %378 = tpu.concatenate %377, %343 in 1 : vector<8x128xf32>, vector<8x128xf32> -> vector<8x256xf32>
    %379 = arith.truncf %378 : vector<8x256xf32> to vector<8x256xbf16>
    %c0_79 = arith.constant 0 : index
    %c0_80 = arith.constant 0 : index
    %380 = vector.load %arg4[%c0_79, %c0_80] : memref<256x896xbf16, #tpu.memory_space<vmem>>, vector<256x896xbf16>
    %cst_81 = arith.constant dense<0.000000e+00> : vector<8x896xf32>
    %381 = tpu.matmul %379, %380, %cst_81 {dimension_numbers = #tpu.dot_dimension_numbers<[1], [0], [0], [1], [0, 0, 1, 1], [], []>} : vector<8x256xbf16>, vector<256x896xbf16>, vector<8x896xf32> -> vector<8x896xf32>
    %382 = vector.extract_strided_slice %381 {offsets = [0, 384], sizes = [8, 512], strides = [1, 1]} : vector<8x896xf32> to vector<8x512xf32>
    %383 = arith.addf %382, %15 : vector<8x512xf32>
    %cst_82 = arith.constant 5.000000e+00 : f32
    %384 = vector.broadcast %cst_82 : f32 to vector<8x1xf32>
    %385 = arith.cmpf ogt, %9, %384 : vector<8x1xf32>
    %386 = vector.extract_strided_slice %383 {offsets = [0, 0], sizes = [8, 128], strides = [1, 1]} : vector<8x512xf32> to vector<8x128xf32>
    %387 = arith.negf %386 : vector<8x128xf32>
    %388 = math.exp %387 : vector<8x128xf32>
    %cst_83 = arith.constant 1.000000e+00 : f32
    %389 = vector.broadcast %cst_83 : f32 to vector<8x128xf32>
    %390 = arith.addf %389, %388 : vector<8x128xf32>
    %391 = arith.divf %389, %390 : vector<8x128xf32>
    %392 = vector.extract_strided_slice %383 {offsets = [0, 128], sizes = [8, 128], strides = [1, 1]} : vector<8x512xf32> to vector<8x128xf32>
    %393 = arith.negf %392 : vector<8x128xf32>
    %394 = math.exp %393 : vector<8x128xf32>
    %cst_84 = arith.constant 1.000000e+00 : f32
    %395 = vector.broadcast %cst_84 : f32 to vector<8x128xf32>
    %396 = arith.addf %395, %394 : vector<8x128xf32>
    %397 = arith.divf %395, %396 : vector<8x128xf32>
    %398 = vector.extract_strided_slice %383 {offsets = [0, 256], sizes = [8, 128], strides = [1, 1]} : vector<8x512xf32> to vector<8x128xf32>
    %399 = vector.extract_strided_slice %383 {offsets = [0, 384], sizes = [8, 128], strides = [1, 1]} : vector<8x512xf32> to vector<8x128xf32>
    %400 = arith.mulf %391, %399 : vector<8x128xf32>
    %401 = arith.addf %398, %400 : vector<8x128xf32>
    %402 = math.tanh %401 : vector<8x128xf32>
    %cst_85 = arith.constant 1.000000e+00 : f32
    %403 = vector.broadcast %cst_85 : f32 to vector<8x128xf32>
    %404 = arith.subf %403, %397 : vector<8x128xf32>
    %405 = arith.mulf %404, %402 : vector<8x128xf32>
    %406 = arith.mulf %397, %343 : vector<8x128xf32>
    %407 = arith.addf %405, %406 : vector<8x128xf32>
    %408 = vector.shape_cast %385 : vector<8x1xi1> to vector<8x1xi1>
    %409 = vector.broadcast %408 : vector<8x1xi1> to vector<8x128xi1>
    %410 = arith.select %409, %407, %343 : vector<8x128xi1>, vector<8x128xf32>
    %c48 = arith.constant 48 : index
    %c0_86 = arith.constant 0 : index
    %411 = vector.load %arg9[%c48, %c0_86] : memref<64x384xf32, #tpu.memory_space<vmem>>, vector<8x384xf32>
    %412 = vector.extract_strided_slice %381 {offsets = [0, 0], sizes = [8, 384], strides = [1, 1]} : vector<8x896xf32> to vector<8x384xf32>
    %cst_87 = arith.constant 6.000000e+00 : f32
    %413 = vector.broadcast %cst_87 : f32 to vector<8x1xf32>
    %414 = arith.cmpf ogt, %9, %413 : vector<8x1xf32>
    %415 = vector.extract_strided_slice %411 {offsets = [0, 0], sizes = [8, 128], strides = [1, 1]} : vector<8x384xf32> to vector<8x128xf32>
    %416 = vector.extract_strided_slice %412 {offsets = [0, 0], sizes = [8, 128], strides = [1, 1]} : vector<8x384xf32> to vector<8x128xf32>
    %417 = arith.addf %415, %416 : vector<8x128xf32>
    %418 = arith.negf %417 : vector<8x128xf32>
    %419 = math.exp %418 : vector<8x128xf32>
    %cst_88 = arith.constant 1.000000e+00 : f32
    %420 = vector.broadcast %cst_88 : f32 to vector<8x128xf32>
    %421 = arith.addf %420, %419 : vector<8x128xf32>
    %422 = arith.divf %420, %421 : vector<8x128xf32>
    %423 = vector.extract_strided_slice %411 {offsets = [0, 128], sizes = [8, 128], strides = [1, 1]} : vector<8x384xf32> to vector<8x128xf32>
    %424 = vector.extract_strided_slice %412 {offsets = [0, 128], sizes = [8, 128], strides = [1, 1]} : vector<8x384xf32> to vector<8x128xf32>
    %425 = arith.addf %423, %424 : vector<8x128xf32>
    %426 = arith.negf %425 : vector<8x128xf32>
    %427 = math.exp %426 : vector<8x128xf32>
    %cst_89 = arith.constant 1.000000e+00 : f32
    %428 = vector.broadcast %cst_89 : f32 to vector<8x128xf32>
    %429 = arith.addf %428, %427 : vector<8x128xf32>
    %430 = arith.divf %428, %429 : vector<8x128xf32>
    %431 = vector.extract_strided_slice %411 {offsets = [0, 256], sizes = [8, 128], strides = [1, 1]} : vector<8x384xf32> to vector<8x128xf32>
    %432 = vector.extract_strided_slice %412 {offsets = [0, 256], sizes = [8, 128], strides = [1, 1]} : vector<8x384xf32> to vector<8x128xf32>
    %433 = arith.addf %432, %12 : vector<8x128xf32>
    %434 = arith.mulf %422, %433 : vector<8x128xf32>
    %435 = arith.addf %431, %434 : vector<8x128xf32>
    %436 = math.tanh %435 : vector<8x128xf32>
    %cst_90 = arith.constant 1.000000e+00 : f32
    %437 = vector.broadcast %cst_90 : f32 to vector<8x128xf32>
    %438 = arith.subf %437, %430 : vector<8x128xf32>
    %439 = arith.mulf %438, %436 : vector<8x128xf32>
    %440 = arith.mulf %430, %377 : vector<8x128xf32>
    %441 = arith.addf %439, %440 : vector<8x128xf32>
    %442 = vector.shape_cast %414 : vector<8x1xi1> to vector<8x1xi1>
    %443 = vector.broadcast %442 : vector<8x1xi1> to vector<8x128xi1>
    %444 = arith.select %443, %441, %377 : vector<8x128xi1>, vector<8x128xf32>
    %445 = tpu.concatenate %444, %410 in 1 : vector<8x128xf32>, vector<8x128xf32> -> vector<8x256xf32>
    %446 = arith.truncf %445 : vector<8x256xf32> to vector<8x256xbf16>
    %c0_91 = arith.constant 0 : index
    %c0_92 = arith.constant 0 : index
    %447 = vector.load %arg4[%c0_91, %c0_92] : memref<256x896xbf16, #tpu.memory_space<vmem>>, vector<256x896xbf16>
    %cst_93 = arith.constant dense<0.000000e+00> : vector<8x896xf32>
    %448 = tpu.matmul %446, %447, %cst_93 {dimension_numbers = #tpu.dot_dimension_numbers<[1], [0], [0], [1], [0, 0, 1, 1], [], []>} : vector<8x256xbf16>, vector<256x896xbf16>, vector<8x896xf32> -> vector<8x896xf32>
    %449 = vector.extract_strided_slice %448 {offsets = [0, 384], sizes = [8, 512], strides = [1, 1]} : vector<8x896xf32> to vector<8x512xf32>
    %450 = arith.addf %449, %15 : vector<8x512xf32>
    %cst_94 = arith.constant 6.000000e+00 : f32
    %451 = vector.broadcast %cst_94 : f32 to vector<8x1xf32>
    %452 = arith.cmpf ogt, %9, %451 : vector<8x1xf32>
    %453 = vector.extract_strided_slice %450 {offsets = [0, 0], sizes = [8, 128], strides = [1, 1]} : vector<8x512xf32> to vector<8x128xf32>
    %454 = arith.negf %453 : vector<8x128xf32>
    %455 = math.exp %454 : vector<8x128xf32>
    %cst_95 = arith.constant 1.000000e+00 : f32
    %456 = vector.broadcast %cst_95 : f32 to vector<8x128xf32>
    %457 = arith.addf %456, %455 : vector<8x128xf32>
    %458 = arith.divf %456, %457 : vector<8x128xf32>
    %459 = vector.extract_strided_slice %450 {offsets = [0, 128], sizes = [8, 128], strides = [1, 1]} : vector<8x512xf32> to vector<8x128xf32>
    %460 = arith.negf %459 : vector<8x128xf32>
    %461 = math.exp %460 : vector<8x128xf32>
    %cst_96 = arith.constant 1.000000e+00 : f32
    %462 = vector.broadcast %cst_96 : f32 to vector<8x128xf32>
    %463 = arith.addf %462, %461 : vector<8x128xf32>
    %464 = arith.divf %462, %463 : vector<8x128xf32>
    %465 = vector.extract_strided_slice %450 {offsets = [0, 256], sizes = [8, 128], strides = [1, 1]} : vector<8x512xf32> to vector<8x128xf32>
    %466 = vector.extract_strided_slice %450 {offsets = [0, 384], sizes = [8, 128], strides = [1, 1]} : vector<8x512xf32> to vector<8x128xf32>
    %467 = arith.mulf %458, %466 : vector<8x128xf32>
    %468 = arith.addf %465, %467 : vector<8x128xf32>
    %469 = math.tanh %468 : vector<8x128xf32>
    %cst_97 = arith.constant 1.000000e+00 : f32
    %470 = vector.broadcast %cst_97 : f32 to vector<8x128xf32>
    %471 = arith.subf %470, %464 : vector<8x128xf32>
    %472 = arith.mulf %471, %469 : vector<8x128xf32>
    %473 = arith.mulf %464, %410 : vector<8x128xf32>
    %474 = arith.addf %472, %473 : vector<8x128xf32>
    %475 = vector.shape_cast %452 : vector<8x1xi1> to vector<8x1xi1>
    %476 = vector.broadcast %475 : vector<8x1xi1> to vector<8x128xi1>
    %477 = arith.select %476, %474, %410 : vector<8x128xi1>, vector<8x128xf32>
    %c56 = arith.constant 56 : index
    %c0_98 = arith.constant 0 : index
    %478 = vector.load %arg9[%c56, %c0_98] : memref<64x384xf32, #tpu.memory_space<vmem>>, vector<8x384xf32>
    %479 = vector.extract_strided_slice %448 {offsets = [0, 0], sizes = [8, 384], strides = [1, 1]} : vector<8x896xf32> to vector<8x384xf32>
    %cst_99 = arith.constant 7.000000e+00 : f32
    %480 = vector.broadcast %cst_99 : f32 to vector<8x1xf32>
    %481 = arith.cmpf ogt, %9, %480 : vector<8x1xf32>
    %482 = vector.extract_strided_slice %478 {offsets = [0, 0], sizes = [8, 128], strides = [1, 1]} : vector<8x384xf32> to vector<8x128xf32>
    %483 = vector.extract_strided_slice %479 {offsets = [0, 0], sizes = [8, 128], strides = [1, 1]} : vector<8x384xf32> to vector<8x128xf32>
    %484 = arith.addf %482, %483 : vector<8x128xf32>
    %485 = arith.negf %484 : vector<8x128xf32>
    %486 = math.exp %485 : vector<8x128xf32>
    %cst_100 = arith.constant 1.000000e+00 : f32
    %487 = vector.broadcast %cst_100 : f32 to vector<8x128xf32>
    %488 = arith.addf %487, %486 : vector<8x128xf32>
    %489 = arith.divf %487, %488 : vector<8x128xf32>
    %490 = vector.extract_strided_slice %478 {offsets = [0, 128], sizes = [8, 128], strides = [1, 1]} : vector<8x384xf32> to vector<8x128xf32>
    %491 = vector.extract_strided_slice %479 {offsets = [0, 128], sizes = [8, 128], strides = [1, 1]} : vector<8x384xf32> to vector<8x128xf32>
    %492 = arith.addf %490, %491 : vector<8x128xf32>
    %493 = arith.negf %492 : vector<8x128xf32>
    %494 = math.exp %493 : vector<8x128xf32>
    %cst_101 = arith.constant 1.000000e+00 : f32
    %495 = vector.broadcast %cst_101 : f32 to vector<8x128xf32>
    %496 = arith.addf %495, %494 : vector<8x128xf32>
    %497 = arith.divf %495, %496 : vector<8x128xf32>
    %498 = vector.extract_strided_slice %478 {offsets = [0, 256], sizes = [8, 128], strides = [1, 1]} : vector<8x384xf32> to vector<8x128xf32>
    %499 = vector.extract_strided_slice %479 {offsets = [0, 256], sizes = [8, 128], strides = [1, 1]} : vector<8x384xf32> to vector<8x128xf32>
    %500 = arith.addf %499, %12 : vector<8x128xf32>
    %501 = arith.mulf %489, %500 : vector<8x128xf32>
    %502 = arith.addf %498, %501 : vector<8x128xf32>
    %503 = math.tanh %502 : vector<8x128xf32>
    %cst_102 = arith.constant 1.000000e+00 : f32
    %504 = vector.broadcast %cst_102 : f32 to vector<8x128xf32>
    %505 = arith.subf %504, %497 : vector<8x128xf32>
    %506 = arith.mulf %505, %503 : vector<8x128xf32>
    %507 = arith.mulf %497, %444 : vector<8x128xf32>
    %508 = arith.addf %506, %507 : vector<8x128xf32>
    %509 = vector.shape_cast %481 : vector<8x1xi1> to vector<8x1xi1>
    %510 = vector.broadcast %509 : vector<8x1xi1> to vector<8x128xi1>
    %511 = arith.select %510, %508, %444 : vector<8x128xi1>, vector<8x128xf32>
    %512 = tpu.concatenate %511, %477 in 1 : vector<8x128xf32>, vector<8x128xf32> -> vector<8x256xf32>
    %513 = arith.truncf %512 : vector<8x256xf32> to vector<8x256xbf16>
    %c0_103 = arith.constant 0 : index
    %c0_104 = arith.constant 0 : index
    %514 = vector.load %arg4[%c0_103, %c0_104] : memref<256x896xbf16, #tpu.memory_space<vmem>>, vector<256x896xbf16>
    %cst_105 = arith.constant dense<0.000000e+00> : vector<8x896xf32>
    %515 = tpu.matmul %513, %514, %cst_105 {dimension_numbers = #tpu.dot_dimension_numbers<[1], [0], [0], [1], [0, 0, 1, 1], [], []>} : vector<8x256xbf16>, vector<256x896xbf16>, vector<8x896xf32> -> vector<8x896xf32>
    %516 = vector.extract_strided_slice %515 {offsets = [0, 384], sizes = [8, 512], strides = [1, 1]} : vector<8x896xf32> to vector<8x512xf32>
    %517 = arith.addf %516, %15 : vector<8x512xf32>
    %cst_106 = arith.constant 7.000000e+00 : f32
    %518 = vector.broadcast %cst_106 : f32 to vector<8x1xf32>
    %519 = arith.cmpf ogt, %9, %518 : vector<8x1xf32>
    %520 = vector.extract_strided_slice %517 {offsets = [0, 0], sizes = [8, 128], strides = [1, 1]} : vector<8x512xf32> to vector<8x128xf32>
    %521 = arith.negf %520 : vector<8x128xf32>
    %522 = math.exp %521 : vector<8x128xf32>
    %cst_107 = arith.constant 1.000000e+00 : f32
    %523 = vector.broadcast %cst_107 : f32 to vector<8x128xf32>
    %524 = arith.addf %523, %522 : vector<8x128xf32>
    %525 = arith.divf %523, %524 : vector<8x128xf32>
    %526 = vector.extract_strided_slice %517 {offsets = [0, 128], sizes = [8, 128], strides = [1, 1]} : vector<8x512xf32> to vector<8x128xf32>
    %527 = arith.negf %526 : vector<8x128xf32>
    %528 = math.exp %527 : vector<8x128xf32>
    %cst_108 = arith.constant 1.000000e+00 : f32
    %529 = vector.broadcast %cst_108 : f32 to vector<8x128xf32>
    %530 = arith.addf %529, %528 : vector<8x128xf32>
    %531 = arith.divf %529, %530 : vector<8x128xf32>
    %532 = vector.extract_strided_slice %517 {offsets = [0, 256], sizes = [8, 128], strides = [1, 1]} : vector<8x512xf32> to vector<8x128xf32>
    %533 = vector.extract_strided_slice %517 {offsets = [0, 384], sizes = [8, 128], strides = [1, 1]} : vector<8x512xf32> to vector<8x128xf32>
    %534 = arith.mulf %525, %533 : vector<8x128xf32>
    %535 = arith.addf %532, %534 : vector<8x128xf32>
    %536 = math.tanh %535 : vector<8x128xf32>
    %cst_109 = arith.constant 1.000000e+00 : f32
    %537 = vector.broadcast %cst_109 : f32 to vector<8x128xf32>
    %538 = arith.subf %537, %531 : vector<8x128xf32>
    %539 = arith.mulf %538, %536 : vector<8x128xf32>
    %540 = arith.mulf %531, %477 : vector<8x128xf32>
    %541 = arith.addf %539, %540 : vector<8x128xf32>
    %542 = vector.shape_cast %519 : vector<8x1xi1> to vector<8x1xi1>
    %543 = vector.broadcast %542 : vector<8x1xi1> to vector<8x128xi1>
    %544 = arith.select %543, %541, %477 : vector<8x128xi1>, vector<8x128xf32>
    %545 = tpu.concatenate %511, %544 in 0 : vector<8x128xf32>, vector<8x128xf32> -> vector<16x128xf32>
    %546 = arith.truncf %545 : vector<16x128xf32> to vector<16x128xbf16>
    %c0_110 = arith.constant 0 : index
    %c0_111 = arith.constant 0 : index
    %547 = vector.load %arg6[%c0_110, %c0_111] : memref<128x8xbf16, #tpu.memory_space<vmem>>, vector<128x8xbf16>
    %cst_112 = arith.constant dense<0.000000e+00> : vector<16x8xf32>
    %548 = tpu.matmul %546, %547, %cst_112 {dimension_numbers = #tpu.dot_dimension_numbers<[1], [0], [0], [1], [0, 0, 1, 1], [], []>} : vector<16x128xbf16>, vector<128x8xbf16>, vector<16x8xf32> -> vector<16x8xf32>
    %c0_113 = arith.constant 0 : index
    %c0_114 = arith.constant 0 : index
    %549 = vector.load %arg7[%c0_113, %c0_114] : memref<1x8xf32, #tpu.memory_space<vmem>>, vector<1x8xf32>
    %550 = vector.broadcast %549 : vector<1x8xf32> to vector<16x8xf32>
    %551 = arith.addf %548, %550 : vector<16x8xf32>
    %c0_115 = arith.constant 0 : index
    %c0_116 = arith.constant 0 : index
    %552 = vector.load %arg8[%c0_115, %c0_116] : memref<16x8xf32, #tpu.memory_space<vmem>>, vector<16x8xf32>
    tpu.vector_store %arg8[%c0_115, %c0_116], %551 {strides = array<i32>} : memref<16x8xf32, #tpu.memory_space<vmem>>, vector<16x8xf32>,
    return
  }
}

</mosaic_0001>

<bundles_post_ra>
// kernel: model_forward.1
= control target key start
LH: loop header
LB: loop body
LE: loop exit
PB: predicated region body
PF: predicated region fallthrough
CT: control target
= control target key end

     0   :  { %13 = vsyncpa [#allocation4], 0  ;;  %s6074_s0 = inlined_call_operand.vmem [shape: s32[64,1], index: 0, kind: input, shape index: {}]   ;;  %s6075_s1 = inlined_call_operand.vmem [shape: f32[8,1], index: 1, kind: input, shape index: {}]   ;;  %s6076_s2 = inlined_call_operand.hbm [shape: f32[128,384], index: 2, kind: input, shape index: {}]   ;;  %s6077_s3 = inlined_call_operand.vmem [shape: f32[1,128], index: 3, kind: input, shape index: {}]   ;;  %s6078_s4 = inlined_call_operand.hbm [shape: bf16[256,896], index: 4, kind: input, shape index: {}]   ;;  %s6079_s5 = inlined_call_operand.vmem [shape: f32[1,512], index: 5, kind: input, shape index: {}]   ;;  %s6080_s6 = inlined_call_operand.vmem [shape: bf16[128,8], index: 6, kind: input, shape index: {}]   ;;  %s6081_s7 = inlined_call_operand.vmem [shape: f32[1,8], index: 7, kind: input, shape index: {}]   ;;  %s6082_s8 = inlined_call_operand.vmem [shape: f32[16,8], index: 8, kind: output, shape index: {}]  }
   0x1   :  { %s23_s29 = sshll.u32 %s6076_s2, 4  ;;  %s24_s29 = int_to_ptr.hbm [resolvable:$true] %s23_s29 }
   0x2   :  { %14 = vsyncpa [#allocation6], 0  ;;  %s4313_s30 = smov [#allocation3]   ;;  %s38_s12 = sshll.u32 %s6078_s4, 4  ;;  %s39_s12 = int_to_ptr.hbm [resolvable:$true] %s38_s12 }
   0x3   :  { %s25_s9 = sshll.u32 %s4313_s30, 4  ;;  %s4314_s13 = smov 384   ;;  %s26_s9 = int_to_ptr.vmem [resolvable:$true] %s25_s9 }
   0x4   :  { %s4315_s14 = smov 24   ;;  %s4316_s15 = smov [#allocation5]  }
   0x5   :  { %31 = dma.hbm_to_vmem [thread:$0]  %s24_s29, 6144, %s26_s9, [#allocation4], %s4314_s13, %s4314_s13, %s4315_s14  }
   0x6   :  { %s40_s16 = sshll.u32 %s4316_s15, 4  ;;  %s4317_s17 = smov 448   ;;  %s41_s16 = int_to_ptr.vmem [resolvable:$true] %s40_s16 }
   0x7   :  { %s4318_s18 = smov 28  }
   0x8   :  { %46 = dma.hbm_to_vmem [thread:$0]  %s39_s12, 14336, %s41_s16, [#allocation6], %s4317_s17, %s4317_s17, %s4318_s18  }
   0x9   :  { %4309 = dma.done.wait [#allocation4], 6144  }
   0xa   :  { %4310 = vsyncadd [#allocation4], 4294961152 }
   0xb   :  { %4311 = dma.done.wait [#allocation6], 14336  }
   0xc   :  { %4312 = vsyncadd [#allocation6], 4294952960  ;;  %v4319_v0 = vmov 0   ;;  %v63_v1 = vld [vmem:[%s6074_s0] sm:$0xff]  ;;  %v65_v2 = vld [vmem:[%s6074_s0 + $0x10] sm:$0xff]  ;;  %v61_v59 = vlaneseq  ;;  %v6083_v62 = vmov 1.0  }
   0xd   :  { %4093 = vset.pattern.permute.xlu0 %v4319_v0  ;;  %4094 = vset.pattern.permute.xlu1 %v4319_v0  ;;  %v64_v3 = vld [vmem:[%s6074_s0 + $0x8] sm:$0xff]  ;;  %v66_v4 = vld [vmem:[%s6074_s0 + $0x18] sm:$0xff]  ;;  %v67_v5 = vld [vmem:[%s6074_s0 + $0x20] sm:$0xff] }
   0xe   :  { %4095 = vset.pattern.permute.xlu2 %v4319_v0  ;;  %72 = vperm.xlu0 %4093, %v63_v1   ;;  %v164_v6 = vld [vmem:[#allocation3 + $0x168] sm:$0xff]  ;;  %v165_v7 = vld [vmem:[#allocation3 + $0x170] sm:$0xff]  ;;  %v166_v8 = vld [vmem:[#allocation3 + $0x178] sm:$0xff]  ;;  %v4405_v60 = vand.u32 127, %v61_v59 }
   0xf   :  { %78 = vperm.xlu1 %4094, %v65_v2   ;;  %84 = vperm.xlu2 %4095, %v67_v5   ;;  %v161_v9 = vld [vmem:[#allocation3 + $0x150] sm:$0xff]  ;;  %v162_v10 = vld [vmem:[#allocation3 + $0x158] sm:$0xff]  ;;  %v163_v11 = vld [vmem:[#allocation3 + $0x160] sm:$0xff] }
  0x10   :  { %167 = vmatpush.msra.mxu0 %v164_v6  ;;  %208 = vmatpush.msra.mxu1 %v165_v7  ;;  %v158_v12 = vld [vmem:[#allocation3 + $0x138] sm:$0xff]  ;;  %v159_v13 = vld [vmem:[#allocation3 + $0x140] sm:$0xff]  ;;  %v160_v14 = vld [vmem:[#allocation3 + $0x148] sm:$0xff] }
  0x11   :  { %249 = vmatpush.msra.mxu2 %v166_v8  ;;  %v155_v15 = vld [vmem:[#allocation3 + $0x120] sm:$0xff]  ;;  %v68_v16 = vld [vmem:[%s6074_s0 + $0x28] sm:$0xff]  ;;  %v157_v18 = vld [vmem:[#allocation3 + $0x130] sm:$0xff] }
  0x12   :  { %168 = vmatpush.msra.mxu0 %v161_v9  ;;  %209 = vmatpush.msra.mxu1 %v162_v10  ;;  %v156_v17 = vld [vmem:[#allocation3 + $0x128] sm:$0xff]  ;;  %v4397_v20 = vld [vmem:[%s6075_s1] sm:$0xff]  ;;  %v153_v21 = vld [vmem:[#allocation3 + $0x110] sm:$0xff] }
  0x13   :  { %250 = vmatpush.msra.mxu2 %v163_v11  ;;  %v152_v19 = vld [vmem:[#allocation3 + $0x108] sm:$0xff]  ;;  %v154_v22 = vld [vmem:[#allocation3 + $0x118] sm:$0xff]  ;;  %v149_v23 = vld [vmem:[#allocation3 + $0xf0] sm:$0xff]  ;;  %vm1323_vm0 = vcmp.gt.f32.partialorder %v4397_v20, 1.0  ;;  %vm2199_vm1 = vcmp.gt.f32.partialorder %v4397_v20, 4.0  ;;  %vm3075_vm2 = vcmp.gt.f32.partialorder %v4397_v20, 7.0 }
  0x14   :  { %169 = vmatpush.msra.mxu0 %v158_v12  ;;  %210 = vmatpush.msra.mxu1 %v159_v13  ;;  %v150_v24 = vld [vmem:[#allocation3 + $0xf8] sm:$0xff]  ;;  %v151_v25 = vld [vmem:[#allocation3 + $0x100] sm:$0xff]  ;;  %v148_v28 = vld [vmem:[#allocation3 + $0xe8] sm:$0xff]  ;;  %v1372_v30 = vsel %vm1323_vm0, 1, %v4319_v0  ;;  %v2248_v43 = vsel %vm2199_vm1, 1, %v4319_v0  ;;  %v3124_v55 = vsel %vm3075_vm2, 1, %v4319_v0 }
  0x15   :  { %251 = vmatpush.msra.mxu2 %v160_v14  ;;  %v146_v26 = vld [vmem:[#allocation3 + $0xd8] sm:$0xff]  ;;  %v147_v27 = vld [vmem:[#allocation3 + $0xe0] sm:$0xff]  ;;  %v144_v31 = vld [vmem:[#allocation3 + $0xc8] sm:$0xff]  ;;  %vm373_vm5 = vcmp.gt.f32.partialorder %v4397_v20, 0.0  ;;  %vm1615_vm6 = vcmp.gt.f32.partialorder %v4397_v20, 2.0  ;;  %vm2491_vm7 = vcmp.gt.f32.partialorder %v4397_v20, 5.0 }
  0x16   :  { %75 = vperm.xlu0 %4093, %v64_v3   ;;  %170 = vmatpush.msra.mxu0 %v155_v15  ;;  %v143_v29 = vld [vmem:[#allocation3 + $0xc0] sm:$0xff]  ;;  %v145_v32 = vld [vmem:[#allocation3 + $0xd0] sm:$0xff]  ;;  %v140_v33 = vld [vmem:[#allocation3 + $0xa8] sm:$0xff]  ;;  %v376_v3 = vsel %vm373_vm5, 1, %v4319_v0  ;;  %v2540_v8 = vsel %vm2491_vm7, 1, %v4319_v0  ;;  %vm1907_vm10 = vcmp.gt.f32.partialorder %v4397_v20, 3.0 }
  0x17   :  { %81 = vperm.xlu1 %4094, %v66_v4   ;;  %211 = vmatpush.msra.mxu1 %v156_v17  ;;  %v141_v34 = vld [vmem:[#allocation3 + $0xb0] sm:$0xff]  ;;  %v142_v35 = vld [vmem:[#allocation3 + $0xb8] sm:$0xff]  ;;  %v139_v38 = vld [vmem:[#allocation3 + $0xa0] sm:$0xff]  ;;  %v1664_v4 = vsel %vm1615_vm6, 1, %v4319_v0  ;;  %vm2783_vm12 = vcmp.gt.f32.partialorder %v4397_v20, 6.0 }
  0x18   :  { %252 = vmatpush.msra.mxu2 %v157_v18  ;;  %171 = vmatpush.msra.mxu0 %v152_v19  ;;  %v137_v36 = vld [vmem:[#allocation3 + $0x90] sm:$0xff]  ;;  %v138_v37 = vld [vmem:[#allocation3 + $0x98] sm:$0xff]  ;;  %v135_v40 = vld [vmem:[#allocation3 + $0x80] sm:$0xff]  ;;  %v2832_v59 = vsel %vm2783_vm12, 1, %v4319_v0 }
  0x19   :  { %212 = vmatpush.msra.mxu1 %v153_v21  ;;  %v134_v39 = vld [vmem:[#allocation3 + $0x78] sm:$0xff]  ;;  %v136_v41 = vld [vmem:[#allocation3 + $0x88] sm:$0xff]  ;;  %v131_v42 = vld [vmem:[#allocation3 + $0x60] sm:$0xff]  ;;  %378 = vperm.xlu2 %4095, %v376_v3  }
  0x1a   :  { %253 = vmatpush.msra.mxu2 %v154_v22  ;;  %172 = vmatpush.msra.mxu0 %v149_v23  ;;  %v132_v44 = vld [vmem:[#allocation3 + $0x68] sm:$0xff]  ;;  %v133_v45 = vld [vmem:[#allocation3 + $0x70] sm:$0xff]  ;;  %v130_v48 = vld [vmem:[#allocation3 + $0x58] sm:$0xff] }
  0x1b   :  { %213 = vmatpush.msra.mxu1 %v150_v24  ;;  %v128_v46 = vld [vmem:[#allocation3 + $0x48] sm:$0xff]  ;;  %v129_v47 = vld [vmem:[#allocation3 + $0x50] sm:$0xff]  ;;  %v126_v50 = vld [vmem:[#allocation3 + $0x38] sm:$0xff] }
  0x1c   :  { %254 = vmatpush.msra.mxu2 %v151_v25  ;;  %173 = vmatpush.msra.mxu0 %v146_v26  ;;  %v125_v49 = vld [vmem:[#allocation3 + $0x30] sm:$0xff]  ;;  %v127_v51 = vld [vmem:[#allocation3 + $0x40] sm:$0xff]  ;;  %v122_v52 = vld [vmem:[#allocation3 + $0x18] sm:$0xff] }
  0x1d   :  { %214 = vmatpush.msra.mxu1 %v147_v27  ;;  %v123_v53 = vld [vmem:[#allocation3 + $0x20] sm:$0xff]  ;;  %v124_v54 = vld [vmem:[#allocation3 + $0x28] sm:$0xff]  ;;  %v121_v58 = vld [vmem:[#allocation3 + $0x10] sm:$0xff] }
  0x1e   :  { %87 = vperm.xlu0 %4093, %v68_v16   ;;  %255 = vmatpush.msra.mxu2 %v148_v28  ;;  %v119_v56 = vld [vmem:[#allocation3] sm:$0xff]  ;;  %v120_v57 = vld [vmem:[#allocation3 + $0x8] sm:$0xff]  ;;  %v69_v63 = vld [vmem:[%s6074_s0 + $0x30] sm:$0xff] }
  0x1f   :  { %174 = vmatpush.msra.mxu0 %v143_v29  ;;  %215 = vmatpush.msra.mxu1 %v144_v31  ;;  %v3610_v5 = vld [vmem:[#allocation5 + $0x188] sm:$0xf]  ;;  %v4016_v6 = vld [vmem:[#allocation5 + $0x1a0] sm:$0xf0]  ;;  %v4013_v7 = vld [vmem:[#allocation5 + $0x18c] sm:$0xf] }
  0x20   :  { %256 = vmatpush.msra.mxu2 %v145_v32  ;;  %90 = vperm.xlu1 %4094, %v69_v63   ;;  %v4424_v9 = vor.u32 %v4016_v6, %v3610_v5  ;;  %v3612_v10 = vld [vmem:[#allocation5 + $0x1a4] sm:$0xf0]  ;;  %v4069_v11 = vld [vmem:[#allocation5 + $0x34c] sm:$0xf]  ;;  %v3618_v14 = vld [vmem:[#allocation5 + $0x190] sm:$0xf] }
  0x21   :  { %175 = vmatpush.msra.mxu0 %v140_v33  ;;  %216 = vmatpush.msra.mxu1 %v141_v34  ;;  %v4427_v12 = vor.u32 %v4013_v7, %v3612_v10  ;;  %v3836_v13 = vld [vmem:[#allocation5 + $0x364] sm:$0xf0]  ;;  %v4017_v15 = vld [vmem:[#allocation5 + $0x1a8] sm:$0xf0]  ;;  %v70_v16 = vld [vmem:[%s6074_s0 + $0x38] sm:$0xff] }
  0x22   :  { %257 = vmatpush.msra.mxu2 %v142_v35  ;;  %1088 = vmatpush.bf16.msra.mxu3 %v4424_v9  ;;  %v4433_v17 = vor.u32 %v4069_v11, %v3836_v13  ;;  %v4435_v18 = vor.u32 %v4017_v15, %v3618_v14  ;;  %v3582_v19 = vld [vmem:[#allocation5 + $0x150] sm:$0xf]  ;;  %v4009_v21 = vld [vmem:[#allocation5 + $0x168] sm:$0xf0]  ;;  %v4006_v22 = vld [vmem:[#allocation5 + $0x154] sm:$0xf] }
  0x23   :  { %176 = vmatpush.msra.mxu0 %v137_v36  ;;  %217 = vmatpush.msra.mxu1 %v138_v37  ;;  %6305 = vst [vmem:[#allocation9_spill] sm:$0xff] %v4427_v12  ;;  %v4438_v23 = vor.u32 %v4009_v21, %v3582_v19  ;;  %v3584_v24 = vld [vmem:[#allocation5 + $0x16c] sm:$0xf0]  ;;  %v4062_v25 = vld [vmem:[#allocation5 + $0x314] sm:$0xf] }
  0x24   :  { %258 = vmatpush.msra.mxu2 %v139_v38  ;;  %6306 = vst [vmem:[#allocation10_spill] sm:$0xff] %v4433_v17  ;;  %v3808_v26 = vld [vmem:[#allocation5 + $0x32c] sm:$0xf0]  ;;  %v4446_v27 = vor.u32 %v4006_v22, %v3584_v24  ;;  %v3590_v28 = vld [vmem:[#allocation5 + $0x158] sm:$0xf]  ;;  %93 = vperm.xlu2 %4095, %v70_v16  }
  0x25   :  { %177 = vmatpush.msra.mxu0 %v134_v39  ;;  %218 = vmatpush.msra.mxu1 %v135_v40  ;;  %6307 = vst [vmem:[#allocation11_spill] sm:$0xff] %v4435_v18  ;;  %v4010_v29 = vld [vmem:[#allocation5 + $0x170] sm:$0xf0]  ;;  %v4452_v31 = vor.u32 %v4062_v25, %v3808_v26  ;;  %v3999_v36 = vld [vmem:[#allocation5 + $0x11c] sm:$0xf] }
  0x26   :  { %1374 = vperm.xlu0 %4093, %v1372_v30   ;;  %259 = vmatpush.msra.mxu2 %v136_v41  ;;  %6308 = vst [vmem:[#allocation12_spill] sm:$0xff] %v4446_v27  ;;  %v3554_v30 = vld [vmem:[#allocation5 + $0x118] sm:$0xf]  ;;  %v4002_v32 = vld [vmem:[#allocation5 + $0x130] sm:$0xf0]  ;;  %v4456_v34 = vor.u32 %v4010_v29, %v3590_v28 }
  0x27   :  { %178 = vmatpush.msra.mxu0 %v131_v42  ;;  %219 = vmatpush.msra.mxu1 %v132_v44  ;;  %6309 = vst [vmem:[#allocation13_spill] sm:$0xff] %v4452_v31  ;;  %v4458_v35 = vor.u32 %v4002_v32, %v3554_v30  ;;  %v3556_v37 = vld [vmem:[#allocation5 + $0x134] sm:$0xf0]  ;;  %v4055_v38 = vld [vmem:[#allocation5 + $0x2dc] sm:$0xf] }
  0x28   :  { %260 = vmatpush.msra.mxu2 %v133_v45  ;;  %1666 = vperm.xlu1 %4094, %v1664_v4   ;;  %6310 = vst [vmem:[#allocation14_spill] sm:$0xff] %v4456_v34  ;;  %v3780_v39 = vld [vmem:[#allocation5 + $0x2f4] sm:$0xf0]  ;;  %v3562_v40 = vld [vmem:[#allocation5 + $0x120] sm:$0xf]  ;;  %v4464_v44 = vor.u32 %v3999_v36, %v3556_v37 }
  0x29   :  { %179 = vmatpush.msra.mxu0 %v128_v46  ;;  %220 = vmatpush.msra.mxu1 %v129_v47  ;;  %v4003_v41 = vld [vmem:[#allocation5 + $0x138] sm:$0xf0]  ;;  %v3526_v42 = vld [vmem:[#allocation5 + $0xe0] sm:$0xf]  ;;  %v4468_v45 = vor.u32 %v4055_v38, %v3780_v39  ;;  %v3992_v47 = vld [vmem:[#allocation5 + $0xe4] sm:$0xf] }
  0x2a   :  { %261 = vmatpush.msra.mxu2 %v130_v48  ;;  %1089 = vmatpush.bf16.msra.mxu3 %v4438_v23  ;;  %6311 = vst [vmem:[#allocation15_spill] sm:$0xff] %v4464_v44  ;;  %v4470_v46 = vor.u32 %v4003_v41, %v3562_v40  ;;  %v3528_v48 = vld [vmem:[#allocation5 + $0xfc] sm:$0xf0]  ;;  %v3498_v20 = vld [vmem:[#allocation5 + $0xa8] sm:$0xf] }
  0x2b   :  { %180 = vmatpush.msra.mxu0 %v125_v49  ;;  %221 = vmatpush.msra.mxu1 %v126_v50  ;;  %6312 = vst [vmem:[#allocation16_spill] sm:$0xff] %v4468_v45  ;;  %v4048_v49 = vld [vmem:[#allocation5 + $0x2a4] sm:$0xf]  ;;  %v3500_v3 = vld [vmem:[#allocation5 + $0xc4] sm:$0xf0] }
  0x2c   :  { %262 = vmatpush.msra.mxu2 %v127_v51  ;;  %6313 = vst [vmem:[#allocation17_spill] sm:$0xff] %v4470_v46  ;;  %v3752_v51 = vld [vmem:[#allocation5 + $0x2bc] sm:$0xf0]  ;;  %v3988_v63 = vld [vmem:[#allocation5 + $0xc0] sm:$0xf0] }
  0x2d   :  { %181 = vmatpush.msra.mxu0 %v122_v52  ;;  %222 = vmatpush.msra.mxu1 %v123_v53  ;;  %v3534_v52 = vld [vmem:[#allocation5 + $0xe8] sm:$0xf]  ;;  %v3996_v53 = vld [vmem:[#allocation5 + $0x100] sm:$0xf0]  ;;  %v4041_v4 = vld [vmem:[#allocation5 + $0x26c] sm:$0xf] }
  0x2e   :  { %2250 = vperm.xlu0 %4093, %v2248_v43   ;;  %263 = vmatpush.msra.mxu2 %v124_v54  ;;  %v3995_v43 = vld [vmem:[#allocation5 + $0xf8] sm:$0xf0]  ;;  %v1956_v54 = vsel %vm1907_vm10, 1, %v4319_v0  ;;  %v3724_v5 = vld [vmem:[#allocation5 + $0x284] sm:$0xf0] }
  0x2f   :  { %182 = vmatpush.msra.mxu0 %v119_v56  ;;  %223 = vmatpush.msra.mxu1 %v120_v57  ;;  %v4472_v50 = vor.u32 %v3995_v43, %v3526_v42  ;;  %v4491_v57 = vor.u32 %v4048_v49, %v3752_v51  ;;  %v3506_v6 = vld [vmem:[#allocation5 + $0xb0] sm:$0xf]  ;;  %v3989_v7 = vld [vmem:[#allocation5 + $0xc8] sm:$0xf0]  ;;  %v3978_v15 = vld [vmem:[#allocation5 + $0x74] sm:$0xf] }
  0x30   :  { %264 = vmatpush.msra.mxu2 %v121_v58  ;;  %2542 = vperm.xlu1 %4094, %v2540_v8   ;;  %v4493_v58 = vor.u32 %v3996_v53, %v3534_v52  ;;  %v4514_v8 = vor.u32 %v4041_v4, %v3724_v5  ;;  %v4516_v10 = vor.u32 %v3989_v7, %v3506_v6  ;;  %v3470_v11 = vld [vmem:[#allocation5 + $0x70] sm:$0xf]  ;;  %v3981_v13 = vld [vmem:[#allocation5 + $0x88] sm:$0xf0]  ;;  %v4034_v19 = vld [vmem:[#allocation5 + $0x234] sm:$0xf] }
  0x31   :  { %1114 = vmatpush.bf16.msrb.mxu0 %v4427_v12  ;;  %1127 = vmatpush.bf16.msrb.mxu1 %v4433_v17  ;;  %6315 = vst [vmem:[#allocation19_spill] sm:$0xff] %v4491_v57  ;;  %v4521_v14 = vor.u32 %v3981_v13, %v3470_v11  ;;  %v3472_v16 = vld [vmem:[#allocation5 + $0x8c] sm:$0xf0]  ;;  %v3478_v24 = vld [vmem:[#allocation5 + $0x78] sm:$0xf] }
  0x32   :  { %1140 = vmatpush.bf16.msrb.mxu2 %v4435_v18  ;;  %1090 = vmatpush.bf16.msra.mxu3 %v4458_v35  ;;  %6316 = vst [vmem:[#allocation20_spill] sm:$0xff] %v4493_v58  ;;  %v4523_v21 = vor.u32 %v3978_v15, %v3472_v16  ;;  %v3696_v22 = vld [vmem:[#allocation5 + $0x24c] sm:$0xf0]  ;;  %v3982_v25 = vld [vmem:[#allocation5 + $0x90] sm:$0xf0] }
  0x33   :  { %1958 = vperm.xlu2 %4095, %v1956_v54   ;;  %6319 = vst [vmem:[#allocation23_spill] sm:$0xff] %v4514_v8  ;;  %v4526_v26 = vor.u32 %v4034_v19, %v3696_v22  ;;  %v4528_v28 = vor.u32 %v3982_v25, %v3478_v24  ;;  %v3442_v29 = vld [vmem:[#allocation5 + $0x38] sm:$0xf]  ;;  %v3974_v30 = vld [vmem:[#allocation5 + $0x50] sm:$0xf0] }
  0x34   :  { %6320 = vst [vmem:[#allocation24_spill] sm:$0xff] %v4516_v10  ;;  %v4533_v32 = vor.u32 %v3974_v30, %v3442_v29  ;;  %v3444_v36 = vld [vmem:[#allocation5 + $0x54] sm:$0xf0]  ;;  %v4027_v37 = vld [vmem:[#allocation5 + $0x1fc] sm:$0xf] }
  0x35   :  { %1115 = vmatpush.bf16.msrb.mxu0 %v4446_v27  ;;  %1128 = vmatpush.bf16.msrb.mxu1 %v4452_v31  ;;  %6321 = vst [vmem:[#allocation25_spill] sm:$0xff] %v4521_v14  ;;  %v3668_v39 = vld [vmem:[#allocation5 + $0x214] sm:$0xf0]  ;;  %v3450_v40 = vld [vmem:[#allocation5 + $0x40] sm:$0xf] }
  0x36   :  { %3126 = vperm.xlu0 %4093, %v3124_v55   ;;  %1141 = vmatpush.bf16.msrb.mxu2 %v4456_v34  ;;  %v4487_v55 = vor.u32 %v3992_v47, %v3528_v48  ;;  %6322 = vst [vmem:[#allocation26_spill] sm:$0xff] %v4523_v21  ;;  %v3975_v41 = vld [vmem:[#allocation5 + $0x58] sm:$0xf0]  ;;  %v4538_v42 = vor.u32 %v4027_v37, %v3668_v39  ;;  %v3414_v47 = vld [vmem:[#allocation5] sm:$0xf] }
  0x37   :  { %1091 = vmatpush.bf16.msra.mxu3 %v4472_v50  ;;  %6323 = vst [vmem:[#allocation27_spill] sm:$0xff] %v4526_v26  ;;  %v4540_v43 = vor.u32 %v3975_v41, %v3450_v40  ;;  %v3967_v48 = vld [vmem:[#allocation5 + $0x18] sm:$0xf0]  ;;  %v3834_v51 = vld [vmem:[#allocation5 + $0x348] sm:$0xf] }
  0x38   :  { %6314 = vst [vmem:[#allocation18_spill] sm:$0xff] %v4487_v55  ;;  %v4545_v49 = vor.u32 %v3967_v48, %v3414_v47  ;;  %v4072_v52 = vld [vmem:[#allocation5 + $0x360] sm:$0xf0]  ;;  %v4014_v4 = vld [vmem:[#allocation5 + $0x194] sm:$0xf] }
  0x39   :  { %1116 = vmatpush.bf16.msrb.mxu0 %v4464_v44  ;;  %1129 = vmatpush.bf16.msrb.mxu1 %v4468_v45  ;;  %6324 = vst [vmem:[#allocation28_spill] sm:$0xff] %v4528_v28  ;;  %v3964_v53 = vld [vmem:[#allocation5 + $0x4] sm:$0xf]  ;;  %v4547_v54 = vor.u32 %v4072_v52, %v3834_v51  ;;  %v3620_v6 = vld [vmem:[#allocation5 + $0x1ac] sm:$0xf0] }
  0x3a   :  { %1142 = vmatpush.bf16.msrb.mxu2 %v4470_v46  ;;  %6325 = vst [vmem:[#allocation29_spill] sm:$0xff] %v4533_v32  ;;  %v4070_v7 = vld [vmem:[#allocation5 + $0x354] sm:$0xf]  ;;  %v3844_v11 = vld [vmem:[#allocation5 + $0x36c] sm:$0xf0]  ;;  %v4559_v13 = vor.u32 %v4014_v4, %v3620_v6 }
  0x3b   :  { %2834 = vperm.xlu2 %4095, %v2832_v59   ;;  %6327 = vst [vmem:[#allocation31_spill] sm:$0xff] %v4538_v42  ;;  %v4020_v59 = vld [vmem:[#allocation5 + $0x1c4] sm:$0xf]  ;;  %v4561_v15 = vor.u32 %v4070_v7, %v3844_v11  ;;  %v3626_v16 = vld [vmem:[#allocation5 + $0x198] sm:$0xf] }
  0x3c   :  { %6328 = vst [vmem:[#allocation32_spill] sm:$0xff] %v4540_v43  ;;  %v4018_v19 = vld [vmem:[#allocation5 + $0x1b0] sm:$0xf0]  ;;  %v3806_v22 = vld [vmem:[#allocation5 + $0x310] sm:$0xf] }
  0x3d   :  { %1117 = vmatpush.bf16.msrb.mxu0 %v4487_v55  ;;  %1130 = vmatpush.bf16.msrb.mxu1 %v4491_v57  ;;  %6329 = vst [vmem:[#allocation33_spill] sm:$0xff] %v4545_v49  ;;  %v4564_v24 = vor.u32 %v4018_v19, %v3626_v16  ;;  %v4065_v25 = vld [vmem:[#allocation5 + $0x328] sm:$0xf0]  ;;  %v4007_v29 = vld [vmem:[#allocation5 + $0x15c] sm:$0xf] }
  0x3e   :  { %1143 = vmatpush.bf16.msrb.mxu2 %v4493_v58  ;;  %6330 = vst [vmem:[#allocation34_spill] sm:$0xff] %v4547_v54  ;;  %v3592_v30 = vld [vmem:[#allocation5 + $0x174] sm:$0xf0]  ;;  %v4063_v37 = vld [vmem:[#allocation5 + $0x31c] sm:$0xf] }
  0x3f   :  { %6334 = vst [vmem:[#allocation38_spill] sm:$0xff] %v4559_v13  ;;  %v3816_v39 = vld [vmem:[#allocation5 + $0x334] sm:$0xf0]  ;;  %v3598_v40 = vld [vmem:[#allocation5 + $0x160] sm:$0xf] }
  0x40   :  { %6335 = vst [vmem:[#allocation39_spill] sm:$0xff] %v4561_v15  ;;  %v4573_v41 = vor.u32 %v4063_v37, %v3816_v39  ;;  %v4011_v47 = vld [vmem:[#allocation5 + $0x178] sm:$0xf0]  ;;  %v3778_v51 = vld [vmem:[#allocation5 + $0x2d8] sm:$0xf] }
  0x41   :  { %1131 = vmatpush.bf16.msrb.mxu1 %v4514_v8  ;;  %6336 = vst [vmem:[#allocation40_spill] sm:$0xff] %v4564_v24  ;;  %v4576_v48 = vor.u32 %v4011_v47, %v3598_v40  ;;  %v4058_v52 = vld [vmem:[#allocation5 + $0x2f0] sm:$0xf0]  ;;  %v3570_v4 = vld [vmem:[#allocation5 + $0x128] sm:$0xf] }
  0x42   :  { %1144 = vmatpush.bf16.msrb.mxu2 %v4516_v10  ;;  %6339 = vst [vmem:[#allocation43_spill] sm:$0xff] %v4573_v41  ;;  %v4004_v11 = vld [vmem:[#allocation5 + $0x140] sm:$0xf0]  ;;  %v3750_v19 = vld [vmem:[#allocation5 + $0x2a0] sm:$0xf] }
  0x43   :  { %6340 = vst [vmem:[#allocation44_spill] sm:$0xff] %v4576_v48  ;;  %v4590_v16 = vor.u32 %v4004_v11, %v3570_v4  ;;  %v3536_v37 = vld [vmem:[#allocation5 + $0x104] sm:$0xf0]  ;;  %v4049_v39 = vld [vmem:[#allocation5 + $0x2ac] sm:$0xf] }
  0x44   :  { %v3760_v47 = vld [vmem:[#allocation5 + $0x2c4] sm:$0xf0]  ;;  %v3986_v11 = vld [vmem:[#allocation5 + $0xb4] sm:$0xf]  ;;  %v4057_v8 = vld [vmem:[#allocation5 + $0x2ec] sm:$0xf] }
  0x45   :  { %1132 = vmatpush.bf16.msrb.mxu1 %v4526_v26  ;;  %6345 = vst [vmem:[#allocation49_spill] sm:$0xff] %v4590_v16  ;;  %v4679_v57 = vld [vmem:[%s6077_s3] ss:$0 sm:$0xff]  ;;  %v3578_v31 = vld [vmem:[#allocation5 + $0x130] sm:$0xf] }
  0x46   :  { %1145 = vmatpush.bf16.msrb.mxu2 %v4528_v28  ;;  %6370 = vst [vmem:[#allocation73_spill] sm:$0xff] %v4679_v57 }
  0x49   :  { %1133 = vmatpush.bf16.msrb.mxu1 %v4538_v42 }
  0x4a   :  { %1146 = vmatpush.bf16.msrb.mxu2 %v4540_v43 }
  0x69   :  { %v85_v56 = vpop.permute.xlu2 %84 }
  0x6a   :  { %vm99_vm11 = vcmp.eq.s32.totalorder %v4405_v60, %v85_v56  ;;  %v3416_v56 = vld [vmem:[#allocation5 + $0x1c] sm:$0xf0] }
  0x73   :  { %v4584_v6 = vpop.permute.xlu2 %378 }
  0x74   :  { %6343 = vst [vmem:[#allocation47_spill] sm:$0xff] %v4584_v6 }
  0x80   :  { %v73_v61 = vpop.permute.xlu0 %72 }
  0x81   :  { %vm95_vm3 = vcmp.eq.s32.totalorder %v4405_v60, %v73_v61  ;;  %v79_v2 = vpop.permute.xlu1 %78 }
  0x82   :  { %3386 = vmatmul.msk.f32.vlgmr.msra.gmra.mxu0 %vm95_vm3, %v6083_v62  ;;  %3394 = vmatmul.msk.f32.vlgmr.msra.gmra.mxu1 %vm95_vm3, %v6083_v62  ;;  %vm97_vm8 = vcmp.eq.s32.totalorder %v4405_v60, %v79_v2  ;;  %v3985_v2 = vld [vmem:[#allocation5 + $0xac] sm:$0xf] }
  0x83   :  { %3402 = vmatmul.msk.f32.vlgmr.msra.gmra.mxu2 %vm95_vm3, %v6083_v62  ;;  %v4511_v0 = vor.u32 %v3985_v2, %v3500_v3  ;;  %v3422_v2 = vld [vmem:[#allocation5 + $0x8] sm:$0xf]  ;;  %v3968_v3 = vld [vmem:[#allocation5 + $0x20] sm:$0xf0] }
  0x84   :  { %v4555_v5 = vor.u32 %v3968_v3, %v3422_v2  ;;  %v4056_v2 = vld [vmem:[#allocation5 + $0x2e4] sm:$0xf]  ;;  %v3788_v3 = vld [vmem:[#allocation5 + $0x2fc] sm:$0xf0] }
  0x85   :  { %6318 = vst [vmem:[#allocation22_spill] sm:$0xff] %v4511_v0  ;;  %1118 = vmatpush.bf16.msrb.mxu0 %v4511_v0  ;;  %v4587_v7 = vor.u32 %v4056_v2, %v3788_v3  ;;  %v3722_v2 = vld [vmem:[#allocation5 + $0x268] sm:$0xf]  ;;  %v4044_v3 = vld [vmem:[#allocation5 + $0x280] sm:$0xf0] }
  0x86   :  { %6333 = vst [vmem:[#allocation37_spill] sm:$0xff] %v4555_v5  ;;  %1147 = vmatpush.bf16.msrb.mxu2 %v4555_v5  ;;  %v4608_v4 = vor.u32 %v4044_v3, %v3722_v2 }
  0x87   :  { %6344 = vst [vmem:[#allocation48_spill] sm:$0xff] %v4587_v7 }
  0x88   :  { %v76_v1 = vpop.permute.xlu0 %75  ;;  %6350 = vst [vmem:[#allocation54_spill] sm:$0xff] %v4608_v4 }
  0x89   :  { %vm96_vm4 = vcmp.eq.s32.totalorder %v4405_v60, %v76_v1  ;;  %v82_v33 = vpop.permute.xlu1 %81  ;;  %v4509_v1 = vor.u32 %v3988_v63, %v3498_v20  ;;  %1119 = vmatpush.bf16.msrb.mxu0 %v4523_v21  ;;  %v4550_v20 = vor.u32 %v3964_v53, %v3416_v56  ;;  %v4578_v53 = vor.u32 %v4058_v52, %v3778_v51  ;;  %v4000_v56 = vld [vmem:[#allocation5 + $0x124] sm:$0xf]  ;;  %v3542_v51 = vld [vmem:[#allocation5 + $0xf0] sm:$0xf]  ;;  %v3997_v52 = vld [vmem:[#allocation5 + $0x108] sm:$0xf0] }
  0x8a   :  { %3387 = vmatmul.msk.f32.gmra.mxu0 %vm96_vm4, %v6083_v62  ;;  %3395 = vmatmul.msk.f32.gmra.mxu1 %vm96_vm4, %v6083_v62  ;;  %vm98_vm9 = vcmp.eq.s32.totalorder %v4405_v60, %v82_v33  ;;  %v3971_v33 = vld [vmem:[#allocation5 + $0x3c] sm:$0xf] }
  0x8b   :  { %3403 = vmatmul.msk.f32.gmra.mxu2 %vm96_vm4, %v6083_v62  ;;  %6317 = vst [vmem:[#allocation21_spill] sm:$0xff] %v4509_v1  ;;  %1092 = vmatpush.bf16.msra.mxu3 %v4509_v1  ;;  %v4535_v38 = vor.u32 %v3971_v33, %v3444_v36  ;;  %v4568_v33 = vor.u32 %v4065_v25, %v3806_v22  ;;  %v4051_v22 = vld [vmem:[#allocation5 + $0x2b8] sm:$0xf0] }
  0x8c   :  { %6331 = vst [vmem:[#allocation35_spill] sm:$0xff] %v4550_v20  ;;  %v4570_v36 = vor.u32 %v4007_v29, %v3592_v30  ;;  %1192 = vmatpush.bf16.msra.mxu2 %v4564_v24  ;;  %v4592_v29 = vor.u32 %v4051_v22, %v3750_v19  ;;  %v3993_v30 = vld [vmem:[#allocation5 + $0xec] sm:$0xf]  ;;  %v3508_v19 = vld [vmem:[#allocation5 + $0xcc] sm:$0xf0] }
  0x8d   :  { %6326 = vst [vmem:[#allocation30_spill] sm:$0xff] %v4535_v38  ;;  %1120 = vmatpush.bf16.msrb.mxu0 %v4535_v38  ;;  %v4597_v40 = vor.u32 %v3993_v30, %v3536_v37  ;;  %v4042_v22 = vld [vmem:[#allocation5 + $0x274] sm:$0xf]  ;;  %v3732_v30 = vld [vmem:[#allocation5 + $0x28c] sm:$0xf0] }
  0x8e   :  { %6337 = vst [vmem:[#allocation41_spill] sm:$0xff] %v4568_v33  ;;  %v3514_v37 = vld [vmem:[#allocation5 + $0xb8] sm:$0xf]  ;;  %v4037_v24 = vld [vmem:[#allocation5 + $0x248] sm:$0xf0] }
  0x8f   :  { %1093 = vmatpush.bf16.msra.mxu3 %v4521_v14  ;;  %6338 = vst [vmem:[#allocation42_spill] sm:$0xff] %v4570_v36 }
  0x90   :  { %v88_v61 = vpop.permute.xlu0 %87  ;;  %6341 = vst [vmem:[#allocation45_spill] sm:$0xff] %v4578_v53  ;;  %1193 = vmatpush.bf16.msra.mxu2 %v4576_v48  ;;  %v94_v48 = vpop.permute.xlu2 %93 }
  0x91   :  { %vm100_vm13 = vcmp.eq.s32.totalorder %v4405_v60, %v88_v61  ;;  %v3640_v61 = vld [vmem:[#allocation5 + $0x1dc] sm:$0xf0]  ;;  %1121 = vmatpush.bf16.msrb.mxu0 %v4550_v20  ;;  %6346 = vst [vmem:[#allocation50_spill] sm:$0xff] %v4592_v29  ;;  %vm102_vm15 = vcmp.eq.s32.totalorder %v4405_v60, %v94_v48 }
  0x92   :  { %3388 = vmatmul.msk.f32.gmra.mxu0 %vm97_vm8, %v6083_v62  ;;  %3396 = vmatmul.msk.f32.gmra.mxu1 %vm97_vm8, %v6083_v62  ;;  %v4552_v63 = vor.u32 %v4020_v59, %v3640_v61  ;;  %v3564_v59 = vld [vmem:[#allocation5 + $0x13c] sm:$0xf0]  ;;  %v91_v25 = vpop.permute.xlu1 %90  ;;  %6347 = vst [vmem:[#allocation51_spill] sm:$0xff] %v4597_v40 }
  0x93   :  { %3404 = vmatmul.msk.f32.gmra.mxu2 %vm97_vm8, %v6083_v62  ;;  %1094 = vmatpush.bf16.msra.mxu3 %v4533_v32  ;;  %v4582_v61 = vor.u32 %v4000_v56, %v3564_v59  ;;  %vm101_vm14 = vcmp.eq.s32.totalorder %v4405_v60, %v91_v25  ;;  %v4601_v56 = vor.u32 %v4049_v39, %v3760_v47  ;;  %v3990_v39 = vld [vmem:[#allocation5 + $0xd0] sm:$0xf0]  ;;  %vm380_vm8 = vcmp.eq.s32.totalorder %v4584_v6, 1  ;;  %v4012_v6 = vld [vmem:[#allocation5 + $0x180] sm:$0xf0] }
  0x94   :  { %6332 = vst [vmem:[#allocation36_spill] sm:$0xff] %v4552_v63  ;;  %1134 = vmatpush.bf16.msrb.mxu1 %v4552_v63  ;;  %1194 = vmatpush.bf16.msra.mxu2 %v4590_v16  ;;  %v4603_v59 = vor.u32 %v3997_v52, %v3542_v51  ;;  %v4612_v25 = vor.u32 %v3986_v11, %v3508_v19  ;;  %v3694_v16 = vld [vmem:[#allocation5 + $0x230] sm:$0xf]  ;;  %v3979_v11 = vld [vmem:[#allocation5 + $0x7c] sm:$0xf] }
  0x95   :  { %1166 = vmatpush.bf16.msra.mxu0 %v4559_v13  ;;  %6342 = vst [vmem:[#allocation46_spill] sm:$0xff] %v4582_v61  ;;  %v4615_v52 = vor.u32 %v4042_v22, %v3732_v30  ;;  %v4617_v2 = vor.u32 %v3990_v39, %v3514_v37  ;;  %v3480_v19 = vld [vmem:[#allocation5 + $0x94] sm:$0xf0]  ;;  %v4035_v22 = vld [vmem:[#allocation5 + $0x23c] sm:$0xf]  ;;  %v6354_v37 = vmov 1.0   ;;  %v4625_v39 = vor.u32 %v4037_v24, %v3694_v16 }
  0x96   :  { %6348 = vst [vmem:[#allocation52_spill] sm:$0xff] %v4601_v56  ;;  %v3704_v30 = vld [vmem:[#allocation5 + $0x254] sm:$0xf0]  ;;  %v3972_v24 = vld [vmem:[#allocation5 + $0x44] sm:$0xf] }
  0x97   :  { %1095 = vmatpush.bf16.msra.mxu3 %v4545_v49  ;;  %6349 = vst [vmem:[#allocation53_spill] sm:$0xff] %v4603_v59  ;;  %v4631_v60 = vor.u32 %v4035_v22, %v3704_v30  ;;  %v3452_v16 = vld [vmem:[#allocation5 + $0x5c] sm:$0xf0]  ;;  %v3458_v22 = vld [vmem:[#allocation5 + $0x48] sm:$0xf] }
  0x98   :  { %1179 = vmatpush.bf16.msra.mxu1 %v4561_v15  ;;  %6351 = vst [vmem:[#allocation55_spill] sm:$0xff] %v4612_v25  ;;  %1195 = vmatpush.bf16.msra.mxu2 %v4603_v59  ;;  %v3983_v59 = vld [vmem:[#allocation5 + $0x98] sm:$0xf0]  ;;  %v3976_v30 = vld [vmem:[#allocation5 + $0x60] sm:$0xf0] }
  0x99   :  { %1167 = vmatpush.bf16.msra.mxu0 %v4570_v36  ;;  %6352 = vst [vmem:[#allocation56_spill] sm:$0xff] %v4615_v52  ;;  %v4064_v63 = vld [vmem:[#allocation5 + $0x324] sm:$0xf] }
  0x9a   :  { %3389 = vmatmul.msk.f32.gmra.mxu0 %vm98_vm9, %v6083_v62  ;;  %3397 = vmatmul.msk.f32.gmra.mxu1 %vm98_vm9, %v6083_v62  ;;  %6353 = vst [vmem:[#allocation57_spill] sm:$0xff] %v4617_v2 }
  0x9b   :  { %3405 = vmatmul.msk.f32.gmra.mxu2 %vm98_vm9, %v6083_v62  ;;  %1101 = vmatpush.bf16.msrb.mxu3 %v4547_v54  ;;  %6355 = vst [vmem:[#allocation58_spill] sm:$0xff] %v4625_v39  ;;  %vm4702_vm9 = vmpackc.low %vm380_vm8, %vm380_vm8 }
  0x9c   :  { %1180 = vmatpush.bf16.msra.mxu1 %v4573_v41  ;;  %1196 = vmatpush.bf16.msra.mxu2 %v4617_v2  ;;  %6357 = vst [vmem:[#allocation60_spill] sm:$0xff] %v4631_v60 }
  0x9d   :  { %1168 = vmatpush.bf16.msra.mxu0 %v4582_v61 }
  0x9f   :  { %1102 = vmatpush.bf16.msrb.mxu3 %v4568_v33 }
  0xa0   :  { %1181 = vmatpush.bf16.msra.mxu1 %v4587_v7 }
  0xa1   :  { %1169 = vmatpush.bf16.msra.mxu0 %v4597_v40 }
  0xa2   :  { %3390 = vmatmul.msk.f32.gmra.mxu0 %vm99_vm11, %v6083_v62  ;;  %3398 = vmatmul.msk.f32.gmra.mxu1 %vm99_vm11, %v6083_v62 }
  0xa3   :  { %3406 = vmatmul.msk.f32.gmra.mxu2 %vm99_vm11, %v6083_v62  ;;  %1103 = vmatpush.bf16.msrb.mxu3 %v4578_v53 }
  0xa4   :  { %1182 = vmatpush.bf16.msra.mxu1 %v4601_v56 }
  0xa5   :  { %1170 = vmatpush.bf16.msra.mxu0 %v4612_v25 }
  0xa7   :  { %1104 = vmatpush.bf16.msrb.mxu3 %v4592_v29 }
  0xa8   :  { %1183 = vmatpush.bf16.msra.mxu1 %v4615_v52  ;;  %v4023_v52 = vld [vmem:[#allocation5 + $0x1d8] sm:$0xf0] }
  0xaa   :  { %3391 = vmatmul.msk.f32.gmra.mxu0 %vm100_vm13, %v6083_v62  ;;  %3399 = vmatmul.msk.f32.gmra.mxu1 %vm100_vm13, %v6083_v62 }
  0xab   :  { %3407 = vmatmul.msk.f32.gmra.mxu2 %vm100_vm13, %v6083_v62  ;;  %1105 = vmatpush.bf16.msrb.mxu3 %v4608_v4 }
  0xac   :  { %1184 = vmatpush.bf16.msra.mxu1 %v4631_v60 }
  0xaf   :  { %1106 = vmatpush.bf16.msrb.mxu3 %v4625_v39 }
  0xb2   :  { %3392 = vmatmul.msk.f32.gmra.mxu0 %vm101_vm14, %v6083_v62  ;;  %3400 = vmatmul.msk.f32.gmra.mxu1 %vm101_vm14, %v6083_v62 }
  0xb3   :  { %3408 = vmatmul.msk.f32.gmra.mxu2 %vm101_vm14, %v6083_v62 }
  0xba   :  { %3393 = vmatmul.msk.f32.gmra.mxu0 %vm102_vm15, %v6354_v37  ;;  %3401 = vmatmul.msk.f32.gmra.mxu1 %vm102_vm15, %v6354_v37 }
  0xbb   :  { %3409 = vmatmul.msk.f32.gmra.mxu2 %vm102_vm15, %v6354_v37  ;;  %v3676_v37 = vld [vmem:[#allocation5 + $0x21c] sm:$0xf0] }
  0xff   :  { %v184_v47 = vpop.f32.mrf.mxu0  ;;  %v225_v51 = vpop.f32.mrf.mxu1 }
 0x100   :  { %v3410_v3 = vmul.f32 -1.442695, %v184_v47  ;;  %v3411_v62 = vmul.f32 -1.442695, %v225_v51  ;;  %v4627_v47 = vor.u32 %v3979_v11, %v3480_v19  ;;  %v3486_v51 = vld [vmem:[#allocation5 + $0x80] sm:$0xf]  ;;  %v4640_v19 = vor.u32 %v3972_v24, %v3452_v16 }
 0x101   :  { %v4633_v48 = vor.u32 %v3983_v59, %v3486_v51  ;;  %v4028_v11 = vld [vmem:[#allocation5 + $0x204] sm:$0xf]  ;;  %v4645_v51 = vor.u32 %v3976_v30, %v3458_v22  ;;  %v3965_v16 = vld [vmem:[#allocation5 + $0xc] sm:$0xf]  ;;  %v3648_v22 = vld [vmem:[#allocation5 + $0x1e4] sm:$0xf0] }
 0x102   :  { %4098 = vpow2.f32 %v3410_v3  ;;  %6356 = vst [vmem:[#allocation59_spill] sm:$0xff] %v4627_v47  ;;  %v3666_v3 = vld [vmem:[#allocation5 + $0x1f8] sm:$0xf]  ;;  %1171 = vmatpush.bf16.msra.mxu0 %v4627_v47  ;;  %v4643_v59 = vor.u32 %v4028_v11, %v3676_v37  ;;  %v3424_v11 = vld [vmem:[#allocation5 + $0x24] sm:$0xf0] }
 0x103   :  { %4100 = vpow2.f32 %v3411_v62  ;;  %6358 = vst [vmem:[#allocation61_spill] sm:$0xff] %v4633_v48  ;;  %v4030_v62 = vld [vmem:[#allocation5 + $0x210] sm:$0xf0]  ;;  %1197 = vmatpush.bf16.msra.mxu2 %v4633_v48  ;;  %v4021_v37 = vld [vmem:[#allocation5 + $0x1cc] sm:$0xf]  ;;  %v4657_v30 = vor.u32 %v3965_v16, %v3424_v11 }
 0x104   :  { %v4636_v2 = vor.u32 %v4030_v62, %v3666_v3  ;;  %6360 = vst [vmem:[#allocation63_spill] sm:$0xff] %v4640_v19  ;;  %v3638_v62 = vld [vmem:[#allocation5 + $0x1c0] sm:$0xf]  ;;  %1185 = vmatpush.bf16.msra.mxu1 %v4643_v59 }
 0x105   :  { %6361 = vst [vmem:[#allocation64_spill] sm:$0xff] %v4643_v59  ;;  %v4648_v41 = vor.u32 %v4023_v52, %v3638_v62  ;;  %v3430_v52 = vld [vmem:[#allocation5 + $0x10] sm:$0xf]  ;;  %v3969_v62 = vld [vmem:[#allocation5 + $0x28] sm:$0xf0] }
 0x106   :  { %6359 = vst [vmem:[#allocation62_spill] sm:$0xff] %v4636_v2  ;;  %1107 = vmatpush.bf16.msrb.mxu3 %v4636_v2  ;;  %1172 = vmatpush.bf16.msra.mxu0 %v4640_v19  ;;  %v4663_v48 = vor.u32 %v3969_v62, %v3430_v52  ;;  %v3852_v59 = vld [vmem:[#allocation5 + $0x374] sm:$0xf0] }
 0x107   :  { %6362 = vst [vmem:[#allocation65_spill] sm:$0xff] %v4645_v51  ;;  %1198 = vmatpush.bf16.msra.mxu2 %v4645_v51  ;;  %v4071_v51 = vld [vmem:[#allocation5 + $0x35c] sm:$0xf] }
 0x108   :  { %v4099_v3 = vpop.eup %4098  ;;  %6363 = vst [vmem:[#allocation66_spill] sm:$0xff] %v4648_v41  ;;  %v4667_v16 = vor.u32 %v4071_v51, %v3852_v59 }
 0x109   :  { %v4101_v56 = vpop.eup %4100  ;;  %v335_v7 = vadd.f32 1.0, %v4099_v3  ;;  %6364 = vst [vmem:[#allocation67_spill] sm:$0xff] %v4657_v30  ;;  %v4660_v3 = vor.u32 %v4021_v37, %v3648_v22 }
 0x10a   :  { %v4650_v24 = vadd.f32 1.0, %v4101_v56  ;;  %1108 = vmatpush.bf16.msrb.mxu3 %v4648_v41  ;;  %v6115_v56 = vmov 0.0|0.0   ;;  %1173 = vmatpush.bf16.msra.mxu0 %v4657_v30  ;;  %6366 = vst [vmem:[#allocation69_spill] sm:$0xff] %v4663_v48  ;;  %v4005_v30 = vld [vmem:[#allocation5 + $0x148] sm:$0xf0] }
 0x10b   :  { %4102 = vrcp.f32 %v335_v7  ;;  %1135 = vmatmul.bf16.vlgmr.msrb.gmra.mxu1 %v6115_v56  ;;  %6365 = vst [vmem:[#allocation68_spill] sm:$0xff] %v4660_v3  ;;  %1199 = vmatpush.bf16.msra.mxu2 %v4663_v48  ;;  %v3824_v56 = vld [vmem:[#allocation5 + $0x33c] sm:$0xf0]  ;;  %v347_v42 = vand.u32 2147483648, %v335_v7  ;;  %v345_v26 = vand.u32 2147483647, %v335_v7  ;;  %vm341_vm1 = vweird.f32 %v335_v7 }
 0x10c   :  { %4104 = vrcp.f32 %v4650_v24  ;;  %1186 = vmatpush.bf16.msra.mxu1 %v4660_v3  ;;  %6367 = vst [vmem:[#allocation70_spill] sm:$0xff] %v4667_v16  ;;  %v4671_v22 = vor.u32 %v4064_v63, %v3824_v56  ;;  %v3796_v48 = vld [vmem:[#allocation5 + $0x304] sm:$0xf0]  ;;  %vm360_vm5 = vweird.f32 %v4650_v24 }
 0x10d   :  { %v4674_v51 = vor.u32 %v4057_v8, %v3796_v48  ;;  %v348_v56 = vor.u32 1.1754944e-38, %v347_v42  ;;  %vm346_vm3 = vcmp.eq.f32.partialorder %v345_v26, 8.507059e+37  ;;  %v364_v42 = vand.u32 2147483647, %v4650_v24 }
 0x10e   :  { %6368 = vst [vmem:[#allocation71_spill] sm:$0xff] %v4671_v22  ;;  %v6372_v26 = vmov 0.0|0.0  }
 0x10f   :  { %6369 = vst [vmem:[#allocation72_spill] sm:$0xff] %v4674_v51  ;;  %vm365_vm7 = vcmp.eq.f32.partialorder %v364_v42, 8.507059e+37  ;;  %v3684_v42 = vld [vmem:[#allocation5 + $0x224] sm:$0xf0] }
 0x110   :  { %1231 = vmatpush.bf16.msrb.mxu1 %v4667_v16 }
 0x111   :  { %v4103_v60 = vpop.eup %4102 }
 0x112   :  { %v4105_v11 = vpop.eup %4104  ;;  %v337_v15 = vmul.f32 %v4103_v60, %v335_v7  ;;  %vm342_vm0 = vweird.f32 %v4103_v60  ;;  %v266_v7 = vpop.f32.mrf.mxu2 }
 0x113   :  { %v356_v37 = vmul.f32 %v4105_v11, %v4650_v24  ;;  %vm343_vm2 = vmor %vm341_vm1, %vm342_vm0  ;;  %vm361_vm4 = vweird.f32 %v4105_v11 }
 0x114   :  { %v338_v52 = vsub.f32 1.0, %v337_v15  ;;  %1232 = vmatpush.bf16.msrb.mxu1 %v4671_v22  ;;  %v4050_v15 = vld [vmem:[#allocation5 + $0x2b4] sm:$0xf]  ;;  %v4043_v22 = vld [vmem:[#allocation5 + $0x27c] sm:$0xf]  ;;  %vm362_vm6 = vmor %vm360_vm5, %vm361_vm4 }
 0x115   :  { %v357_v62 = vsub.f32 1.0, %v356_v37  ;;  %v3768_v37 = vld [vmem:[#allocation5 + $0x2cc] sm:$0xf0] }
 0x116   :  { %v339_v3 = vmul.f32 %v4103_v60, %v338_v52  ;;  %v4682_v8 = vor.u32 %v4050_v15, %v3768_v37  ;;  %v4036_v15 = vld [vmem:[#allocation5 + $0x244] sm:$0xf] }
 0x117   :  { %v358_v59 = vmul.f32 %v4105_v11, %v357_v62  ;;  %v366_v62 = vand.u32 2147483648, %v4650_v24  ;;  %v3842_v24 = vld [vmem:[#allocation5 + $0x350] sm:$0xf] }
 0x118   :  { %v340_v63 = vadd.f32 %v4103_v60, %v339_v3  ;;  %1233 = vmatpush.bf16.msrb.mxu1 %v4674_v51  ;;  %6371 = vst [vmem:[#allocation74_spill] sm:$0xff] %v4682_v8  ;;  %v3740_v3 = vld [vmem:[#allocation5 + $0x294] sm:$0xf0]  ;;  %v3606_v51 = vld [vmem:[#allocation5 + $0x168] sm:$0xf] }
 0x119   :  { %v359_v45 = vadd.f32 %v4105_v11, %v358_v59 }
 0x11a   :  { %v344_v52 = vsel %vm343_vm2, %v4103_v60, %v340_v63  ;;  %v4690_v63 = vor.u32 %v4043_v22, %v3740_v3  ;;  %v3634_v22 = vld [vmem:[#allocation5 + $0x1a0] sm:$0xf]  ;;  %v4019_v3 = vld [vmem:[#allocation5 + $0x1b8] sm:$0xf0] }
 0x11b   :  { %v349_v16 = vsel %vm346_vm3, %v348_v56, %v344_v52  ;;  %1187 = vmatmul.bf16.vlgmr.msra.gmra.mxu1 %v6372_v26  ;;  %v363_v59 = vsel %vm362_vm6, %v4105_v11, %v359_v45  ;;  %v3712_v56 = vld [vmem:[#allocation5 + $0x25c] sm:$0xf0]  ;;  %v4015_v45 = vld [vmem:[#allocation5 + $0x19c] sm:$0xf] }
 0x11c   :  { %v370_v48 = vmul.f32 %v4679_v57, %v349_v16  ;;  %1234 = vmatpush.bf16.msrb.mxu1 %v4682_v8  ;;  %6373 = vst [vmem:[#allocation75_spill] sm:$0xff] %v4690_v63  ;;  %v367_v16 = vor.u32 1.1754944e-38, %v366_v62  ;;  %v4693_v52 = vor.u32 %v4036_v15, %v3712_v56  ;;  %v3628_v8 = vld [vmem:[#allocation5 + $0x1b4] sm:$0xf0]  ;;  %v4029_v62 = vld [vmem:[#allocation5 + $0x20c] sm:$0xf] }
 0x11d   :  { %v4712_v56 = vor.u32 %v4015_v45, %v3628_v8  ;;  %v4716_v57 = vor.u32 %v4029_v62, %v3684_v42  ;;  %v4022_v8 = vld [vmem:[#allocation5 + $0x1d4] sm:$0xf]  ;;  %v4059_v62 = vld [vmem:[#allocation5 + $0x2f8] sm:$0xf0]  ;;  %v4001_v42 = vld [vmem:[#allocation5 + $0x12c] sm:$0xf] }
 0x11e   :  { %v371_v60 = vadd.f32 %v370_v48, %v266_v7  ;;  %v368_v37 = vsel %vm365_vm7, %v367_v16, %v363_v59  ;;  %6374 = vst [vmem:[#allocation76_spill] sm:$0xff] %v4693_v52  ;;  %v4073_v7 = vld [vmem:[#allocation5 + $0x368] sm:$0xf0]  ;;  %v6519_v59 = vld [vmem:[#allocation23_spill] sm:$0xff] }
 0x11f   :  { %v374_v48 = vsub.f32 1.0, %v368_v37  ;;  %v4706_v16 = vor.u32 %v4073_v7, %v3842_v24  ;;  %6379 = vst [vmem:[#allocation79_spill] sm:$0xff] %v4712_v56  ;;  %v4714_v37 = vor.u32 %v4019_v3, %v3634_v22  ;;  %v3656_v24 = vld [vmem:[#allocation5 + $0x1ec] sm:$0xf0]  ;;  %v4734_v22 = vor.u32 %v4012_v6, %v3606_v51  ;;  %v3786_v3 = vld [vmem:[#allocation5 + $0x2e0] sm:$0xf] }
 0x120   :  { %4106 = vtanh.f32 %v371_v60  ;;  %1235 = vmatpush.bf16.msrb.mxu1 %v4690_v63  ;;  %v3600_v63 = vld [vmem:[#allocation5 + $0x17c] sm:$0xf0]  ;;  %6381 = vst [vmem:[#allocation81_spill] sm:$0xff] %v4716_v57  ;;  %v4737_v5 = vor.u32 %v4022_v8, %v3656_v24  ;;  %v4746_v51 = vor.u32 %v4005_v30, %v3578_v31  ;;  %v4045_v24 = vld [vmem:[#allocation5 + $0x288] sm:$0xf0] }
 0x121   :  { %6378 = vst [vmem:[#allocation78_spill] sm:$0xff] %v4706_v16 }
 0x122   :  { %6380 = vst [vmem:[#allocation80_spill] sm:$0xff] %v4714_v37 }
 0x123   :  { %6384 = vst [vmem:[#allocation84_spill] sm:$0xff] %v4734_v22 }
 0x124   :  { %1236 = vmatpush.bf16.msrb.mxu1 %v4693_v52  ;;  %v4008_v52 = vld [vmem:[#allocation5 + $0x164] sm:$0xf]  ;;  %6385 = vst [vmem:[#allocation85_spill] sm:$0xff] %v4737_v5 }
 0x125   :  { %v4732_v45 = vor.u32 %v4008_v52, %v3600_v63  ;;  %6388 = vst [vmem:[#allocation88_spill] sm:$0xff] %v4746_v51  ;;  %v3758_v63 = vld [vmem:[#allocation5 + $0x2a8] sm:$0xf]  ;;  %v4052_v52 = vld [vmem:[#allocation5 + $0x2c0] sm:$0xf0] }
 0x126   :  { %v4107_v11 = vpop.eup %4106  ;;  %v4751_v8 = vor.u32 %v4052_v52, %v3758_v63  ;;  %v4038_v52 = vld [vmem:[#allocation5 + $0x250] sm:$0xf0] }
 0x127   :  { %v4696_v60 = vmul.f32 %v4107_v11, %v374_v48  ;;  %v3814_v48 = vld [vmem:[#allocation5 + $0x318] sm:$0xf]  ;;  %v4066_v11 = vld [vmem:[#allocation5 + $0x330] sm:$0xf0]  ;;  %6383 = vst [vmem:[#allocation83_spill] sm:$0xff] %v4732_v45 }
 0x128   :  { %v4728_v7 = vor.u32 %v4066_v11, %v3814_v48  ;;  %1237 = vmatpush.bf16.msrb.mxu1 %v4716_v57  ;;  %v4740_v48 = vor.u32 %v4059_v62, %v3786_v3  ;;  %v3994_v11 = vld [vmem:[#allocation5 + $0xf4] sm:$0xf]  ;;  %6389 = vst [vmem:[#allocation89_spill] sm:$0xff] %v4751_v8  ;;  %v3987_v3 = vld [vmem:[#allocation5 + $0xbc] sm:$0xf] }
 0x129   :  { %6375 = vst [vmem:[#allocation77_spill] sm:$0xff] %v4696_v60  ;;  %v4710_v15 = vpack.c.bf16 %v4696_v60, %v4696_v60  ;;  %v3572_v60 = vld [vmem:[#allocation5 + $0x144] sm:$0xf0]  ;;  %v3998_v57 = vld [vmem:[#allocation5 + $0x110] sm:$0xf0] }
 0x12a   :  { %6382 = vst [vmem:[#allocation82_spill] sm:$0xff] %v4728_v7  ;;  %v4744_v6 = vor.u32 %v4001_v42, %v3572_v60  ;;  %v3730_v60 = vld [vmem:[#allocation5 + $0x270] sm:$0xf]  ;;  %v3516_v62 = vld [vmem:[#allocation5 + $0xd4] sm:$0xf0] }
 0x12b   :  { %3862 = vmatmul.msk.bf16.vlgmr.msra.gmra.mxu3 %vm4702_vm9, %v4710_v15  ;;  %3865 = vmatmul.msk.bf16.vlgmr.msrb.gmra.mxu0 %vm4702_vm9, %v4710_v15  ;;  %6386 = vst [vmem:[#allocation86_spill] sm:$0xff] %v4740_v48  ;;  %v3522_v42 = vld [vmem:[#allocation5 + $0xc0] sm:$0xf]  ;;  %v4762_v63 = vor.u32 %v4045_v24, %v3730_v60 }
 0x12c   :  { %3868 = vmatmul.msk.bf16.vlgmr.msrb.gmra.mxu2 %vm4702_vm9, %v4710_v15  ;;  %1153 = vmatpush.bf16.msra.mxu3 %v4706_v16  ;;  %6387 = vst [vmem:[#allocation87_spill] sm:$0xff] %v4744_v6 }
 0x12d   :  { %1218 = vmatpush.bf16.msrb.mxu0 %v4712_v56  ;;  %1244 = vmatpush.bf16.msrb.mxu2 %v4714_v37  ;;  %v3544_v37 = vld [vmem:[#allocation5 + $0x10c] sm:$0xf0]  ;;  %v3550_v56 = vld [vmem:[#allocation5 + $0xf8] sm:$0xf]  ;;  %6392 = vst [vmem:[#allocation92_spill] sm:$0xff] %v4762_v63 }
 0x12e   :  { %1238 = vmatpush.bf16.msrb.mxu1 %v4737_v5  ;;  %v4755_v31 = vor.u32 %v3994_v11, %v3544_v37  ;;  %v4757_v30 = vor.u32 %v3998_v57, %v3550_v56  ;;  %v3991_v5 = vld [vmem:[#allocation5 + $0xd8] sm:$0xf0]  ;;  %v4766_v57 = vor.u32 %v3987_v3, %v3516_v62  ;;  %v3702_v37 = vld [vmem:[#allocation5 + $0x238] sm:$0xf]  ;;  %v3980_v11 = vld [vmem:[#allocation5 + $0x84] sm:$0xf] }
 0x12f   :  { %v4768_v56 = vor.u32 %v3991_v5, %v3522_v42  ;;  %v4778_v5 = vor.u32 %v4038_v52, %v3702_v37  ;;  %v3674_v3 = vld [vmem:[#allocation5 + $0x200] sm:$0xf]  ;;  %v4031_v62 = vld [vmem:[#allocation5 + $0x218] sm:$0xf0]  ;;  %v3973_v42 = vld [vmem:[#allocation5 + $0x4c] sm:$0xf] }
 0x130   :  { %1154 = vmatpush.bf16.msra.mxu3 %v4728_v7  ;;  %6390 = vst [vmem:[#allocation90_spill] sm:$0xff] %v4755_v31  ;;  %v4788_v37 = vor.u32 %v4031_v62, %v3674_v3  ;;  %v4024_v52 = vld [vmem:[#allocation5 + $0x1e0] sm:$0xf0]  ;;  %v3822_v62 = vld [vmem:[#allocation5 + $0x320] sm:$0xf] }
 0x131   :  { %1219 = vmatpush.bf16.msrb.mxu0 %v4732_v45  ;;  %1245 = vmatpush.bf16.msrb.mxu2 %v4734_v22  ;;  %6391 = vst [vmem:[#allocation91_spill] sm:$0xff] %v4757_v30  ;;  %v3984_v22 = vld [vmem:[#allocation5 + $0xa0] sm:$0xf0]  ;;  %v3970_v45 = vld [vmem:[#allocation5 + $0x30] sm:$0xf0] }
 0x132   :  { %1393 = vmatpush.bf16.msra.mxu1 %v4547_v54  ;;  %6393 = vst [vmem:[#allocation93_spill] sm:$0xff] %v4766_v57  ;;  %v3488_v54 = vld [vmem:[#allocation5 + $0x9c] sm:$0xf0] }
 0x133   :  { %1239 = vmatmul.bf16.vlgmr.msrb.gmra.mxu1 %v6372_v26  ;;  %6394 = vst [vmem:[#allocation94_spill] sm:$0xff] %v4768_v56  ;;  %v4782_v60 = vor.u32 %v3980_v11, %v3488_v54  ;;  %v3850_v11 = vld [vmem:[#allocation5 + $0x358] sm:$0xf] }
 0x134   :  { %1155 = vmatpush.bf16.msra.mxu3 %v4740_v48  ;;  %6395 = vst [vmem:[#allocation95_spill] sm:$0xff] %v4778_v5 }
 0x135   :  { %1220 = vmatpush.bf16.msrb.mxu0 %v4744_v6  ;;  %1246 = vmatpush.bf16.msrb.mxu2 %v4746_v51  ;;  %v3494_v51 = vld [vmem:[#allocation5 + $0x88] sm:$0xf]  ;;  %6396 = vst [vmem:[#allocation96_spill] sm:$0xff] %v4782_v60  ;;  %v3432_v6 = vld [vmem:[#allocation5 + $0x2c] sm:$0xf0] }
 0x136   :  { %1394 = vmatpush.bf16.msra.mxu1 %v4568_v33  ;;  %v4784_v24 = vor.u32 %v3984_v22, %v3494_v51  ;;  %v3460_v33 = vld [vmem:[#allocation5 + $0x64] sm:$0xf0]  ;;  %6398 = vst [vmem:[#allocation98_spill] sm:$0xff] %v4788_v37 }
 0x137   :  { %v4792_v54 = vor.u32 %v3973_v42, %v3460_v33  ;;  %v3646_v51 = vld [vmem:[#allocation5 + $0x1c8] sm:$0xf]  ;;  %v4067_v42 = vld [vmem:[#allocation5 + $0x338] sm:$0xf0] }
 0x138   :  { %1156 = vmatpush.bf16.msra.mxu3 %v4751_v8  ;;  %6397 = vst [vmem:[#allocation97_spill] sm:$0xff] %v4784_v24  ;;  %v4798_v3 = vor.u32 %v4024_v52, %v3646_v51  ;;  %v4814_v51 = vor.u32 %v4067_v42, %v3822_v62  ;;  %v4046_v62 = vld [vmem:[#allocation5 + $0x290] sm:$0xf0] }
 0x139   :  { %1221 = vmatpush.bf16.msrb.mxu0 %v4755_v31  ;;  %1247 = vmatpush.bf16.msrb.mxu2 %v4757_v30  ;;  %v3466_v30 = vld [vmem:[#allocation5 + $0x50] sm:$0xf]  ;;  %v3977_v31 = vld [vmem:[#allocation5 + $0x68] sm:$0xf0] }
 0x13a   :  { %1395 = vmatpush.bf16.msra.mxu1 %v4578_v53  ;;  %v4794_v22 = vor.u32 %v3977_v31, %v3466_v30  ;;  %v3438_v53 = vld [vmem:[#allocation5 + $0x18] sm:$0xf]  ;;  %6400 = vst [vmem:[#allocation100_spill] sm:$0xff] %v4798_v3 }
 0x13b   :  { %1109 = vmatmul.bf16.vlgmr.msrb.gmra.mxu3 %v6372_v26  ;;  %3871 = vmatmul.msk.bf16.vlgmr.msra.gmra.mxu0 %vm4702_vm9, %v4710_v15  ;;  %v4806_v30 = vor.u32 %v3970_v45, %v3438_v53  ;;  %v3766_v45 = vld [vmem:[#allocation5 + $0x2b0] sm:$0xf] }
 0x13c   :  { %1157 = vmatpush.bf16.msra.mxu3 %v4762_v63  ;;  %3874 = vmatmul.msk.bf16.vlgmr.msra.gmra.mxu2 %vm4702_vm9, %v4710_v15  ;;  %6399 = vst [vmem:[#allocation99_spill] sm:$0xff] %v4794_v22 }
 0x13d   :  { %1222 = vmatpush.bf16.msrb.mxu0 %v4766_v57  ;;  %1248 = vmatpush.bf16.msrb.mxu2 %v4768_v56  ;;  %v4074_v56 = vld [vmem:[#allocation5 + $0x370] sm:$0xf0]  ;;  %6401 = vst [vmem:[#allocation101_spill] sm:$0xff] %v4806_v30 }
 0x13e   :  { %v3966_v57 = vld [vmem:[#allocation5 + $0x14] sm:$0xf]  ;;  %1396 = vmatpush.bf16.msra.mxu1 %v4592_v29  ;;  %v4802_v33 = vor.u32 %v4074_v56, %v3850_v11  ;;  %v4810_v29 = vpop.f32.mrf.mxu1  ;;  %v4053_v56 = vld [vmem:[#allocation5 + $0x2c8] sm:$0xf0]  ;;  %v3738_v11 = vld [vmem:[#allocation5 + $0x278] sm:$0xf] }
 0x13f   :  { %v4804_v31 = vor.u32 %v3966_v57, %v3432_v6  ;;  %v3794_v6 = vld [vmem:[#allocation5 + $0x2e8] sm:$0xf]  ;;  %v4060_v57 = vld [vmem:[#allocation5 + $0x300] sm:$0xf0]  ;;  %v4834_v52 = vor.u32 %v4053_v56, %v3766_v45  ;;  %v4842_v42 = vor.u32 %v4046_v62, %v3738_v11 }
 0x140   :  { %1158 = vmatpush.bf16.msra.mxu3 %v4778_v5  ;;  %v4828_v53 = vor.u32 %v4060_v57, %v3794_v6  ;;  %v3710_v6 = vld [vmem:[#allocation5 + $0x240] sm:$0xf]  ;;  %v4039_v57 = vld [vmem:[#allocation5 + $0x258] sm:$0xf0]  ;;  %v3682_v56 = vld [vmem:[#allocation5 + $0x208] sm:$0xf] }
 0x141   :  { %1223 = vmatpush.bf16.msrb.mxu0 %v4782_v60  ;;  %1249 = vmatpush.bf16.msrb.mxu2 %v4784_v24  ;;  %6402 = vst [vmem:[#allocation102_spill] sm:$0xff] %v4834_v52  ;;  %v4848_v45 = vor.u32 %v4039_v57, %v3710_v6  ;;  %v3858_v6 = vld [vmem:[#allocation5 + $0x360] sm:$0xf]  ;;  %v4075_v57 = vld [vmem:[#allocation5 + $0x378] sm:$0xf0] }
 0x142   :  { %1397 = vmatpush.bf16.msra.mxu1 %v4608_v4  ;;  %6404 = vst [vmem:[#allocation104_spill] sm:$0xff] %v4842_v42  ;;  %v6446_v4 = vld [vmem:[#allocation56_spill] sm:$0xff] }
 0x143   :  { %6405 = vst [vmem:[#allocation105_spill] sm:$0xff] %v4848_v45 }
 0x144   :  { %1159 = vmatpush.bf16.msra.mxu3 %v4788_v37 }
 0x145   :  { %1224 = vmatpush.bf16.msrb.mxu0 %v4792_v54  ;;  %1250 = vmatpush.bf16.msrb.mxu2 %v4794_v22 }
 0x146   :  { %1398 = vmatpush.bf16.msra.mxu1 %v4625_v39  ;;  %v4047_v39 = vld [vmem:[#allocation5 + $0x298] sm:$0xf0] }
 0x148   :  { %1160 = vmatpush.bf16.msra.mxu3 %v4798_v3 }
 0x149   :  { %1225 = vmatpush.bf16.msrb.mxu0 %v4804_v31  ;;  %1251 = vmatpush.bf16.msrb.mxu2 %v4806_v30 }
 0x14a   :  { %1399 = vmatpush.bf16.msra.mxu1 %v4636_v2 }
 0x14b   :  { %1161 = vmatmul.bf16.vlgmr.msra.gmra.mxu3 %v6372_v26 }
 0x14c   :  { %1205 = vmatpush.bf16.msrb.mxu3 %v4802_v33  ;;  %3877 = vmatmul.msk.bf16.vlgmr.msrb.gmra.mxu0 %vm4702_vm9, %v4710_v15 }
 0x14d   :  { %1380 = vmatpush.bf16.msra.mxu0 %v4424_v9  ;;  %1406 = vmatpush.bf16.msra.mxu2 %v4427_v12 }
 0x14e   :  { %3880 = vmatmul.msk.bf16.vlgmr.msrb.gmra.mxu2 %vm4702_vm9, %v4710_v15  ;;  %v4837_v15 = vpop.f32.mrf.mxu1  ;;  %1400 = vmatpush.bf16.msra.mxu1 %v4648_v41  ;;  %v4025_v41 = vld [vmem:[#allocation5 + $0x1e8] sm:$0xf0] }
 0x14f   :  { %6403 = vst [vmem:[#allocation103_spill] sm:$0xff] %v4837_v15  ;;  %v4032_v15 = vld [vmem:[#allocation5 + $0x220] sm:$0xf0] }
 0x150   :  { %1206 = vmatpush.bf16.msrb.mxu3 %v4814_v51  ;;  %v4856_v62 = vor.u32 %v4032_v15, %v3682_v56  ;;  %v3830_v15 = vld [vmem:[#allocation5 + $0x328] sm:$0xf]  ;;  %v4068_v56 = vld [vmem:[#allocation5 + $0x340] sm:$0xf0] }
 0x151   :  { %1381 = vmatpush.bf16.msra.mxu0 %v4438_v23  ;;  %1407 = vmatpush.bf16.msra.mxu2 %v4446_v27 }
 0x152   :  { %1445 = vmatpush.bf16.msrb.mxu1 %v4706_v16  ;;  %6407 = vst [vmem:[#allocation107_spill] sm:$0xff] %v4856_v62  ;;  %v3654_v16 = vld [vmem:[#allocation5 + $0x1d0] sm:$0xf] }
 0x154   :  { %1207 = vmatpush.bf16.msrb.mxu3 %v4828_v53 }
 0x155   :  { %1382 = vmatpush.bf16.msra.mxu0 %v4458_v35  ;;  %1408 = vmatpush.bf16.msra.mxu2 %v4464_v44 }
 0x156   :  { %1446 = vmatpush.bf16.msrb.mxu1 %v4728_v7  ;;  %v4853_v11 = vpop.f32.mrf.mxu1  ;;  %v4862_v7 = vor.u32 %v4025_v41, %v3654_v16  ;;  %v4874_v41 = vor.u32 %v4068_v56, %v3830_v15  ;;  %v4887_v56 = vpop.f32.mrf.mxu2 }
 0x157   :  { %6406 = vst [vmem:[#allocation106_spill] sm:$0xff] %v4853_v11  ;;  %v4865_v11 = vor.u32 %v4075_v57, %v3858_v6  ;;  %v3802_v6 = vld [vmem:[#allocation5 + $0x2f0] sm:$0xf]  ;;  %v4061_v57 = vld [vmem:[#allocation5 + $0x308] sm:$0xf0] }
 0x158   :  { %1208 = vmatpush.bf16.msrb.mxu3 %v4834_v52  ;;  %6408 = vst [vmem:[#allocation108_spill] sm:$0xff] %v4862_v7  ;;  %v4885_v15 = vor.u32 %v4061_v57, %v3802_v6 }
 0x159   :  { %1383 = vmatpush.bf16.msra.mxu0 %v4472_v50  ;;  %1409 = vmatpush.bf16.msra.mxu2 %v4487_v55  ;;  %6409 = vst [vmem:[#allocation109_spill] sm:$0xff] %v4865_v11 }
 0x15a   :  { %1447 = vmatpush.bf16.msrb.mxu1 %v4740_v48  ;;  %v4869_v48 = vpop.f32.mrf.mxu0  ;;  %6410 = vst [vmem:[#allocation110_spill] sm:$0xff] %v4874_v41 }
 0x15b   :  { %6412 = vst [vmem:[#allocation112_spill] sm:$0xff] %v4885_v15 }
 0x15c   :  { %1209 = vmatpush.bf16.msrb.mxu3 %v4842_v42 }
 0x15d   :  { %1384 = vmatpush.bf16.msra.mxu0 %v4509_v1  ;;  %1410 = vmatpush.bf16.msra.mxu2 %v4511_v0 }
 0x15e   :  { %1448 = vmatpush.bf16.msrb.mxu1 %v4751_v8  ;;  %v4877_v16 = vpop.f32.mrf.mxu1 }
 0x15f   :  { %6411 = vst [vmem:[#allocation111_spill] sm:$0xff] %v4877_v16  ;;  %v4054_v16 = vld [vmem:[#allocation5 + $0x2d0] sm:$0xf0] }
 0x160   :  { %1210 = vmatpush.bf16.msrb.mxu3 %v4848_v45 }
 0x161   :  { %1385 = vmatpush.bf16.msra.mxu0 %v4521_v14  ;;  %1411 = vmatpush.bf16.msra.mxu2 %v4523_v21 }
 0x162   :  { %1449 = vmatpush.bf16.msrb.mxu1 %v4762_v63  ;;  %v3774_v63 = vld [vmem:[#allocation5 + $0x2b8] sm:$0xf]  ;;  %v4892_v8 = vpop.f32.mrf.mxu0 }
 0x163   :  { %6413 = vst [vmem:[#allocation113_spill] sm:$0xff] %v4892_v8  ;;  %v4895_v2 = vor.u32 %v4054_v16, %v3774_v63  ;;  %v4040_v8 = vld [vmem:[#allocation5 + $0x260] sm:$0xf0]  ;;  %v4907_v63 = vpop.f32.mrf.mxu2 }
 0x164   :  { %1211 = vmatpush.bf16.msrb.mxu3 %v4856_v62  ;;  %6417 = vst [vmem:[#allocation117_spill] sm:$0xff] %v4907_v63  ;;  %v4026_v63 = vld [vmem:[#allocation5 + $0x1f0] sm:$0xf0] }
 0x165   :  { %1386 = vmatpush.bf16.msra.mxu0 %v4533_v32  ;;  %1412 = vmatpush.bf16.msra.mxu2 %v4535_v38  ;;  %6414 = vst [vmem:[#allocation114_spill] sm:$0xff] %v4895_v2 }
 0x166   :  { %1450 = vmatpush.bf16.msrb.mxu1 %v4778_v5  ;;  %v3746_v5 = vld [vmem:[#allocation5 + $0x280] sm:$0xf]  ;;  %v4899_v6 = vpop.f32.mrf.mxu1 }
 0x167   :  { %6415 = vst [vmem:[#allocation115_spill] sm:$0xff] %v4899_v6  ;;  %v4903_v57 = vor.u32 %v4047_v39, %v3746_v5  ;;  %v4033_v6 = vld [vmem:[#allocation5 + $0x228] sm:$0xf0] }
 0x168   :  { %1212 = vmatpush.bf16.msrb.mxu3 %v4862_v7 }
 0x169   :  { %1387 = vmatpush.bf16.msra.mxu0 %v4545_v49  ;;  %1413 = vmatpush.bf16.msra.mxu2 %v4550_v20  ;;  %6416 = vst [vmem:[#allocation116_spill] sm:$0xff] %v4903_v57 }
 0x16a   :  { %1451 = vmatpush.bf16.msrb.mxu1 %v4788_v37  ;;  %v3718_v37 = vld [vmem:[#allocation5 + $0x248] sm:$0xf] }
 0x16b   :  { %1213 = vmatmul.bf16.vlgmr.msrb.gmra.mxu3 %v6372_v26  ;;  %v4910_v16 = vor.u32 %v4040_v8, %v3718_v37  ;;  %v4926_v37 = vpop.f32.mrf.mxu2 }
 0x16c   :  { %1257 = vmatpush.bf16.msra.mxu3 %v4865_v11  ;;  %6423 = vst [vmem:[#allocation123_spill] sm:$0xff] %v4926_v37 }
 0x16d   :  { %1432 = vmatpush.bf16.msrb.mxu0 %v4435_v18  ;;  %1458 = vmatpush.bf16.msrb.mxu2 %v4559_v13  ;;  %6418 = vst [vmem:[#allocation118_spill] sm:$0xff] %v4910_v16 }
 0x16e   :  { %1452 = vmatpush.bf16.msrb.mxu1 %v4798_v3  ;;  %v4913_v3 = vpop.f32.mrf.mxu0  ;;  %v4916_v39 = vpop.f32.mrf.mxu1 }
 0x16f   :  { %6419 = vst [vmem:[#allocation119_spill] sm:$0xff] %v4913_v3  ;;  %v6427_v3 = vld [vmem:[#allocation67_spill] sm:$0xff] }
 0x170   :  { %1258 = vmatpush.bf16.msra.mxu3 %v4874_v41  ;;  %6420 = vst [vmem:[#allocation120_spill] sm:$0xff] %v4916_v39  ;;  %v6451_v41 = vld [vmem:[#allocation73_spill] sm:$0xff] }
 0x171   :  { %1433 = vmatpush.bf16.msrb.mxu0 %v4456_v34  ;;  %1459 = vmatpush.bf16.msrb.mxu2 %v4570_v36 }
 0x174   :  { %1259 = vmatpush.bf16.msra.mxu3 %v4885_v15 }
 0x175   :  { %1434 = vmatpush.bf16.msrb.mxu0 %v4470_v46  ;;  %1460 = vmatpush.bf16.msrb.mxu2 %v4582_v61  ;;  %v3690_v61 = vld [vmem:[#allocation5 + $0x210] sm:$0xf] }
 0x176   :  { %v4919_v5 = vor.u32 %v4033_v6, %v3690_v61  ;;  %v4930_v39 = vpop.f32.mrf.mxu1  ;;  %v4932_v61 = vpop.f32.mrf.mxu0  ;;  %v6426_v6 = vld [vmem:[#allocation37_spill] sm:$0xff] }
 0x177   :  { %6424 = vst [vmem:[#allocation124_spill] sm:$0xff] %v4930_v39 }
 0x178   :  { %1260 = vmatpush.bf16.msra.mxu3 %v4895_v2  ;;  %6421 = vst [vmem:[#allocation121_spill] sm:$0xff] %v4919_v5 }
 0x179   :  { %1435 = vmatpush.bf16.msrb.mxu0 %v4493_v58  ;;  %1461 = vmatpush.bf16.msrb.mxu2 %v4597_v40  ;;  %v3662_v40 = vld [vmem:[#allocation5 + $0x1d8] sm:$0xf]  ;;  %6425 = vst [vmem:[#allocation125_spill] sm:$0xff] %v4932_v61  ;;  %v6432_v61 = vld [vmem:[#allocation19_spill] sm:$0xff] }
 0x17a   :  { %v4924_v8 = vor.u32 %v4026_v63, %v3662_v40  ;;  %v6428_v40 = vld [vmem:[#allocation13_spill] sm:$0xff]  ;;  %v4940_v63 = vpop.f32.mrf.mxu2 }
 0x17b   :  { %6429 = vst [vmem:[#allocation126_spill] sm:$0xff] %v4940_v63  ;;  %v6438_v63 = vld [vmem:[#allocation31_spill] sm:$0xff] }
 0x17c   :  { %1261 = vmatpush.bf16.msra.mxu3 %v4903_v57  ;;  %6422 = vst [vmem:[#allocation122_spill] sm:$0xff] %v4924_v8 }
 0x17d   :  { %1436 = vmatpush.bf16.msrb.mxu0 %v4516_v10  ;;  %1462 = vmatpush.bf16.msrb.mxu2 %v4612_v25 }
 0x17e   :  { %v4943_v39 = vpop.f32.mrf.mxu0 }
 0x17f   :  { %6431 = vst [vmem:[#allocation127_spill] sm:$0xff] %v4943_v39  ;;  %v6441_v39 = vld [vmem:[#allocation39_spill] sm:$0xff] }
 0x180   :  { %1262 = vmatpush.bf16.msra.mxu3 %v4910_v16 }
 0x181   :  { %1437 = vmatpush.bf16.msrb.mxu0 %v4528_v28  ;;  %1463 = vmatpush.bf16.msrb.mxu2 %v4627_v47 }
 0x182   :  { %v4946_v47 = vpop.f32.mrf.mxu2 }
 0x183   :  { %6433 = vst [vmem:[#allocation128_spill] sm:$0xff] %v4946_v47  ;;  %v6442_v47 = vld [vmem:[#allocation43_spill] sm:$0xff] }
 0x184   :  { %1263 = vmatpush.bf16.msra.mxu3 %v4919_v5 }
 0x185   :  { %1438 = vmatpush.bf16.msrb.mxu0 %v4540_v43  ;;  %1464 = vmatpush.bf16.msrb.mxu2 %v4640_v19  ;;  %v6430_v19 = vld [vmem:[#allocation16_spill] sm:$0xff] }
 0x188   :  { %1264 = vmatpush.bf16.msra.mxu3 %v4924_v8  ;;  %v1136_v37 = vpop.f32.mrf.mxu1  ;;  %v4949_v8 = vpop.f32.mrf.mxu0 }
 0x189   :  { %1439 = vmatpush.bf16.msrb.mxu0 %v6426_v6  ;;  %1465 = vmatpush.bf16.msrb.mxu2 %v6427_v3  ;;  %6435 = vst [vmem:[#allocation129_spill] sm:$0xff] %v4949_v8  ;;  %v6436_v3 = vld [vmem:[#allocation27_spill] sm:$0xff]  ;;  %v6444_v8 = vld [vmem:[#allocation48_spill] sm:$0xff] }
 0x18a   :  { %v6448_v6 = vld [vmem:[#allocation64_spill] sm:$0xff] }
 0x18b   :  { %1265 = vmatmul.bf16.vlgmr.msra.gmra.mxu3 %v6372_v26  ;;  %v4952_v26 = vpop.f32.mrf.mxu2 }
 0x18c   :  { %1419 = vmatpush.bf16.msrb.mxu3 %v4433_v17  ;;  %v6434_v17 = vld [vmem:[#allocation23_spill] sm:$0xff]  ;;  %6437 = vst [vmem:[#allocation130_spill] sm:$0xff] %v4952_v26 }
 0x190   :  { %1420 = vmatpush.bf16.msrb.mxu3 %v6428_v40  ;;  %v1138_v25 = vpop.f32.mrf.mxu1  ;;  %v4955_v5 = vpop.f32.mrf.mxu0 }
 0x191   :  { %6439 = vst [vmem:[#allocation131_spill] sm:$0xff] %v4955_v5 }
 0x193   :  { %v4960_v25 = vpop.f32.mrf.mxu2 }
 0x194   :  { %1421 = vmatpush.bf16.msrb.mxu3 %v6430_v19  ;;  %v6440_v19 = vld [vmem:[#allocation36_spill] sm:$0xff]  ;;  %6443 = vst [vmem:[#allocation132_spill] sm:$0xff] %v4960_v25 }
 0x198   :  { %1422 = vmatpush.bf16.msrb.mxu3 %v6432_v61  ;;  %v1188_v40 = vpop.f32.mrf.mxu1 }
 0x19c   :  { %1423 = vmatpush.bf16.msrb.mxu3 %v6434_v17 }
 0x1a0   :  { %1424 = vmatpush.bf16.msrb.mxu3 %v6436_v3  ;;  %v1190_v61 = vpop.f32.mrf.mxu1  ;;  %v6445_v3 = vld [vmem:[#allocation52_spill] sm:$0xff] }
 0x1a4   :  { %1425 = vmatpush.bf16.msrb.mxu3 %v6438_v63 }
 0x1a8   :  { %1426 = vmatpush.bf16.msrb.mxu3 %v6440_v19  ;;  %v1123_v17 = vpop.f32.mrf.mxu0 }
 0x1a9   :  { %v1137_v36 = vadd.f32 %v1136_v37, %v1123_v17 }
 0x1ab   :  { %v1344_v19 = vadd.f32 %v1137_v36, %v4810_v29 }
 0x1ac   :  { %1471 = vmatpush.bf16.msra.mxu3 %v6441_v39  ;;  %v6447_v39 = vld [vmem:[#allocation60_spill] sm:$0xff] }
 0x1ad   :  { %v3884_v57 = vmul.f32 -1.442695, %v1344_v19 }
 0x1ae   :  { %v1097_v26 = vpop.f32.mrf.mxu3 }
 0x1af   :  { %v1149_v16 = vpop.f32.mrf.mxu2  ;;  %4108 = vpow2.f32 %v3884_v57 }
 0x1b0   :  { %1472 = vmatpush.bf16.msra.mxu3 %v6442_v47  ;;  %v1125_v63 = vpop.f32.mrf.mxu0  ;;  %v1240_v5 = vpop.f32.mrf.mxu1 }
 0x1b4   :  { %1473 = vmatpush.bf16.msra.mxu3 %v6444_v8 }
 0x1b5   :  { %v4109_v36 = vpop.eup %4108 }
 0x1b6   :  { %v1099_v61 = vpop.f32.mrf.mxu3 }
 0x1b7   :  { %v1151_v47 = vpop.f32.mrf.mxu2 }
 0x1b8   :  { %1474 = vmatpush.bf16.msra.mxu3 %v6445_v3  ;;  %v1175_v25 = vpop.f32.mrf.mxu0  ;;  %v1242_v8 = vpop.f32.mrf.mxu1  ;;  %v6449_v3 = vld [vmem:[#allocation68_spill] sm:$0xff] }
 0x1bc   :  { %1475 = vmatpush.bf16.msra.mxu3 %v6446_v4 }
 0x1be   :  { %v1110_v13 = vpop.f32.mrf.mxu3 }
 0x1bf   :  { %v1111_v17 = vadd.f32 %v1110_v13, %v1097_v26  ;;  %v4969_v37 = vpop.f32.mrf.mxu2 }
 0x1c0   :  { %1476 = vmatpush.bf16.msra.mxu3 %v6447_v39  ;;  %v1177_v63 = vpop.f32.mrf.mxu0  ;;  %v1348_v39 = vadd.f32 1.0, %v4109_v36 }
 0x1c1   :  { %v1324_v4 = vadd.f32 %v1111_v17, %v4869_v48 }
 0x1c2   :  { %vm1354_vm15 = vweird.f32 %v1348_v39 }
 0x1c3   :  { %v3883_v29 = vmul.f32 -1.442695, %v1324_v4  ;;  %v4979_v4 = vld [vmem:[%s6079_s5] sm:$0xf] }
 0x1c4   :  { %1477 = vmatpush.bf16.msra.mxu3 %v6448_v6 }
 0x1c5   :  { %4110 = vpow2.f32 %v3883_v29  ;;  %v1189_v29 = vadd.f32 %v1188_v40, %v1175_v25 }
 0x1c6   :  { %v1112_v47 = vpop.f32.mrf.mxu3  ;;  %4112 = vrcp.f32 %v1348_v39 }
 0x1c7   :  { %v1203_v19 = vpop.f32.mrf.mxu2 }
 0x1c8   :  { %1478 = vmatpush.bf16.msra.mxu3 %v6449_v3 }
 0x1c9   :  { %v1227_v61 = vpop.f32.mrf.mxu0 }
 0x1ca   :  { %v4972_v6 = vadd.f32 %v1240_v5, %v1227_v61  ;;  %v4982_v5 = vperm.slane %v4979_v4, 0 }
 0x1cb   :  { %v4111_v57 = vpop.eup %4110 }
 0x1cc   :  { %v1328_v8 = vadd.f32 1.0, %v4111_v57  ;;  %v4113_v13 = vpop.eup %4112  ;;  %6450 = vst [vmem:[#allocation133_spill] sm:$0xff] %v4982_v5  ;;  %v1270_v15 = vadd.f32 %v1189_v29, %v4982_v5 }
 0x1cd   :  { %v1350_v20 = vmul.f32 %v4113_v13, %v1348_v39  ;;  %vm1355_vm14 = vweird.f32 %v4113_v13 }
 0x1ce   :  { %4114 = vrcp.f32 %v1328_v8  ;;  %v1162_v3 = vpop.f32.mrf.mxu3  ;;  %v1340_v61 = vand.u32 2147483648, %v1328_v8  ;;  %vm1334_vm11 = vweird.f32 %v1328_v8  ;;  %v3881_v25 = vmul.f32 -1.442695, %v1270_v15  ;;  %vm1356_vm0 = vmor %vm1354_vm15, %vm1355_vm14  ;;  %v4990_v15 = vpop.permute.xlu0 %1374 }
 0x1cf   :  { %v1351_v36 = vsub.f32 1.0, %v1350_v20  ;;  %v1163_v2 = vadd.f32 %v1162_v3, %v1149_v16  ;;  %v1358_v16 = vand.u32 2147483647, %v1348_v39  ;;  %6454 = vst [vmem:[#allocation73_spill] sm:$0xff] %v4990_v15  ;;  %vm1376_vm2 = vcmp.eq.s32.totalorder %v4990_v15, 1 }
 0x1d0   :  { %v1341_v21 = vor.u32 1.1754944e-38, %v1340_v61  ;;  %4116 = vpow2.f32 %v3881_v25 }
 0x1d1   :  { %v4974_v26 = vpop.f32.mrf.mxu2  ;;  %v1229_v63 = vpop.f32.mrf.mxu0  ;;  %v1352_v38 = vmul.f32 %v4113_v13, %v1351_v36  ;;  %v1364_v10 = vadd.f32 %v6451_v41, %v1163_v2  ;;  %vm1359_vm1 = vcmp.eq.f32.partialorder %v1358_v16, 8.507059e+37  ;;  %v6457_v16 = vld [vmem:[#allocation44_spill] sm:$0xff] }
 0x1d2   :  { %v1338_v63 = vand.u32 2147483647, %v1328_v8 }
 0x1d3   :  { %v1353_v40 = vadd.f32 %v4113_v13, %v1352_v38  ;;  %v6452_v38 = vld [vmem:[#allocation77_spill] sm:$0xff] }
 0x1d4   :  { %v4115_v48 = vpop.eup %4114  ;;  %vm1339_vm13 = vcmp.eq.f32.partialorder %v1338_v63, 8.507059e+37 }
 0x1d5   :  { %v1330_v17 = vmul.f32 %v4115_v48, %v1328_v8  ;;  %vm1335_vm10 = vweird.f32 %v4115_v48 }
 0x1d6   :  { %v1164_v47 = vpop.f32.mrf.mxu3  ;;  %vm1336_vm12 = vmor %vm1334_vm11, %vm1335_vm10 }
 0x1d7   :  { %v1331_v19 = vsub.f32 1.0, %v1330_v17  ;;  %v1360_v47 = vand.u32 2147483648, %v1348_v39 }
 0x1d9   :  { %v1255_v57 = vpop.f32.mrf.mxu2  ;;  %v1332_v43 = vmul.f32 %v4115_v48, %v1331_v19  ;;  %v1361_v8 = vor.u32 1.1754944e-38, %v1360_v47  ;;  %v4993_v19 = vperm.slane %v4979_v4, 1 }
 0x1db   :  { %v1333_v28 = vadd.f32 %v4115_v48, %v1332_v43  ;;  %v1357_v43 = vsel %vm1356_vm0, %v4113_v13, %v1353_v40 }
 0x1dd   :  { %v1337_v20 = vsel %vm1336_vm12, %v4115_v48, %v1333_v28  ;;  %v1362_v28 = vsel %vm1359_vm1, %v1361_v8, %v1357_v43  ;;  %v4117_v48 = vpop.eup %4116 }
 0x1de   :  { %v1342_v17 = vsel %vm1339_vm13, %v1341_v21, %v1337_v20  ;;  %v1368_v29 = vsub.f32 1.0, %v1362_v28  ;;  %v381_v21 = vsel %vm380_vm8, %v6452_v38, 0.0  ;;  %v1277_v13 = vadd.f32 1.0, %v4117_v48  ;;  %v6459_v48 = vld [vmem:[#allocation49_spill] sm:$0xff] }
 0x1df   :  { %v1365_v3 = vmul.f32 %v1364_v10, %v1342_v17  ;;  %v1370_v39 = vmul.f32 %v1362_v28, %v381_v21  ;;  %v6456_v17 = vld [vmem:[#allocation79_spill] sm:$0xff]  ;;  %v6461_v38 = vld [vmem:[#allocation53_spill] sm:$0xff] }
 0x1e0   :  { %vm1283_vm4 = vweird.f32 %v1277_v13  ;;  %v1287_v15 = vand.u32 2147483647, %v1277_v13 }
 0x1e1   :  { %v1366_v36 = vadd.f32 %v1365_v3, %v4887_v56 }
 0x1e2   :  { %vm1288_vm6 = vcmp.eq.f32.partialorder %v1287_v15, 8.507059e+37 }
 0x1e3   :  { %4118 = vtanh.f32 %v1366_v36  ;;  %v6458_v36 = vld [vmem:[#allocation83_spill] sm:$0xff] }
 0x1e4   :  { %4120 = vrcp.f32 %v1277_v13 }
 0x1e9   :  { %v4119_v2 = vpop.eup %4118 }
 0x1ea   :  { %v1369_v10 = vmul.f32 %v4119_v2, %v1368_v29  ;;  %v4121_v3 = vpop.eup %4120  ;;  %v6460_v29 = vld [vmem:[#allocation87_spill] sm:$0xff] }
 0x1eb   :  { %v1279_v28 = vmul.f32 %v4121_v3, %v1277_v13  ;;  %vm1284_vm3 = vweird.f32 %v4121_v3 }
 0x1ec   :  { %v1371_v61 = vadd.f32 %v1370_v39, %v1369_v10  ;;  %vm1285_vm5 = vmor %vm1283_vm4, %vm1284_vm3 }
 0x1ed   :  { %v1280_v2 = vsub.f32 1.0, %v1279_v28  ;;  %v5023_v28 = vperm.slane %v4979_v4, 3 }
 0x1ee   :  { %v1214_v56 = vpop.f32.mrf.mxu3  ;;  %v4999_v63 = vsel %vm1376_vm2, %v1371_v61, %v381_v21  ;;  %v6462_v21 = vld [vmem:[#allocation90_spill] sm:$0xff]  ;;  %v6463_v61 = vld [vmem:[#allocation57_spill] sm:$0xff] }
 0x1ef   :  { %v1215_v57 = vadd.f32 %v1214_v56, %v4969_v37  ;;  %v5004_v40 = vpack.c.bf16 %v4999_v63, %v4999_v63  ;;  %v6455_v37 = vld [vmem:[#allocation40_spill] sm:$0xff]  ;;  %v1281_v39 = vmul.f32 %v4121_v3, %v1280_v2 }
 0x1f1   :  { %v1271_v20 = vadd.f32 %v1215_v57, %v4993_v19  ;;  %1388 = vmatmul.bf16.vlgmr.msra.gmra.mxu0 %v5004_v40  ;;  %1414 = vmatmul.bf16.vlgmr.msra.gmra.mxu2 %v5004_v40  ;;  %v6464_v57 = vld [vmem:[#allocation93_spill] sm:$0xff] }
 0x1f2   :  { %1484 = vmatpush.bf16.msra.mxu0 %v6455_v37  ;;  %1510 = vmatpush.bf16.msra.mxu2 %v6456_v17 }
 0x1f3   :  { %v3882_v25 = vmul.f32 -1.442695, %v1271_v20 }
 0x1f5   :  { %4122 = vpow2.f32 %v3882_v25  ;;  %v1282_v25 = vadd.f32 %v4121_v3, %v1281_v39 }
 0x1f6   :  { %v1216_v47 = vpop.f32.mrf.mxu3  ;;  %1485 = vmatpush.bf16.msra.mxu0 %v6457_v16  ;;  %1511 = vmatpush.bf16.msra.mxu2 %v6458_v36 }
 0x1f7   :  { %v6465_v47 = vld [vmem:[#allocation61_spill] sm:$0xff]  ;;  %v1286_v39 = vsel %vm1285_vm5, %v4121_v3, %v1282_v25  ;;  %v6468_v25 = vld [vmem:[#allocation80_spill] sm:$0xff] }
 0x1fa   :  { %1486 = vmatpush.bf16.msra.mxu0 %v6459_v48  ;;  %1512 = vmatpush.bf16.msra.mxu2 %v6460_v29 }
 0x1fb   :  { %v4123_v43 = vpop.eup %4122 }
 0x1fc   :  { %v1296_v8 = vadd.f32 1.0, %v4123_v43  ;;  %v1289_v43 = vand.u32 2147483648, %v1277_v13 }
 0x1fe   :  { %4124 = vrcp.f32 %v1296_v8  ;;  %1487 = vmatpush.bf16.msra.mxu0 %v6461_v38  ;;  %1513 = vmatpush.bf16.msra.mxu2 %v6462_v21  ;;  %v6466_v21 = vld [vmem:[#allocation65_spill] sm:$0xff]  ;;  %v1308_v38 = vand.u32 2147483648, %v1296_v8  ;;  %vm1302_vm10 = vweird.f32 %v1296_v8  ;;  %v1306_v29 = vand.u32 2147483647, %v1296_v8 }
 0x200   :  { %vm1307_vm12 = vcmp.eq.f32.partialorder %v1306_v29, 8.507059e+37 }
 0x201   :  { %1440 = vmatmul.bf16.vlgmr.msrb.gmra.mxu0 %v5004_v40  ;;  %1466 = vmatmul.bf16.vlgmr.msrb.gmra.mxu2 %v5004_v40 }
 0x202   :  { %1488 = vmatpush.bf16.msra.mxu0 %v6463_v61  ;;  %1514 = vmatpush.bf16.msra.mxu2 %v6464_v57  ;;  %v5026_v61 = vperm.slane %v4979_v4, 2  ;;  %v1290_v57 = vor.u32 1.1754944e-38, %v1289_v43 }
 0x204   :  { %v4125_v10 = vpop.eup %4124  ;;  %v1291_v13 = vsel %vm1288_vm6, %v1290_v57, %v1286_v39  ;;  %v1309_v57 = vor.u32 1.1754944e-38, %v1308_v38  ;;  %v6472_v39 = vld [vmem:[#allocation70_spill] sm:$0xff] }
 0x205   :  { %v1298_v56 = vmul.f32 %v4125_v10, %v1296_v8  ;;  %vm1303_vm7 = vweird.f32 %v4125_v10 }
 0x206   :  { %1489 = vmatpush.bf16.msra.mxu0 %v6465_v47  ;;  %1515 = vmatpush.bf16.msra.mxu2 %v4782_v60  ;;  %vm1304_vm11 = vmor %vm1302_vm10, %vm1303_vm7 }
 0x207   :  { %v1299_v20 = vsub.f32 1.0, %v1298_v56 }
 0x209   :  { %v1300_v41 = vmul.f32 %v4125_v10, %v1299_v20  ;;  %v1272_v20 = vadd.f32 %v4972_v6, %v5026_v61  ;;  %v6469_v6 = vld [vmem:[#allocation84_spill] sm:$0xff] }
 0x20a   :  { %1490 = vmatpush.bf16.msra.mxu0 %v6466_v21  ;;  %1516 = vmatpush.bf16.msra.mxu2 %v4792_v54 }
 0x20b   :  { %v1301_v47 = vadd.f32 %v4125_v10, %v1300_v41 }
 0x20d   :  { %v1305_v41 = vsel %vm1304_vm11, %v4125_v10, %v1301_v47 }
 0x20e   :  { %v1266_v2 = vpop.f32.mrf.mxu3  ;;  %1517 = vmatpush.bf16.msra.mxu2 %v4804_v31 }
 0x20f   :  { %v1267_v56 = vadd.f32 %v1266_v2, %v4974_v26  ;;  %v6467_v26 = vld [vmem:[#allocation69_spill] sm:$0xff]  ;;  %v6470_v2 = vld [vmem:[#allocation88_spill] sm:$0xff] }
 0x210   :  { %1491 = vmatpush.bf16.msra.mxu0 %v6467_v26 }
 0x211   :  { %v1273_v60 = vadd.f32 %v1267_v56, %v5023_v28  ;;  %1518 = vmatmul.bf16.vlgmr.msra.gmra.mxu2 %v5004_v40  ;;  %v6471_v56 = vld [vmem:[#allocation91_spill] sm:$0xff] }
 0x212   :  { %1672 = vmatpush.bf16.msrb.mxu2 %v4424_v9 }
 0x213   :  { %v1312_v4 = vmul.f32 %v1291_v13, %v1273_v60  ;;  %1492 = vmatmul.bf16.vlgmr.msra.gmra.mxu0 %v5004_v40  ;;  %v1310_v60 = vsel %vm1307_vm12, %v1309_v57, %v1305_v41  ;;  %v6473_v13 = vld [vmem:[#allocation94_spill] sm:$0xff]  ;;  %v6477_v41 = vld [vmem:[#allocation75_spill] sm:$0xff]  ;;  %v6479_v57 = vld [vmem:[#allocation81_spill] sm:$0xff] }
 0x214   :  { %1536 = vmatpush.bf16.msrb.mxu0 %v6468_v25  ;;  %v1315_v8 = vsub.f32 1.0, %v1310_v60  ;;  %v1317_v47 = vmul.f32 0.0, %v1310_v60  ;;  %v6481_v60 = vld [vmem:[#allocation34_spill] sm:$0xff] }
 0x215   :  { %v1313_v3 = vadd.f32 %v1312_v4, %v1272_v20  ;;  %v6474_v20 = vld [vmem:[#allocation71_spill] sm:$0xff]  ;;  %v6475_v4 = vld [vmem:[#allocation72_spill] sm:$0xff] }
 0x216   :  { %v1268_v15 = vpop.f32.mrf.mxu3  ;;  %1673 = vmatpush.bf16.msrb.mxu2 %v4438_v23 }
 0x217   :  { %4126 = vtanh.f32 %v1313_v3  ;;  %v6476_v3 = vld [vmem:[#allocation74_spill] sm:$0xff]  ;;  %v6478_v15 = vld [vmem:[#allocation76_spill] sm:$0xff] }
 0x218   :  { %1537 = vmatpush.bf16.msrb.mxu0 %v6469_v6 }
 0x21a   :  { %1674 = vmatpush.bf16.msrb.mxu2 %v4458_v35 }
 0x21c   :  { %1538 = vmatpush.bf16.msrb.mxu0 %v6470_v2 }
 0x21d   :  { %v4127_v43 = vpop.eup %4126 }
 0x21e   :  { %v1316_v10 = vmul.f32 %v4127_v43, %v1315_v8  ;;  %1675 = vmatpush.bf16.msrb.mxu2 %v4472_v50  ;;  %v6482_v8 = vld [vmem:[#allocation24_spill] sm:$0xff]  ;;  %v6483_v43 = vld [vmem:[#allocation110_spill] sm:$0xff] }
 0x220   :  { %v5044_v38 = vadd.f32 %v1317_v47, %v1316_v10  ;;  %1539 = vmatpush.bf16.msrb.mxu0 %v6471_v56  ;;  %v6484_v10 = vld [vmem:[#allocation26_spill] sm:$0xff]  ;;  %v6485_v47 = vld [vmem:[#allocation41_spill] sm:$0xff] }
 0x222   :  { %v5050_v29 = vpack.c.bf16 %v5044_v38, %v5044_v38  ;;  %1676 = vmatpush.bf16.msrb.mxu2 %v4509_v1 }
 0x224   :  { %3887 = vmatmul.msk.bf16.vlgmr.msra.gmra.mxu1 %vm4702_vm9, %v5050_v29  ;;  %3890 = vmatmul.msk.bf16.vlgmr.msrb.gmra.mxu3 %vm4702_vm9, %v5050_v29 }
 0x225   :  { %1497 = vmatpush.bf16.msra.mxu1 %v4802_v33  ;;  %1523 = vmatpush.bf16.msrb.mxu3 %v6472_v39 }
 0x226   :  { %1540 = vmatpush.bf16.msrb.mxu0 %v6473_v13  ;;  %1677 = vmatpush.bf16.msrb.mxu2 %v4521_v14 }
 0x229   :  { %1498 = vmatpush.bf16.msra.mxu1 %v4814_v51  ;;  %1524 = vmatpush.bf16.msrb.mxu3 %v6474_v20 }
 0x22a   :  { %1541 = vmatpush.bf16.msrb.mxu0 %v4784_v24  ;;  %1678 = vmatpush.bf16.msrb.mxu2 %v4533_v32 }
 0x22d   :  { %1499 = vmatpush.bf16.msra.mxu1 %v4828_v53  ;;  %1525 = vmatpush.bf16.msrb.mxu3 %v6475_v4 }
 0x22e   :  { %1542 = vmatpush.bf16.msrb.mxu0 %v4794_v22  ;;  %1679 = vmatpush.bf16.msrb.mxu2 %v4545_v49 }
 0x231   :  { %1500 = vmatpush.bf16.msra.mxu1 %v4834_v52  ;;  %1526 = vmatpush.bf16.msrb.mxu3 %v6476_v3 }
 0x232   :  { %1543 = vmatpush.bf16.msrb.mxu0 %v4806_v30  ;;  %1724 = vmatpush.bf16.msra.mxu2 %v4435_v18  ;;  %v6535_v18 = vld [vmem:[#allocation113_spill] sm:$0xff] }
 0x234   :  { %3893 = vmatmul.msk.bf16.vlgmr.msrb.gmra.mxu1 %vm4702_vm9, %v5050_v29  ;;  %3896 = vmatmul.msk.bf16.vlgmr.msra.gmra.mxu3 %vm4702_vm9, %v5050_v29 }
 0x235   :  { %1501 = vmatpush.bf16.msra.mxu1 %v4842_v42  ;;  %1544 = vmatmul.bf16.vlgmr.msrb.gmra.mxu0 %v5004_v40  ;;  %v6480_v40 = vld [vmem:[#allocation85_spill] sm:$0xff] }
 0x236   :  { %1698 = vmatpush.bf16.msra.mxu0 %v4427_v12  ;;  %1527 = vmatpush.bf16.msrb.mxu3 %v6477_v41 }
 0x237   :  { %1725 = vmatpush.bf16.msra.mxu2 %v4456_v34  ;;  %v6492_v34 = vld [vmem:[#allocation35_spill] sm:$0xff] }
 0x239   :  { %1502 = vmatpush.bf16.msra.mxu1 %v4848_v45 }
 0x23a   :  { %1699 = vmatpush.bf16.msra.mxu0 %v4446_v27  ;;  %1528 = vmatpush.bf16.msrb.mxu3 %v6478_v15  ;;  %v6530_v27 = vld [vmem:[#allocation52_spill] sm:$0xff] }
 0x23b   :  { %1726 = vmatpush.bf16.msra.mxu2 %v4470_v46  ;;  %v6489_v46 = vld [vmem:[#allocation45_spill] sm:$0xff] }
 0x23d   :  { %1503 = vmatpush.bf16.msra.mxu1 %v4856_v62 }
 0x23e   :  { %1700 = vmatpush.bf16.msra.mxu0 %v4464_v44  ;;  %1529 = vmatpush.bf16.msrb.mxu3 %v6479_v57  ;;  %v6490_v44 = vld [vmem:[#allocation32_spill] sm:$0xff] }
 0x23f   :  { %1727 = vmatpush.bf16.msra.mxu2 %v4493_v58  ;;  %v6486_v58 = vld [vmem:[#allocation28_spill] sm:$0xff] }
 0x241   :  { %1504 = vmatpush.bf16.msra.mxu1 %v4862_v7 }
 0x242   :  { %1701 = vmatpush.bf16.msra.mxu0 %v4487_v55  ;;  %1530 = vmatpush.bf16.msrb.mxu3 %v6480_v40  ;;  %v6488_v55 = vld [vmem:[#allocation30_spill] sm:$0xff]  ;;  %v6533_v40 = vld [vmem:[#allocation64_spill] sm:$0xff] }
 0x243   :  { %1728 = vmatpush.bf16.msra.mxu2 %v6482_v8  ;;  %v6491_v8 = vld [vmem:[#allocation114_spill] sm:$0xff] }
 0x244   :  { %3899 = vmatmul.msk.bf16.vlgmr.msra.gmra.mxu1 %vm4702_vm9, %v5050_v29 }
 0x245   :  { %1549 = vmatpush.bf16.msrb.mxu1 %v4865_v11  ;;  %3902 = vmatmul.msk.bf16.vlgmr.msrb.gmra.mxu3 %vm4702_vm9, %v5050_v29  ;;  %v6531_v11 = vld [vmem:[#allocation56_spill] sm:$0xff] }
 0x246   :  { %1702 = vmatpush.bf16.msra.mxu0 %v4511_v0  ;;  %1685 = vmatpush.bf16.msra.mxu3 %v6481_v60  ;;  %v6487_v0 = vld [vmem:[#allocation112_spill] sm:$0xff]  ;;  %v6493_v60 = vld [vmem:[#allocation50_spill] sm:$0xff] }
 0x247   :  { %1729 = vmatpush.bf16.msra.mxu2 %v6486_v58  ;;  %v6497_v58 = vld [vmem:[#allocation54_spill] sm:$0xff] }
 0x249   :  { %1550 = vmatpush.bf16.msrb.mxu1 %v6483_v43  ;;  %v6494_v43 = vld [vmem:[#allocation38_spill] sm:$0xff] }
 0x24a   :  { %1703 = vmatpush.bf16.msra.mxu0 %v6484_v10  ;;  %1686 = vmatpush.bf16.msra.mxu3 %v6485_v47  ;;  %v6495_v10 = vld [vmem:[#allocation37_spill] sm:$0xff]  ;;  %v6496_v47 = vld [vmem:[#allocation116_spill] sm:$0xff] }
 0x24b   :  { %1730 = vmatpush.bf16.msra.mxu2 %v6490_v44  ;;  %v6501_v44 = vld [vmem:[#allocation46_spill] sm:$0xff] }
 0x24d   :  { %1551 = vmatpush.bf16.msrb.mxu1 %v6487_v0  ;;  %v6498_v0 = vld [vmem:[#allocation42_spill] sm:$0xff] }
 0x24e   :  { %1704 = vmatpush.bf16.msra.mxu0 %v6488_v55  ;;  %1687 = vmatpush.bf16.msra.mxu3 %v6489_v46  ;;  %v6499_v55 = vld [vmem:[#allocation118_spill] sm:$0xff] }
 0x24f   :  { %1731 = vmatpush.bf16.msra.mxu2 %v6495_v10  ;;  %v6500_v46 = vld [vmem:[#allocation58_spill] sm:$0xff] }
 0x250   :  { %v6506_v10 = vld [vmem:[#allocation10_spill] sm:$0xff] }
 0x251   :  { %1552 = vmatpush.bf16.msrb.mxu1 %v6491_v8  ;;  %v6502_v8 = vld [vmem:[#allocation121_spill] sm:$0xff] }
 0x252   :  { %1705 = vmatpush.bf16.msra.mxu0 %v6492_v34  ;;  %1688 = vmatpush.bf16.msra.mxu3 %v6493_v60  ;;  %v6503_v34 = vld [vmem:[#allocation62_spill] sm:$0xff]  ;;  %v6504_v60 = vld [vmem:[#allocation51_spill] sm:$0xff] }
 0x255   :  { %1553 = vmatpush.bf16.msrb.mxu1 %v6496_v47  ;;  %v6507_v47 = vld [vmem:[#allocation66_spill] sm:$0xff] }
 0x256   :  { %1750 = vmatpush.bf16.msrb.mxu0 %v6494_v43  ;;  %1689 = vmatpush.bf16.msra.mxu3 %v6497_v58  ;;  %v6505_v43 = vld [vmem:[#allocation122_spill] sm:$0xff]  ;;  %v6508_v58 = vld [vmem:[#allocation55_spill] sm:$0xff] }
 0x259   :  { %1554 = vmatpush.bf16.msrb.mxu1 %v6499_v55 }
 0x25a   :  { %1751 = vmatpush.bf16.msrb.mxu0 %v6498_v0  ;;  %1690 = vmatpush.bf16.msra.mxu3 %v6500_v46  ;;  %v6509_v0 = vld [vmem:[#allocation78_spill] sm:$0xff]  ;;  %v6525_v46 = vld [vmem:[#allocation36_spill] sm:$0xff] }
 0x25d   :  { %1555 = vmatpush.bf16.msrb.mxu1 %v6502_v8  ;;  %v6511_v8 = vld [vmem:[#allocation59_spill] sm:$0xff] }
 0x25e   :  { %1752 = vmatpush.bf16.msrb.mxu0 %v6501_v44  ;;  %1691 = vmatpush.bf16.msra.mxu3 %v6503_v34  ;;  %v6510_v44 = vld [vmem:[#allocation13_spill] sm:$0xff]  ;;  %v6512_v34 = vld [vmem:[#allocation82_spill] sm:$0xff] }
 0x261   :  { %1556 = vmatpush.bf16.msrb.mxu1 %v6505_v43  ;;  %v6514_v43 = vld [vmem:[#allocation63_spill] sm:$0xff] }
 0x262   :  { %1753 = vmatpush.bf16.msrb.mxu0 %v6504_v60  ;;  %1692 = vmatpush.bf16.msra.mxu3 %v6507_v47  ;;  %v6513_v60 = vld [vmem:[#allocation16_spill] sm:$0xff]  ;;  %v6516_v47 = vld [vmem:[#allocation19_spill] sm:$0xff] }
 0x264   :  { %3905 = vmatmul.msk.bf16.vlgmr.msrb.gmra.mxu1 %vm4702_vm9, %v5050_v29  ;;  %v6520_v29 = vld [vmem:[#allocation92_spill] sm:$0xff] }
 0x265   :  { %1711 = vmatpush.bf16.msra.mxu1 %v6506_v10  ;;  %v6515_v10 = vld [vmem:[#allocation86_spill] sm:$0xff] }
 0x266   :  { %1754 = vmatpush.bf16.msrb.mxu0 %v6508_v58  ;;  %1737 = vmatpush.bf16.msrb.mxu3 %v6509_v0  ;;  %v6517_v58 = vld [vmem:[#allocation67_spill] sm:$0xff]  ;;  %v6518_v0 = vld [vmem:[#allocation89_spill] sm:$0xff] }
 0x269   :  { %1712 = vmatpush.bf16.msra.mxu1 %v6510_v44  ;;  %v6521_v44 = vld [vmem:[#allocation27_spill] sm:$0xff] }
 0x26a   :  { %1755 = vmatpush.bf16.msrb.mxu0 %v6511_v8  ;;  %1738 = vmatpush.bf16.msrb.mxu3 %v6512_v34  ;;  %v6522_v34 = vld [vmem:[#allocation95_spill] sm:$0xff] }
 0x26d   :  { %1713 = vmatpush.bf16.msra.mxu1 %v6513_v60  ;;  %v6523_v60 = vld [vmem:[#allocation31_spill] sm:$0xff] }
 0x26e   :  { %1756 = vmatpush.bf16.msrb.mxu0 %v6514_v43  ;;  %1739 = vmatpush.bf16.msrb.mxu3 %v6515_v10  ;;  %v1389_v8 = vpop.f32.mrf.mxu0  ;;  %v6524_v43 = vld [vmem:[#allocation98_spill] sm:$0xff] }
 0x271   :  { %1714 = vmatpush.bf16.msra.mxu1 %v6516_v47 }
 0x272   :  { %1757 = vmatpush.bf16.msrb.mxu0 %v6517_v58  ;;  %1740 = vmatpush.bf16.msrb.mxu3 %v6518_v0  ;;  %v6526_v58 = vld [vmem:[#allocation39_spill] sm:$0xff]  ;;  %v6527_v0 = vld [vmem:[#allocation100_spill] sm:$0xff] }
 0x274   :  { %v1415_v10 = vpop.f32.mrf.mxu2 }
 0x275   :  { %1715 = vmatpush.bf16.msra.mxu1 %v6519_v59  ;;  %v6528_v59 = vld [vmem:[#allocation43_spill] sm:$0xff] }
 0x276   :  { %1741 = vmatpush.bf16.msrb.mxu3 %v6520_v29  ;;  %v1391_v47 = vpop.f32.mrf.mxu0 }
 0x279   :  { %1716 = vmatpush.bf16.msra.mxu1 %v6521_v44  ;;  %v6529_v44 = vld [vmem:[#allocation48_spill] sm:$0xff] }
 0x27a   :  { %1742 = vmatpush.bf16.msrb.mxu3 %v6522_v34 }
 0x27c   :  { %v1417_v29 = vpop.f32.mrf.mxu2 }
 0x27d   :  { %1717 = vmatpush.bf16.msra.mxu1 %v6523_v60 }
 0x27e   :  { %1743 = vmatpush.bf16.msrb.mxu3 %v6524_v43  ;;  %v1441_v55 = vpop.f32.mrf.mxu0  ;;  %v6532_v43 = vld [vmem:[#allocation60_spill] sm:$0xff] }
 0x281   :  { %1718 = vmatpush.bf16.msra.mxu1 %v6525_v46 }
 0x282   :  { %1744 = vmatpush.bf16.msrb.mxu3 %v6527_v0 }
 0x284   :  { %v1467_v34 = vpop.f32.mrf.mxu2 }
 0x285   :  { %1763 = vmatpush.bf16.msrb.mxu1 %v6526_v58  ;;  %v6534_v58 = vld [vmem:[#allocation68_spill] sm:$0xff] }
 0x286   :  { %v1443_v60 = vpop.f32.mrf.mxu0 }
 0x289   :  { %1764 = vmatpush.bf16.msrb.mxu1 %v6528_v59 }
 0x28c   :  { %v1469_v46 = vpop.f32.mrf.mxu2 }
 0x28d   :  { %1765 = vmatpush.bf16.msrb.mxu1 %v6529_v44 }
 0x290   :  { %v1493_v47 = vpop.f32.mrf.mxu0 }
 0x291   :  { %1766 = vmatpush.bf16.msrb.mxu1 %v6530_v27 }
 0x294   :  { %v5162_v0 = vpop.f32.mrf.mxu2 }
 0x295   :  { %1767 = vmatpush.bf16.msrb.mxu1 %v6531_v11 }
 0x298   :  { %v1495_v29 = vpop.f32.mrf.mxu0 }
 0x299   :  { %1768 = vmatpush.bf16.msrb.mxu1 %v6532_v43  ;;  %v6536_v43 = vld [vmem:[#allocation103_spill] sm:$0xff] }
 0x29c   :  { %v1521_v44 = vpop.f32.mrf.mxu2 }
 0x29d   :  { %1769 = vmatpush.bf16.msrb.mxu1 %v6533_v40 }
 0x2a1   :  { %1770 = vmatpush.bf16.msrb.mxu1 %v6534_v58  ;;  %v1402_v59 = vpop.f32.mrf.mxu1 }
 0x2a2   :  { %v1403_v7 = vadd.f32 %v1402_v59, %v1389_v8 }
 0x2a4   :  { %v1616_v27 = vadd.f32 %v1403_v7, %v6535_v18 }
 0x2a6   :  { %v3908_v12 = vmul.f32 -1.442695, %v1616_v27 }
 0x2a7   :  { %v1428_v60 = vpop.f32.mrf.mxu3 }
 0x2a8   :  { %4128 = vpow2.f32 %v3908_v12  ;;  %v1429_v11 = vadd.f32 %v1428_v60, %v1415_v10 }
 0x2a9   :  { %v1404_v49 = vpop.f32.mrf.mxu1 }
 0x2aa   :  { %v1636_v46 = vadd.f32 %v1429_v11, %v6536_v43 }
 0x2ac   :  { %v3909_v30 = vmul.f32 -1.442695, %v1636_v46 }
 0x2ae   :  { %v4129_v57 = vpop.eup %4128  ;;  %4130 = vpow2.f32 %v3909_v30 }
 0x2af   :  { %v1620_v40 = vadd.f32 1.0, %v4129_v57  ;;  %v1430_v58 = vpop.f32.mrf.mxu3 }
 0x2b1   :  { %4132 = vrcp.f32 %v1620_v40  ;;  %v1454_v62 = vpop.f32.mrf.mxu1  ;;  %v1630_v10 = vand.u32 2147483647, %v1620_v40  ;;  %v1632_v30 = vand.u32 2147483648, %v1620_v40  ;;  %vm1626_vm13 = vweird.f32 %v1620_v40 }
 0x2b2   :  { %v5166_v29 = vpop.f32.mrf.mxu0  ;;  %v1455_v57 = vadd.f32 %v1454_v62, %v1441_v55 }
 0x2b3   :  { %vm1631_vm15 = vcmp.eq.f32.partialorder %v1630_v10, 8.507059e+37 }
 0x2b4   :  { %v4131_v8 = vpop.eup %4130 }
 0x2b5   :  { %v1640_v44 = vadd.f32 1.0, %v4131_v8  ;;  %v1633_v8 = vor.u32 1.1754944e-38, %v1632_v30 }
 0x2b7   :  { %v4133_v59 = vpop.eup %4132  ;;  %4134 = vrcp.f32 %v1640_v44  ;;  %v1480_v18 = vpop.f32.mrf.mxu3  ;;  %v1652_v62 = vand.u32 2147483648, %v1640_v44  ;;  %vm1646_vm1 = vweird.f32 %v1640_v44 }
 0x2b8   :  { %v1622_v27 = vmul.f32 %v4133_v59, %v1620_v40  ;;  %v1481_v12 = vadd.f32 %v1480_v18, %v1467_v34  ;;  %vm1627_vm9 = vweird.f32 %v4133_v59 }
 0x2b9   :  { %v1456_v7 = vpop.f32.mrf.mxu1  ;;  %vm1628_vm14 = vmor %vm1626_vm13, %vm1627_vm9 }
 0x2ba   :  { %v1623_v49 = vsub.f32 1.0, %v1622_v27  ;;  %v1562_v11 = vadd.f32 %v1481_v12, %v4982_v5  ;;  %v1547_v43 = vpop.f32.mrf.mxu0  ;;  %v5172_v27 = vld [vmem:[%s6077_s3] ss:$0 sm:$0xff] }
 0x2bb   :  { %v1656_v55 = vadd.f32 %v5172_v27, %v1455_v57  ;;  %v1650_v43 = vand.u32 2147483647, %v1640_v44 }
 0x2bc   :  { %v1624_v58 = vmul.f32 %v4133_v59, %v1623_v49  ;;  %v3906_v60 = vmul.f32 -1.442695, %v1562_v11 }
 0x2bd   :  { %v4135_v46 = vpop.eup %4134  ;;  %vm1651_vm4 = vcmp.eq.f32.partialorder %v1650_v43, 8.507059e+37 }
 0x2be   :  { %v1642_v32 = vmul.f32 %v4135_v46, %v1640_v44  ;;  %v1625_v22 = vadd.f32 %v4133_v59, %v1624_v58  ;;  %4136 = vpow2.f32 %v3906_v60  ;;  %vm1647_vm0 = vweird.f32 %v4135_v46 }
 0x2bf   :  { %v1482_v15 = vpop.f32.mrf.mxu3  ;;  %vm1648_vm3 = vmor %vm1646_vm1, %vm1647_vm0  ;;  %v1653_v58 = vor.u32 1.1754944e-38, %v1652_v62 }
 0x2c0   :  { %v1643_v34 = vsub.f32 1.0, %v1642_v32  ;;  %v1629_v18 = vsel %vm1628_vm14, %v4133_v59, %v1625_v22  ;;  %v6537_v32 = vld [vmem:[#allocation117_spill] sm:$0xff] }
 0x2c1   :  { %v1634_v12 = vsel %vm1631_vm15, %v1633_v8, %v1629_v18  ;;  %v1506_v7 = vpop.f32.mrf.mxu1 }
 0x2c2   :  { %v1644_v49 = vmul.f32 %v4135_v46, %v1643_v34  ;;  %v1657_v40 = vmul.f32 %v1656_v55, %v1634_v12  ;;  %v1507_v11 = vadd.f32 %v1506_v7, %v1493_v47 }
 0x2c4   :  { %v4137_v30 = vpop.eup %4136  ;;  %v1645_v15 = vadd.f32 %v4135_v46, %v1644_v49  ;;  %v1658_v22 = vadd.f32 %v1657_v40, %v6537_v32  ;;  %v1563_v59 = vadd.f32 %v1507_v11, %v4993_v19  ;;  %v5178_v40 = vpop.permute.xlu1 %1666 }
 0x2c5   :  { %v1569_v10 = vadd.f32 1.0, %v4137_v30  ;;  %6538 = vst [vmem:[#allocation77_spill] sm:$0xff] %v5178_v40  ;;  %vm1668_vm5 = vcmp.eq.s32.totalorder %v5178_v40, 1 }
 0x2c6   :  { %v1649_v60 = vsel %vm1648_vm3, %v4135_v46, %v1645_v15  ;;  %4138 = vtanh.f32 %v1658_v22  ;;  %v3907_v57 = vmul.f32 -1.442695, %v1563_v59 }
 0x2c7   :  { %4140 = vrcp.f32 %v1569_v10  ;;  %v1654_v8 = vsel %vm1651_vm4, %v1653_v58, %v1649_v60  ;;  %vm1575_vm7 = vweird.f32 %v1569_v10 }
 0x2c8   :  { %4142 = vpow2.f32 %v3907_v57  ;;  %v1532_v34 = vpop.f32.mrf.mxu3  ;;  %v1660_v18 = vsub.f32 1.0, %v1654_v8  ;;  %v1662_v7 = vmul.f32 %v1654_v8, %v4999_v63  ;;  %v1581_v57 = vand.u32 2147483648, %v1569_v10 }
 0x2c9   :  { %v1508_v47 = vpop.f32.mrf.mxu1  ;;  %v1579_v8 = vand.u32 2147483647, %v1569_v10 }
 0x2ca   :  { %v6539_v47 = vld [vmem:[#allocation87_spill] sm:$0xff] }
 0x2cb   :  { %vm1580_vm11 = vcmp.eq.f32.partialorder %v1579_v8, 8.507059e+37 }
 0x2cc   :  { %v4139_v55 = vpop.eup %4138 }
 0x2cd   :  { %v4141_v12 = vpop.eup %4140  ;;  %v1661_v44 = vmul.f32 %v4139_v55, %v1660_v18 }
 0x2ce   :  { %v4143_v49 = vpop.eup %4142  ;;  %v1571_v46 = vmul.f32 %v4141_v12, %v1569_v10  ;;  %vm1576_vm6 = vweird.f32 %v4141_v12 }
 0x2cf   :  { %v1663_v11 = vadd.f32 %v1662_v7, %v1661_v44  ;;  %v1588_v62 = vadd.f32 1.0, %v4143_v49  ;;  %vm1577_vm10 = vmor %vm1575_vm7, %vm1576_vm6  ;;  %v1533_v44 = vadd.f32 %v1532_v34, %v5162_v0  ;;  %v6542_v34 = vld [vmem:[#allocation57_spill] sm:$0xff] }
 0x2d0   :  { %v1534_v43 = vpop.f32.mrf.mxu3  ;;  %v1572_v32 = vsub.f32 1.0, %v1571_v46 }
 0x2d1   :  { %v5184_v30 = vsel %vm1668_vm5, %v1663_v11, %v4999_v63  ;;  %4144 = vrcp.f32 %v1588_v62  ;;  %v1582_v11 = vor.u32 1.1754944e-38, %v1581_v57  ;;  %v6540_v43 = vld [vmem:[#allocation53_spill] sm:$0xff]  ;;  %vm1594_vm9 = vweird.f32 %v1588_v62 }
 0x2d2   :  { %v5188_v15 = vpack.c.bf16 %v5184_v30, %v5184_v30  ;;  %v1573_v59 = vmul.f32 %v4141_v12, %v1572_v32  ;;  %v6541_v32 = vld [vmem:[#allocation90_spill] sm:$0xff]  ;;  %v1598_v0 = vand.u32 2147483647, %v1588_v62 }
 0x2d4   :  { %1680 = vmatmul.bf16.vlgmr.msrb.gmra.mxu2 %v5188_v15  ;;  %1706 = vmatmul.bf16.vlgmr.msra.gmra.mxu0 %v5188_v15  ;;  %v1574_v60 = vadd.f32 %v4141_v12, %v1573_v59  ;;  %vm1599_vm14 = vcmp.eq.f32.partialorder %v1598_v0, 8.507059e+37  ;;  %v6550_v0 = vld [vmem:[#allocation29_spill] sm:$0xff] }
 0x2d5   :  { %1776 = vmatpush.bf16.msrb.mxu2 %v6455_v37  ;;  %1802 = vmatpush.bf16.msra.mxu0 %v6456_v17 }
 0x2d6   :  { %v1578_v49 = vsel %vm1577_vm10, %v4141_v12, %v1574_v60  ;;  %v6543_v12 = vld [vmem:[#allocation93_spill] sm:$0xff] }
 0x2d7   :  { %v4145_v22 = vpop.eup %4144  ;;  %v1583_v10 = vsel %vm1580_vm11, %v1582_v11, %v1578_v49  ;;  %v6558_v49 = vld [vmem:[#allocation85_spill] sm:$0xff] }
 0x2d8   :  { %v1590_v58 = vmul.f32 %v4145_v22, %v1588_v62  ;;  %vm1595_vm12 = vweird.f32 %v4145_v22 }
 0x2d9   :  { %1777 = vmatpush.bf16.msrb.mxu2 %v6457_v16  ;;  %1803 = vmatpush.bf16.msra.mxu0 %v6458_v36  ;;  %vm1596_vm13 = vmor %vm1594_vm9, %vm1595_vm12 }
 0x2da   :  { %v1591_v63 = vsub.f32 1.0, %v1590_v58  ;;  %v1600_v58 = vand.u32 2147483648, %v1588_v62 }
 0x2dc   :  { %v1592_v18 = vmul.f32 %v4145_v22, %v1591_v63  ;;  %v1564_v63 = vadd.f32 %v1533_v44, %v5026_v61  ;;  %v1601_v8 = vor.u32 1.1754944e-38, %v1600_v58  ;;  %v6545_v44 = vld [vmem:[#allocation96_spill] sm:$0xff] }
 0x2dd   :  { %1778 = vmatpush.bf16.msrb.mxu2 %v6459_v48  ;;  %1804 = vmatpush.bf16.msra.mxu0 %v6539_v47  ;;  %v6548_v58 = vld [vmem:[#allocation76_spill] sm:$0xff] }
 0x2de   :  { %v1593_v59 = vadd.f32 %v4145_v22, %v1592_v18 }
 0x2e0   :  { %v1597_v60 = vsel %vm1596_vm13, %v4145_v22, %v1593_v59  ;;  %v6563_v59 = vld [vmem:[#allocation110_spill] sm:$0xff] }
 0x2e1   :  { %v1558_v55 = vpop.f32.mrf.mxu1  ;;  %1779 = vmatpush.bf16.msrb.mxu2 %v6540_v43  ;;  %1805 = vmatpush.bf16.msra.mxu0 %v6541_v32  ;;  %v1602_v18 = vsel %vm1599_vm14, %v1601_v8, %v1597_v60  ;;  %v6552_v60 = vld [vmem:[#allocation81_spill] sm:$0xff] }
 0x2e2   :  { %v1559_v7 = vadd.f32 %v1558_v55, %v5166_v29  ;;  %v6544_v55 = vld [vmem:[#allocation61_spill] sm:$0xff]  ;;  %v1607_v62 = vsub.f32 1.0, %v1602_v18 }
 0x2e3   :  { %v6554_v8 = vld [vmem:[#allocation33_spill] sm:$0xff] }
 0x2e4   :  { %v1565_v46 = vadd.f32 %v1559_v7, %v5023_v28  ;;  %1732 = vmatmul.bf16.vlgmr.msra.gmra.mxu2 %v5188_v15  ;;  %1758 = vmatmul.bf16.vlgmr.msrb.gmra.mxu0 %v5188_v15 }
 0x2e5   :  { %1780 = vmatpush.bf16.msrb.mxu2 %v6542_v34  ;;  %1806 = vmatpush.bf16.msra.mxu0 %v6543_v12 }
 0x2e6   :  { %v1604_v40 = vmul.f32 %v1583_v10, %v1565_v46 }
 0x2e8   :  { %v1605_v29 = vadd.f32 %v1604_v40, %v1564_v63  ;;  %v1319_v40 = vsel %vm380_vm8, %v5044_v38, 0.0  ;;  %v6549_v63 = vld [vmem:[#allocation99_spill] sm:$0xff] }
 0x2e9   :  { %v1560_v57 = vpop.f32.mrf.mxu1  ;;  %1781 = vmatpush.bf16.msrb.mxu2 %v6544_v55  ;;  %1807 = vmatpush.bf16.msra.mxu0 %v6545_v44  ;;  %v1609_v11 = vmul.f32 %v1602_v18, %v1319_v40  ;;  %v6555_v18 = vld [vmem:[#allocation9_spill] sm:$0xff] }
 0x2ea   :  { %4146 = vtanh.f32 %v1605_v29  ;;  %v6551_v29 = vld [vmem:[#allocation107_spill] sm:$0xff]  ;;  %v6553_v57 = vld [vmem:[#allocation101_spill] sm:$0xff] }
 0x2ed   :  { %1782 = vmatpush.bf16.msrb.mxu2 %v6466_v21  ;;  %1808 = vmatpush.bf16.msra.mxu0 %v4792_v54 }
 0x2f0   :  { %v4147_v7 = vpop.eup %4146 }
 0x2f1   :  { %v1608_v22 = vmul.f32 %v4147_v7, %v1607_v62  ;;  %1783 = vmatpush.bf16.msrb.mxu2 %v6467_v26  ;;  %1809 = vmatpush.bf16.msra.mxu0 %v4804_v31  ;;  %v6556_v62 = vld [vmem:[#allocation11_spill] sm:$0xff]  ;;  %v6557_v7 = vld [vmem:[#allocation108_spill] sm:$0xff] }
 0x2f3   :  { %v1610_v46 = vadd.f32 %v1609_v11, %v1608_v22  ;;  %v6560_v22 = vld [vmem:[#allocation12_spill] sm:$0xff]  ;;  %v6561_v11 = vld [vmem:[#allocation34_spill] sm:$0xff] }
 0x2f4   :  { %1784 = vmatmul.bf16.vlgmr.msrb.gmra.mxu2 %v5188_v15  ;;  %1810 = vmatmul.bf16.vlgmr.msra.gmra.mxu0 %v5188_v15 }
 0x2f5   :  { %v5219_v10 = vsel %vm1376_vm2, %v1610_v46, %v1319_v40  ;;  %1828 = vmatpush.bf16.msra.mxu2 %v6468_v25  ;;  %1964 = vmatpush.bf16.msrb.mxu0 %v4424_v9  ;;  %v6559_v40 = vld [vmem:[#allocation109_spill] sm:$0xff]  ;;  %v6562_v46 = vld [vmem:[#allocation14_spill] sm:$0xff] }
 0x2f6   :  { %v5225_v38 = vpack.c.bf16 %v5219_v10, %v5219_v10 }
 0x2f8   :  { %1693 = vmatmul.bf16.vlgmr.msra.gmra.mxu3 %v5225_v38  ;;  %1719 = vmatmul.bf16.vlgmr.msra.gmra.mxu1 %v5225_v38 }
 0x2f9   :  { %1789 = vmatpush.bf16.msra.mxu3 %v4802_v33  ;;  %1815 = vmatpush.bf16.msra.mxu1 %v6472_v39 }
 0x2fa   :  { %1829 = vmatpush.bf16.msra.mxu2 %v6469_v6  ;;  %1965 = vmatpush.bf16.msrb.mxu0 %v4438_v23 }
 0x2fd   :  { %1790 = vmatpush.bf16.msra.mxu3 %v4814_v51  ;;  %1816 = vmatpush.bf16.msra.mxu1 %v6474_v20 }
 0x2fe   :  { %1830 = vmatpush.bf16.msra.mxu2 %v6470_v2  ;;  %1966 = vmatpush.bf16.msrb.mxu0 %v4458_v35 }
 0x301   :  { %1791 = vmatpush.bf16.msra.mxu3 %v4828_v53  ;;  %1817 = vmatpush.bf16.msra.mxu1 %v6475_v4 }
 0x302   :  { %1831 = vmatpush.bf16.msra.mxu2 %v6471_v56  ;;  %1967 = vmatpush.bf16.msrb.mxu0 %v4472_v50 }
 0x305   :  { %1792 = vmatpush.bf16.msra.mxu3 %v4834_v52  ;;  %1818 = vmatpush.bf16.msra.mxu1 %v6476_v3 }
 0x306   :  { %1832 = vmatpush.bf16.msra.mxu2 %v6473_v13  ;;  %1968 = vmatpush.bf16.msrb.mxu0 %v4509_v1 }
 0x308   :  { %1745 = vmatmul.bf16.vlgmr.msrb.gmra.mxu3 %v5225_v38  ;;  %1771 = vmatmul.bf16.vlgmr.msrb.gmra.mxu1 %v5225_v38 }
 0x309   :  { %1793 = vmatpush.bf16.msra.mxu3 %v4842_v42  ;;  %1819 = vmatpush.bf16.msra.mxu1 %v6477_v41 }
 0x30a   :  { %1833 = vmatpush.bf16.msra.mxu2 %v4784_v24  ;;  %1969 = vmatpush.bf16.msrb.mxu0 %v4521_v14  ;;  %v6622_v14 = vld [vmem:[#allocation119_spill] sm:$0xff] }
 0x30d   :  { %1794 = vmatpush.bf16.msra.mxu3 %v4848_v45  ;;  %1820 = vmatpush.bf16.msra.mxu1 %v6548_v58 }
 0x30e   :  { %1834 = vmatpush.bf16.msra.mxu2 %v6549_v63  ;;  %1970 = vmatpush.bf16.msrb.mxu0 %v6550_v0 }
 0x311   :  { %1795 = vmatpush.bf16.msra.mxu3 %v6551_v29  ;;  %1821 = vmatpush.bf16.msra.mxu1 %v6552_v60 }
 0x312   :  { %1835 = vmatpush.bf16.msra.mxu2 %v6553_v57  ;;  %1971 = vmatpush.bf16.msrb.mxu0 %v6554_v8  ;;  %v6573_v8 = vld [vmem:[#allocation50_spill] sm:$0xff] }
 0x315   :  { %1796 = vmatpush.bf16.msra.mxu3 %v6557_v7  ;;  %1836 = vmatmul.bf16.vlgmr.msra.gmra.mxu2 %v5188_v15  ;;  %v6565_v7 = vld [vmem:[#allocation41_spill] sm:$0xff] }
 0x316   :  { %1990 = vmatpush.bf16.msrb.mxu2 %v6555_v18  ;;  %2016 = vmatpush.bf16.msra.mxu0 %v6556_v62  ;;  %v6564_v62 = vld [vmem:[#allocation15_spill] sm:$0xff]  ;;  %v6566_v15 = vld [vmem:[#allocation17_spill] sm:$0xff]  ;;  %v6571_v18 = vld [vmem:[#allocation114_spill] sm:$0xff] }
 0x317   :  { %1822 = vmatpush.bf16.msra.mxu1 %v6558_v49  ;;  %v6567_v49 = vld [vmem:[#allocation112_spill] sm:$0xff] }
 0x318   :  { %1797 = vmatmul.bf16.vlgmr.msra.gmra.mxu3 %v5225_v38 }
 0x319   :  { %1841 = vmatpush.bf16.msrb.mxu3 %v6559_v40  ;;  %v6568_v40 = vld [vmem:[#allocation18_spill] sm:$0xff] }
 0x31a   :  { %1991 = vmatpush.bf16.msrb.mxu2 %v6560_v22  ;;  %2017 = vmatpush.bf16.msra.mxu0 %v6562_v46  ;;  %v6569_v22 = vld [vmem:[#allocation45_spill] sm:$0xff]  ;;  %v6572_v46 = vld [vmem:[#allocation22_spill] sm:$0xff] }
 0x31b   :  { %1977 = vmatpush.bf16.msrb.mxu1 %v6561_v11  ;;  %v6570_v11 = vld [vmem:[#allocation20_spill] sm:$0xff] }
 0x31c   :  { %1823 = vmatmul.bf16.vlgmr.msra.gmra.mxu1 %v5225_v38 }
 0x31d   :  { %1842 = vmatpush.bf16.msrb.mxu3 %v6563_v59  ;;  %v6574_v59 = vld [vmem:[#allocation24_spill] sm:$0xff] }
 0x31e   :  { %1992 = vmatpush.bf16.msrb.mxu2 %v6564_v62  ;;  %2018 = vmatpush.bf16.msra.mxu0 %v6566_v15  ;;  %v6575_v62 = vld [vmem:[#allocation116_spill] sm:$0xff]  ;;  %v6577_v15 = vld [vmem:[#allocation54_spill] sm:$0xff] }
 0x31f   :  { %1978 = vmatpush.bf16.msrb.mxu1 %v6565_v7  ;;  %v6576_v7 = vld [vmem:[#allocation26_spill] sm:$0xff] }
 0x321   :  { %1843 = vmatpush.bf16.msrb.mxu3 %v6567_v49  ;;  %v6578_v49 = vld [vmem:[#allocation28_spill] sm:$0xff] }
 0x322   :  { %1993 = vmatpush.bf16.msrb.mxu2 %v6568_v40  ;;  %2019 = vmatpush.bf16.msra.mxu0 %v6570_v11  ;;  %v6579_v40 = vld [vmem:[#allocation118_spill] sm:$0xff] }
 0x323   :  { %1979 = vmatpush.bf16.msrb.mxu1 %v6569_v22  ;;  %v6580_v22 = vld [vmem:[#allocation30_spill] sm:$0xff] }
 0x324   :  { %v6581_v11 = vld [vmem:[#allocation58_spill] sm:$0xff] }
 0x325   :  { %1844 = vmatpush.bf16.msrb.mxu3 %v6571_v18  ;;  %v6582_v18 = vld [vmem:[#allocation32_spill] sm:$0xff] }
 0x326   :  { %1994 = vmatpush.bf16.msrb.mxu2 %v6572_v46  ;;  %2020 = vmatpush.bf16.msra.mxu0 %v6574_v59  ;;  %v6583_v46 = vld [vmem:[#allocation121_spill] sm:$0xff]  ;;  %v6585_v59 = vld [vmem:[#allocation62_spill] sm:$0xff] }
 0x327   :  { %1980 = vmatpush.bf16.msrb.mxu1 %v6573_v8  ;;  %v6584_v8 = vld [vmem:[#allocation35_spill] sm:$0xff] }
 0x329   :  { %1845 = vmatpush.bf16.msrb.mxu3 %v6575_v62  ;;  %v6586_v62 = vld [vmem:[#allocation38_spill] sm:$0xff] }
 0x32a   :  { %1995 = vmatpush.bf16.msrb.mxu2 %v6576_v7  ;;  %2021 = vmatpush.bf16.msra.mxu0 %v6578_v49  ;;  %v6587_v7 = vld [vmem:[#allocation37_spill] sm:$0xff]  ;;  %v6589_v49 = vld [vmem:[#allocation10_spill] sm:$0xff] }
 0x32b   :  { %1981 = vmatpush.bf16.msrb.mxu1 %v6577_v15  ;;  %v6588_v15 = vld [vmem:[#allocation122_spill] sm:$0xff] }
 0x32d   :  { %1846 = vmatpush.bf16.msrb.mxu3 %v6579_v40  ;;  %v6590_v40 = vld [vmem:[#allocation66_spill] sm:$0xff] }
 0x32e   :  { %1996 = vmatpush.bf16.msrb.mxu2 %v6580_v22  ;;  %2022 = vmatpush.bf16.msra.mxu0 %v6582_v18  ;;  %v6591_v22 = vld [vmem:[#allocation42_spill] sm:$0xff] }
 0x32f   :  { %1982 = vmatpush.bf16.msrb.mxu1 %v6581_v11  ;;  %v6592_v11 = vld [vmem:[#allocation78_spill] sm:$0xff] }
 0x331   :  { %1847 = vmatpush.bf16.msrb.mxu3 %v6583_v46  ;;  %v6593_v46 = vld [vmem:[#allocation13_spill] sm:$0xff] }
 0x332   :  { %1997 = vmatpush.bf16.msrb.mxu2 %v6584_v8  ;;  %2023 = vmatpush.bf16.msra.mxu0 %v6587_v7  ;;  %v6594_v8 = vld [vmem:[#allocation46_spill] sm:$0xff]  ;;  %v6597_v7 = vld [vmem:[#allocation51_spill] sm:$0xff] }
 0x333   :  { %1983 = vmatpush.bf16.msrb.mxu1 %v6585_v59  ;;  %v6595_v59 = vld [vmem:[#allocation82_spill] sm:$0xff] }
 0x335   :  { %1848 = vmatpush.bf16.msrb.mxu3 %v6588_v15  ;;  %v6598_v15 = vld [vmem:[#allocation86_spill] sm:$0xff] }
 0x336   :  { %2042 = vmatpush.bf16.msra.mxu2 %v6586_v62  ;;  %v6596_v62 = vld [vmem:[#allocation16_spill] sm:$0xff] }
 0x337   :  { %1984 = vmatpush.bf16.msrb.mxu1 %v6590_v40  ;;  %v6600_v40 = vld [vmem:[#allocation55_spill] sm:$0xff] }
 0x338   :  { %1849 = vmatmul.bf16.vlgmr.msrb.gmra.mxu3 %v5225_v38  ;;  %v6603_v38 = vld [vmem:[#allocation59_spill] sm:$0xff] }
 0x339   :  { %2003 = vmatpush.bf16.msra.mxu3 %v6589_v49  ;;  %v6599_v49 = vld [vmem:[#allocation19_spill] sm:$0xff] }
 0x33a   :  { %2043 = vmatpush.bf16.msra.mxu2 %v6591_v22  ;;  %v6601_v22 = vld [vmem:[#allocation89_spill] sm:$0xff] }
 0x33b   :  { %2029 = vmatpush.bf16.msra.mxu1 %v6592_v11  ;;  %v6602_v11 = vld [vmem:[#allocation23_spill] sm:$0xff] }
 0x33d   :  { %2004 = vmatpush.bf16.msra.mxu3 %v6593_v46  ;;  %v6604_v46 = vld [vmem:[#allocation92_spill] sm:$0xff] }
 0x33e   :  { %2044 = vmatpush.bf16.msra.mxu2 %v6594_v8  ;;  %v6605_v8 = vld [vmem:[#allocation27_spill] sm:$0xff] }
 0x33f   :  { %2030 = vmatpush.bf16.msra.mxu1 %v6595_v59  ;;  %v6606_v59 = vld [vmem:[#allocation63_spill] sm:$0xff] }
 0x341   :  { %2005 = vmatpush.bf16.msra.mxu3 %v6596_v62  ;;  %v6607_v62 = vld [vmem:[#allocation95_spill] sm:$0xff] }
 0x342   :  { %2045 = vmatpush.bf16.msra.mxu2 %v6597_v7  ;;  %v6608_v7 = vld [vmem:[#allocation31_spill] sm:$0xff] }
 0x343   :  { %2031 = vmatpush.bf16.msra.mxu1 %v6598_v15  ;;  %v6609_v15 = vld [vmem:[#allocation67_spill] sm:$0xff] }
 0x345   :  { %2006 = vmatpush.bf16.msra.mxu3 %v6599_v49  ;;  %v6610_v49 = vld [vmem:[#allocation98_spill] sm:$0xff] }
 0x346   :  { %2046 = vmatpush.bf16.msra.mxu2 %v6600_v40  ;;  %v6611_v40 = vld [vmem:[#allocation36_spill] sm:$0xff] }
 0x347   :  { %2032 = vmatpush.bf16.msra.mxu1 %v6601_v22  ;;  %v6612_v22 = vld [vmem:[#allocation39_spill] sm:$0xff] }
 0x349   :  { %2007 = vmatpush.bf16.msra.mxu3 %v6602_v11  ;;  %v6613_v11 = vld [vmem:[#allocation100_spill] sm:$0xff] }
 0x34a   :  { %2047 = vmatpush.bf16.msra.mxu2 %v6603_v38 }
 0x34b   :  { %2033 = vmatpush.bf16.msra.mxu1 %v6604_v46  ;;  %v6614_v46 = vld [vmem:[#allocation43_spill] sm:$0xff] }
 0x34d   :  { %2008 = vmatpush.bf16.msra.mxu3 %v6605_v8  ;;  %v6615_v8 = vld [vmem:[#allocation48_spill] sm:$0xff] }
 0x34e   :  { %2048 = vmatpush.bf16.msra.mxu2 %v6606_v59 }
 0x34f   :  { %2034 = vmatpush.bf16.msra.mxu1 %v6607_v62  ;;  %v6616_v62 = vld [vmem:[#allocation52_spill] sm:$0xff] }
 0x351   :  { %2009 = vmatpush.bf16.msra.mxu3 %v6608_v7  ;;  %v1707_v38 = vpop.f32.mrf.mxu0  ;;  %v6617_v7 = vld [vmem:[#allocation56_spill] sm:$0xff] }
 0x352   :  { %2049 = vmatpush.bf16.msra.mxu2 %v6609_v15 }
 0x353   :  { %2035 = vmatpush.bf16.msra.mxu1 %v6610_v49  ;;  %v6618_v49 = vld [vmem:[#allocation60_spill] sm:$0xff] }
 0x355   :  { %2010 = vmatpush.bf16.msra.mxu3 %v6611_v40  ;;  %v6619_v40 = vld [vmem:[#allocation64_spill] sm:$0xff] }
 0x357   :  { %2036 = vmatpush.bf16.msra.mxu1 %v6613_v11  ;;  %v1681_v59 = vpop.f32.mrf.mxu2  ;;  %v6620_v11 = vld [vmem:[#allocation68_spill] sm:$0xff] }
 0x359   :  { %2055 = vmatpush.bf16.msrb.mxu3 %v6612_v22  ;;  %v1709_v18 = vpop.f32.mrf.mxu0 }
 0x35a   :  { %v6621_v18 = vld [vmem:[#allocation106_spill] sm:$0xff] }
 0x35d   :  { %2056 = vmatpush.bf16.msrb.mxu3 %v6614_v46 }
 0x35f   :  { %v1683_v15 = vpop.f32.mrf.mxu2 }
 0x361   :  { %2057 = vmatpush.bf16.msrb.mxu3 %v6615_v8  ;;  %v1759_v57 = vpop.f32.mrf.mxu0 }
 0x365   :  { %2058 = vmatpush.bf16.msrb.mxu3 %v6616_v62 }
 0x367   :  { %v1733_v22 = vpop.f32.mrf.mxu2 }
 0x369   :  { %2059 = vmatpush.bf16.msrb.mxu3 %v6617_v7  ;;  %v1761_v60 = vpop.f32.mrf.mxu0 }
 0x36d   :  { %2060 = vmatpush.bf16.msrb.mxu3 %v6618_v49 }
 0x36f   :  { %v1735_v29 = vpop.f32.mrf.mxu2 }
 0x371   :  { %2061 = vmatpush.bf16.msrb.mxu3 %v6619_v40  ;;  %v5331_v46 = vpop.f32.mrf.mxu0 }
 0x375   :  { %2062 = vmatpush.bf16.msrb.mxu3 %v6620_v11  ;;  %v1720_v8 = vpop.f32.mrf.mxu1 }
 0x376   :  { %v1721_v0 = vadd.f32 %v1720_v8, %v1707_v38 }
 0x377   :  { %v1785_v58 = vpop.f32.mrf.mxu2 }
 0x378   :  { %v1928_v63 = vadd.f32 %v1721_v0, %v6621_v18 }
 0x379   :  { %v1813_v45 = vpop.f32.mrf.mxu0 }
 0x37a   :  { %v3913_v62 = vmul.f32 -1.442695, %v1928_v63 }
 0x37b   :  { %v1694_v7 = vpop.f32.mrf.mxu3 }
 0x37c   :  { %4148 = vpow2.f32 %v3913_v62  ;;  %v1695_v15 = vadd.f32 %v1694_v7, %v1681_v59 }
 0x37d   :  { %v1722_v49 = vpop.f32.mrf.mxu1 }
 0x37e   :  { %v1908_v40 = vadd.f32 %v1695_v15, %v6622_v14 }
 0x37f   :  { %v1787_v11 = vpop.f32.mrf.mxu2 }
 0x380   :  { %v3912_v24 = vmul.f32 -1.442695, %v1908_v40 }
 0x382   :  { %v4149_v60 = vpop.eup %4148  ;;  %4150 = vpow2.f32 %v3912_v24 }
 0x383   :  { %v1932_v29 = vadd.f32 1.0, %v4149_v60  ;;  %v1696_v41 = vpop.f32.mrf.mxu3 }
 0x385   :  { %v1772_v42 = vpop.f32.mrf.mxu1  ;;  %4152 = vrcp.f32 %v1932_v29  ;;  %vm1938_vm3 = vweird.f32 %v1932_v29 }
 0x386   :  { %v1773_v8 = vadd.f32 %v1772_v42, %v1759_v57 }
 0x388   :  { %v4151_v38 = vpop.eup %4150  ;;  %v1854_v63 = vadd.f32 %v1773_v8, %v4982_v5 }
 0x389   :  { %v1912_v0 = vadd.f32 1.0, %v4151_v38 }
 0x38a   :  { %v3910_v49 = vmul.f32 -1.442695, %v1854_v63 }
 0x38b   :  { %4154 = vrcp.f32 %v1912_v0  ;;  %v1746_v62 = vpop.f32.mrf.mxu3  ;;  %v4153_v7 = vpop.eup %4152  ;;  %v1924_v41 = vand.u32 2147483648, %v1912_v0  ;;  %v1922_v42 = vand.u32 2147483647, %v1912_v0  ;;  %vm1918_vm2 = vweird.f32 %v1912_v0 }
 0x38c   :  { %v1934_v59 = vmul.f32 %v4153_v7, %v1932_v29  ;;  %4156 = vpow2.f32 %v3910_v49  ;;  %v1747_v15 = vadd.f32 %v1746_v62, %v1733_v22  ;;  %vm1939_vm1 = vweird.f32 %v4153_v7 }
 0x38d   :  { %v1774_v45 = vpop.f32.mrf.mxu1  ;;  %v1925_v63 = vor.u32 1.1754944e-38, %v1924_v41  ;;  %vm1923_vm0 = vcmp.eq.f32.partialorder %v1922_v42, 8.507059e+37  ;;  %vm1940_vm4 = vmor %vm1938_vm3, %vm1939_vm1 }
 0x38e   :  { %v1935_v24 = vsub.f32 1.0, %v1934_v59  ;;  %v1948_v59 = vadd.f32 %v5172_v27, %v1747_v15 }
 0x390   :  { %v1936_v8 = vmul.f32 %v4153_v7, %v1935_v24  ;;  %v1942_v24 = vand.u32 2147483647, %v1932_v29 }
 0x391   :  { %v4155_v14 = vpop.eup %4154 }
 0x392   :  { %v1914_v40 = vmul.f32 %v4155_v14, %v1912_v0  ;;  %vm1919_vm8 = vweird.f32 %v4155_v14  ;;  %v4157_v38 = vpop.eup %4156  ;;  %v6623_v0 = vld [vmem:[#allocation123_spill] sm:$0xff]  ;;  %vm1943_vm6 = vcmp.eq.f32.partialorder %v1942_v24, 8.507059e+37 }
 0x393   :  { %v1748_v11 = vpop.f32.mrf.mxu3  ;;  %vm1920_vm15 = vmor %vm1918_vm2, %vm1919_vm8  ;;  %v1861_v22 = vadd.f32 1.0, %v4157_v38 }
 0x394   :  { %v1915_v18 = vsub.f32 1.0, %v1914_v40  ;;  %v1937_v40 = vadd.f32 %v4153_v7, %v1936_v8 }
 0x395   :  { %4158 = vrcp.f32 %v1861_v22  ;;  %vm1867_vm11 = vweird.f32 %v1861_v22 }
 0x396   :  { %v1916_v60 = vmul.f32 %v4155_v14, %v1915_v18  ;;  %v1944_v18 = vand.u32 2147483648, %v1932_v29 }
 0x398   :  { %v1917_v5 = vadd.f32 %v4155_v14, %v1916_v60  ;;  %v5338_v45 = vpop.f32.mrf.mxu2 }
 0x399   :  { %v5336_v57 = vpop.f32.mrf.mxu1 }
 0x39a   :  { %v1921_v49 = vsel %vm1920_vm15, %v4155_v14, %v1917_v5  ;;  %v1941_v5 = vsel %vm1940_vm4, %v4153_v7, %v1937_v40  ;;  %v1945_v14 = vor.u32 1.1754944e-38, %v1944_v18 }
 0x39b   :  { %v1926_v62 = vsel %vm1923_vm0, %v1925_v63, %v1921_v49  ;;  %v1798_v11 = vpop.f32.mrf.mxu3  ;;  %v4159_v38 = vpop.eup %4158 }
 0x39c   :  { %v1949_v1 = vmul.f32 %v1948_v59, %v1926_v62  ;;  %v1799_v13 = vadd.f32 %v1798_v11, %v1785_v58  ;;  %v1946_v42 = vsel %vm1943_vm6, %v1945_v14, %v1941_v5  ;;  %v5344_v59 = vpop.permute.xlu2 %1958  ;;  %v1863_v7 = vmul.f32 %v4159_v38, %v1861_v22 }
 0x39d   :  { %v1952_v58 = vsub.f32 1.0, %v1946_v42  ;;  %v1954_v49 = vmul.f32 %v1946_v42, %v5184_v30  ;;  %vm1960_vm7 = vcmp.eq.s32.totalorder %v5344_v59, 1  ;;  %vm1868_vm10 = vweird.f32 %v4159_v38  ;;  %v6710_v59 = vld [vmem:[#allocation94_spill] sm:$0xff] }
 0x39e   :  { %v1950_v60 = vadd.f32 %v1949_v1, %v6623_v0  ;;  %v1855_v3 = vadd.f32 %v1799_v13, %v4993_v19  ;;  %v1864_v11 = vsub.f32 1.0, %v1863_v7  ;;  %v1871_v5 = vand.u32 2147483647, %v1861_v22  ;;  %vm1869_vm12 = vmor %vm1867_vm11, %vm1868_vm10 }
 0x3a0   :  { %4160 = vtanh.f32 %v1950_v60  ;;  %v3911_v27 = vmul.f32 -1.442695, %v1855_v3  ;;  %v1839_v15 = vpop.f32.mrf.mxu2  ;;  %v1865_v24 = vmul.f32 %v4159_v38, %v1864_v11  ;;  %vm1872_vm9 = vcmp.eq.f32.partialorder %v1871_v5, 8.507059e+37 }
 0x3a1   :  { %v1826_v41 = vpop.f32.mrf.mxu1  ;;  %v1825_v15 = vadd.f32 %v5336_v57, %v5331_v46 }
 0x3a2   :  { %4162 = vpow2.f32 %v3911_v27  ;;  %v1866_v60 = vadd.f32 %v4159_v38, %v1865_v24  ;;  %v1873_v41 = vand.u32 2147483648, %v1861_v22 }
 0x3a3   :  { %v1800_v8 = vpop.f32.mrf.mxu3 }
 0x3a4   :  { %v1870_v8 = vsel %vm1869_vm12, %v4159_v38, %v1866_v60 }
 0x3a6   :  { %v4161_v63 = vpop.eup %4160 }
 0x3a7   :  { %v1953_v29 = vmul.f32 %v4161_v63, %v1952_v58  ;;  %v1874_v58 = vor.u32 1.1754944e-38, %v1873_v41 }
 0x3a8   :  { %v4163_v1 = vpop.eup %4162 }
 0x3a9   :  { %v1955_v13 = vadd.f32 %v1954_v49, %v1953_v29  ;;  %v1880_v62 = vadd.f32 1.0, %v4163_v1  ;;  %v1875_v29 = vsel %vm1872_vm9, %v1874_v58, %v1870_v8  ;;  %v1856_v49 = vadd.f32 %v1825_v15, %v5026_v61  ;;  %v6628_v15 = vld [vmem:[#allocation104_spill] sm:$0xff]  ;;  %v6630_v8 = vld [vmem:[#allocation97_spill] sm:$0xff] }
 0x3aa   :  { %v6631_v58 = vld [vmem:[#allocation25_spill] sm:$0xff] }
 0x3ab   :  { %v5350_v3 = vsel %vm1960_vm7, %v1955_v13, %v5184_v30  ;;  %4164 = vrcp.f32 %v1880_v62  ;;  %v1892_v1 = vand.u32 2147483648, %v1880_v62  ;;  %vm1886_vm14 = vweird.f32 %v1880_v62 }
 0x3ac   :  { %v5354_v40 = vpack.c.bf16 %v5350_v3, %v5350_v3  ;;  %v1890_v46 = vand.u32 2147483647, %v1880_v62 }
 0x3ad   :  { %v1893_v7 = vor.u32 1.1754944e-38, %v1892_v1  ;;  %v6636_v1 = vld [vmem:[#allocation107_spill] sm:$0xff] }
 0x3ae   :  { %1972 = vmatmul.bf16.vlgmr.msrb.gmra.mxu0 %v5354_v40  ;;  %1998 = vmatmul.bf16.vlgmr.msrb.gmra.mxu2 %v5354_v40  ;;  %vm1891_vm2 = vcmp.eq.f32.partialorder %v1890_v46, 8.507059e+37  ;;  %v6638_v46 = vld [vmem:[#allocation101_spill] sm:$0xff] }
 0x3af   :  { %2068 = vmatpush.bf16.msrb.mxu0 %v6455_v37  ;;  %2094 = vmatpush.bf16.msrb.mxu2 %v6456_v17 }
 0x3b1   :  { %v4165_v18 = vpop.eup %4164 }
 0x3b2   :  { %v1882_v0 = vmul.f32 %v4165_v18, %v1880_v62  ;;  %vm1887_vm13 = vweird.f32 %v4165_v18 }
 0x3b3   :  { %2069 = vmatpush.bf16.msrb.mxu0 %v6457_v16  ;;  %2095 = vmatpush.bf16.msrb.mxu2 %v6458_v36  ;;  %vm1888_vm8 = vmor %vm1886_vm14, %vm1887_vm13 }
 0x3b4   :  { %v1883_v30 = vsub.f32 1.0, %v1882_v0 }
 0x3b6   :  { %v1884_v14 = vmul.f32 %v4165_v18, %v1883_v30 }
 0x3b7   :  { %2070 = vmatpush.bf16.msrb.mxu0 %v6459_v48  ;;  %2096 = vmatpush.bf16.msrb.mxu2 %v6539_v47 }
 0x3b8   :  { %v1885_v22 = vadd.f32 %v4165_v18, %v1884_v14  ;;  %v6626_v14 = vld [vmem:[#allocation94_spill] sm:$0xff] }
 0x3bb   :  { %v1850_v27 = vpop.f32.mrf.mxu3  ;;  %2071 = vmatpush.bf16.msrb.mxu0 %v6540_v43  ;;  %2097 = vmatpush.bf16.msrb.mxu2 %v6541_v32 }
 0x3bc   :  { %v1851_v42 = vadd.f32 %v1850_v27, %v5338_v45  ;;  %v1889_v45 = vsel %vm1888_vm8, %v4165_v18, %v1885_v22  ;;  %v6627_v27 = vld [vmem:[#allocation21_spill] sm:$0xff]  ;;  %v6633_v22 = vld [vmem:[#allocation76_spill] sm:$0xff]  ;;  %v6649_v18 = vld [vmem:[#allocation15_spill] sm:$0xff] }
 0x3bd   :  { %v1894_v11 = vsel %vm1891_vm2, %v1893_v7, %v1889_v45  ;;  %v6640_v45 = vld [vmem:[#allocation9_spill] sm:$0xff]  ;;  %v6642_v7 = vld [vmem:[#allocation108_spill] sm:$0xff] }
 0x3be   :  { %v1857_v63 = vadd.f32 %v1851_v42, %v5023_v28  ;;  %2024 = vmatmul.bf16.vlgmr.msra.gmra.mxu0 %v5354_v40  ;;  %2050 = vmatmul.bf16.vlgmr.msra.gmra.mxu2 %v5354_v40  ;;  %v1899_v62 = vsub.f32 1.0, %v1894_v11  ;;  %v1901_v30 = vmul.f32 %v1894_v11, %v5219_v10  ;;  %v6629_v42 = vld [vmem:[#allocation75_spill] sm:$0xff]  ;;  %v6643_v11 = vld [vmem:[#allocation85_spill] sm:$0xff] }
 0x3bf   :  { %2072 = vmatpush.bf16.msrb.mxu0 %v6542_v34  ;;  %2098 = vmatpush.bf16.msrb.mxu2 %v6543_v12 }
 0x3c0   :  { %v1896_v13 = vmul.f32 %v1875_v29, %v1857_v63  ;;  %v6632_v63 = vld [vmem:[#allocation105_spill] sm:$0xff]  ;;  %v6634_v29 = vld [vmem:[#allocation99_spill] sm:$0xff] }
 0x3c2   :  { %v1897_v57 = vadd.f32 %v1896_v13, %v1856_v49  ;;  %v6635_v49 = vld [vmem:[#allocation29_spill] sm:$0xff] }
 0x3c3   :  { %v1852_v38 = vpop.f32.mrf.mxu3  ;;  %2073 = vmatpush.bf16.msrb.mxu0 %v6544_v55  ;;  %2099 = vmatpush.bf16.msrb.mxu2 %v6545_v44  ;;  %v6637_v13 = vld [vmem:[#allocation81_spill] sm:$0xff] }
 0x3c4   :  { %4166 = vtanh.f32 %v1897_v57  ;;  %v6639_v57 = vld [vmem:[#allocation33_spill] sm:$0xff]  ;;  %v6641_v38 = vld [vmem:[#allocation11_spill] sm:$0xff] }
 0x3c7   :  { %2074 = vmatpush.bf16.msrb.mxu0 %v6466_v21  ;;  %2100 = vmatpush.bf16.msrb.mxu2 %v4792_v54 }
 0x3ca   :  { %v4167_v24 = vpop.eup %4166 }
 0x3cb   :  { %v1900_v0 = vmul.f32 %v4167_v24, %v1899_v62  ;;  %2075 = vmatpush.bf16.msrb.mxu0 %v6467_v26  ;;  %2101 = vmatpush.bf16.msrb.mxu2 %v4804_v31  ;;  %v6644_v62 = vld [vmem:[#allocation109_spill] sm:$0xff]  ;;  %v6645_v24 = vld [vmem:[#allocation12_spill] sm:$0xff] }
 0x3cd   :  { %v1902_v60 = vadd.f32 %v1901_v30, %v1900_v0  ;;  %v6646_v0 = vld [vmem:[#allocation34_spill] sm:$0xff] }
 0x3ce   :  { %2076 = vmatmul.bf16.vlgmr.msrb.gmra.mxu0 %v5354_v40  ;;  %2102 = vmatmul.bf16.vlgmr.msrb.gmra.mxu2 %v5354_v40  ;;  %v6647_v30 = vld [vmem:[#allocation14_spill] sm:$0xff] }
 0x3cf   :  { %v5385_v41 = vsel %vm1668_vm5, %v1902_v60, %v5219_v10  ;;  %2120 = vmatpush.bf16.msra.mxu0 %v6468_v25  ;;  %2256 = vmatpush.bf16.msra.mxu2 %v4424_v9  ;;  %v6625_v10 = vld [vmem:[#allocation74_spill] sm:$0xff] }
 0x3d0   :  { %v5391_v5 = vpack.c.bf16 %v5385_v41, %v5385_v41  ;;  %v6648_v60 = vld [vmem:[#allocation110_spill] sm:$0xff] }
 0x3d2   :  { %1985 = vmatmul.bf16.vlgmr.msrb.gmra.mxu1 %v5391_v5  ;;  %2011 = vmatmul.bf16.vlgmr.msra.gmra.mxu3 %v5391_v5 }
 0x3d3   :  { %2081 = vmatpush.bf16.msrb.mxu1 %v4802_v33  ;;  %2107 = vmatpush.bf16.msra.mxu3 %v6472_v39 }
 0x3d4   :  { %2121 = vmatpush.bf16.msra.mxu0 %v6469_v6  ;;  %2257 = vmatpush.bf16.msra.mxu2 %v4438_v23 }
 0x3d7   :  { %2082 = vmatpush.bf16.msrb.mxu1 %v4814_v51  ;;  %2108 = vmatpush.bf16.msra.mxu3 %v6474_v20 }
 0x3d8   :  { %2122 = vmatpush.bf16.msra.mxu0 %v6470_v2  ;;  %2258 = vmatpush.bf16.msra.mxu2 %v4458_v35 }
 0x3db   :  { %2083 = vmatpush.bf16.msrb.mxu1 %v4828_v53  ;;  %2109 = vmatpush.bf16.msra.mxu3 %v6475_v4 }
 0x3dc   :  { %2123 = vmatpush.bf16.msra.mxu0 %v6471_v56  ;;  %2259 = vmatpush.bf16.msra.mxu2 %v4472_v50 }
 0x3df   :  { %2084 = vmatpush.bf16.msrb.mxu1 %v4834_v52  ;;  %2110 = vmatpush.bf16.msra.mxu3 %v6625_v10 }
 0x3e0   :  { %2124 = vmatpush.bf16.msra.mxu0 %v6626_v14  ;;  %2260 = vmatpush.bf16.msra.mxu2 %v6627_v27 }
 0x3e2   :  { %2037 = vmatmul.bf16.vlgmr.msra.gmra.mxu1 %v5391_v5  ;;  %2063 = vmatmul.bf16.vlgmr.msrb.gmra.mxu3 %v5391_v5 }
 0x3e3   :  { %2085 = vmatpush.bf16.msrb.mxu1 %v6628_v15  ;;  %2111 = vmatpush.bf16.msra.mxu3 %v6629_v42 }
 0x3e4   :  { %2125 = vmatpush.bf16.msra.mxu0 %v6630_v8  ;;  %2261 = vmatpush.bf16.msra.mxu2 %v6631_v58 }
 0x3e7   :  { %2086 = vmatpush.bf16.msrb.mxu1 %v6632_v63  ;;  %2112 = vmatpush.bf16.msra.mxu3 %v6633_v22  ;;  %v6707_v63 = vld [vmem:[#allocation111_spill] sm:$0xff] }
 0x3e8   :  { %2126 = vmatpush.bf16.msra.mxu0 %v6634_v29  ;;  %2262 = vmatpush.bf16.msra.mxu2 %v6635_v49  ;;  %v6706_v49 = vld [vmem:[#allocation125_spill] sm:$0xff] }
 0x3eb   :  { %2087 = vmatpush.bf16.msrb.mxu1 %v6636_v1  ;;  %2113 = vmatpush.bf16.msra.mxu3 %v6637_v13 }
 0x3ec   :  { %2127 = vmatpush.bf16.msra.mxu0 %v6638_v46  ;;  %2263 = vmatpush.bf16.msra.mxu2 %v6639_v57 }
 0x3ef   :  { %2088 = vmatpush.bf16.msrb.mxu1 %v6642_v7  ;;  %2128 = vmatmul.bf16.vlgmr.msra.gmra.mxu0 %v5354_v40  ;;  %v6650_v7 = vld [vmem:[#allocation41_spill] sm:$0xff] }
 0x3f0   :  { %2282 = vmatpush.bf16.msrb.mxu0 %v6640_v45  ;;  %2308 = vmatpush.bf16.msrb.mxu2 %v6641_v38  ;;  %v6651_v40 = vld [vmem:[#allocation17_spill] sm:$0xff]  ;;  %v6656_v38 = vld [vmem:[#allocation114_spill] sm:$0xff] }
 0x3f1   :  { %2114 = vmatpush.bf16.msra.mxu3 %v6643_v11  ;;  %v6652_v11 = vld [vmem:[#allocation112_spill] sm:$0xff]  ;;  %v6658_v45 = vld [vmem:[#allocation50_spill] sm:$0xff] }
 0x3f2   :  { %2089 = vmatmul.bf16.vlgmr.msrb.gmra.mxu1 %v5391_v5 }
 0x3f3   :  { %2133 = vmatpush.bf16.msra.mxu1 %v6644_v62  ;;  %v6653_v62 = vld [vmem:[#allocation18_spill] sm:$0xff] }
 0x3f4   :  { %2283 = vmatpush.bf16.msrb.mxu0 %v6645_v24  ;;  %2309 = vmatpush.bf16.msrb.mxu2 %v6647_v30  ;;  %v6654_v24 = vld [vmem:[#allocation45_spill] sm:$0xff]  ;;  %v6657_v30 = vld [vmem:[#allocation22_spill] sm:$0xff] }
 0x3f5   :  { %2269 = vmatpush.bf16.msrb.mxu3 %v6646_v0  ;;  %v6655_v0 = vld [vmem:[#allocation20_spill] sm:$0xff] }
 0x3f6   :  { %2115 = vmatmul.bf16.vlgmr.msra.gmra.mxu3 %v5391_v5 }
 0x3f7   :  { %2134 = vmatpush.bf16.msra.mxu1 %v6648_v60  ;;  %v6659_v60 = vld [vmem:[#allocation24_spill] sm:$0xff] }
 0x3f8   :  { %2284 = vmatpush.bf16.msrb.mxu0 %v6649_v18  ;;  %2310 = vmatpush.bf16.msrb.mxu2 %v6651_v40  ;;  %v6660_v18 = vld [vmem:[#allocation116_spill] sm:$0xff]  ;;  %v6662_v40 = vld [vmem:[#allocation54_spill] sm:$0xff] }
 0x3f9   :  { %2270 = vmatpush.bf16.msrb.mxu3 %v6650_v7  ;;  %v6661_v7 = vld [vmem:[#allocation26_spill] sm:$0xff] }
 0x3fb   :  { %2135 = vmatpush.bf16.msra.mxu1 %v6652_v11  ;;  %v6663_v11 = vld [vmem:[#allocation28_spill] sm:$0xff] }
 0x3fc   :  { %2285 = vmatpush.bf16.msrb.mxu0 %v6653_v62  ;;  %2311 = vmatpush.bf16.msrb.mxu2 %v6655_v0  ;;  %v6664_v62 = vld [vmem:[#allocation118_spill] sm:$0xff] }
 0x3fd   :  { %2271 = vmatpush.bf16.msrb.mxu3 %v6654_v24  ;;  %v6665_v24 = vld [vmem:[#allocation30_spill] sm:$0xff] }
 0x3fe   :  { %v6666_v0 = vld [vmem:[#allocation58_spill] sm:$0xff] }
 0x3ff   :  { %2136 = vmatpush.bf16.msra.mxu1 %v6656_v38  ;;  %v6667_v38 = vld [vmem:[#allocation32_spill] sm:$0xff] }
 0x400   :  { %2286 = vmatpush.bf16.msrb.mxu0 %v6657_v30  ;;  %2312 = vmatpush.bf16.msrb.mxu2 %v6659_v60  ;;  %v6668_v30 = vld [vmem:[#allocation121_spill] sm:$0xff]  ;;  %v6670_v60 = vld [vmem:[#allocation62_spill] sm:$0xff] }
 0x401   :  { %2272 = vmatpush.bf16.msrb.mxu3 %v6658_v45  ;;  %v6669_v45 = vld [vmem:[#allocation35_spill] sm:$0xff] }
 0x403   :  { %2137 = vmatpush.bf16.msra.mxu1 %v6660_v18  ;;  %v6671_v18 = vld [vmem:[#allocation38_spill] sm:$0xff] }
 0x404   :  { %2287 = vmatpush.bf16.msrb.mxu0 %v6661_v7  ;;  %2313 = vmatpush.bf16.msrb.mxu2 %v6663_v11  ;;  %v6672_v7 = vld [vmem:[#allocation37_spill] sm:$0xff]  ;;  %v6674_v11 = vld [vmem:[#allocation10_spill] sm:$0xff] }
 0x405   :  { %2273 = vmatpush.bf16.msrb.mxu3 %v6662_v40  ;;  %v6673_v40 = vld [vmem:[#allocation122_spill] sm:$0xff] }
 0x407   :  { %2138 = vmatpush.bf16.msra.mxu1 %v6664_v62  ;;  %v6675_v62 = vld [vmem:[#allocation66_spill] sm:$0xff] }
 0x408   :  { %2288 = vmatpush.bf16.msrb.mxu0 %v6665_v24  ;;  %2314 = vmatpush.bf16.msrb.mxu2 %v6667_v38  ;;  %v6676_v24 = vld [vmem:[#allocation42_spill] sm:$0xff] }
 0x409   :  { %2274 = vmatpush.bf16.msrb.mxu3 %v6666_v0  ;;  %v6677_v0 = vld [vmem:[#allocation78_spill] sm:$0xff] }
 0x40b   :  { %2139 = vmatpush.bf16.msra.mxu1 %v6668_v30  ;;  %v6678_v30 = vld [vmem:[#allocation13_spill] sm:$0xff] }
 0x40c   :  { %2289 = vmatpush.bf16.msrb.mxu0 %v6669_v45  ;;  %2315 = vmatpush.bf16.msrb.mxu2 %v6672_v7  ;;  %v6679_v45 = vld [vmem:[#allocation46_spill] sm:$0xff]  ;;  %v6682_v7 = vld [vmem:[#allocation51_spill] sm:$0xff] }
 0x40d   :  { %2275 = vmatpush.bf16.msrb.mxu3 %v6670_v60  ;;  %v6680_v60 = vld [vmem:[#allocation82_spill] sm:$0xff] }
 0x40f   :  { %2140 = vmatpush.bf16.msra.mxu1 %v6673_v40  ;;  %v6683_v40 = vld [vmem:[#allocation86_spill] sm:$0xff] }
 0x410   :  { %2334 = vmatpush.bf16.msra.mxu0 %v6671_v18  ;;  %v6681_v18 = vld [vmem:[#allocation16_spill] sm:$0xff] }
 0x411   :  { %2276 = vmatpush.bf16.msrb.mxu3 %v6675_v62  ;;  %v6685_v62 = vld [vmem:[#allocation55_spill] sm:$0xff] }
 0x412   :  { %2141 = vmatmul.bf16.vlgmr.msra.gmra.mxu1 %v5391_v5  ;;  %v6688_v5 = vld [vmem:[#allocation59_spill] sm:$0xff] }
 0x413   :  { %2295 = vmatpush.bf16.msrb.mxu1 %v6674_v11  ;;  %v6684_v11 = vld [vmem:[#allocation19_spill] sm:$0xff] }
 0x414   :  { %2335 = vmatpush.bf16.msra.mxu0 %v6676_v24  ;;  %v6686_v24 = vld [vmem:[#allocation89_spill] sm:$0xff] }
 0x415   :  { %2321 = vmatpush.bf16.msra.mxu3 %v6677_v0  ;;  %v6687_v0 = vld [vmem:[#allocation23_spill] sm:$0xff] }
 0x417   :  { %2296 = vmatpush.bf16.msrb.mxu1 %v6678_v30  ;;  %v6689_v30 = vld [vmem:[#allocation92_spill] sm:$0xff] }
 0x418   :  { %2336 = vmatpush.bf16.msra.mxu0 %v6679_v45  ;;  %v6690_v45 = vld [vmem:[#allocation27_spill] sm:$0xff] }
 0x419   :  { %2322 = vmatpush.bf16.msra.mxu3 %v6680_v60  ;;  %v6691_v60 = vld [vmem:[#allocation63_spill] sm:$0xff] }
 0x41b   :  { %2297 = vmatpush.bf16.msrb.mxu1 %v6681_v18  ;;  %v6692_v18 = vld [vmem:[#allocation95_spill] sm:$0xff] }
 0x41c   :  { %2337 = vmatpush.bf16.msra.mxu0 %v6682_v7  ;;  %v6693_v7 = vld [vmem:[#allocation31_spill] sm:$0xff] }
 0x41d   :  { %2323 = vmatpush.bf16.msra.mxu3 %v6683_v40  ;;  %v6694_v40 = vld [vmem:[#allocation67_spill] sm:$0xff] }
 0x41f   :  { %2298 = vmatpush.bf16.msrb.mxu1 %v6684_v11  ;;  %v6695_v11 = vld [vmem:[#allocation98_spill] sm:$0xff] }
 0x420   :  { %2338 = vmatpush.bf16.msra.mxu0 %v6685_v62  ;;  %v6696_v62 = vld [vmem:[#allocation36_spill] sm:$0xff] }
 0x421   :  { %2324 = vmatpush.bf16.msra.mxu3 %v6686_v24  ;;  %v6697_v24 = vld [vmem:[#allocation39_spill] sm:$0xff] }
 0x423   :  { %2299 = vmatpush.bf16.msrb.mxu1 %v6687_v0  ;;  %v6698_v0 = vld [vmem:[#allocation100_spill] sm:$0xff] }
 0x424   :  { %2339 = vmatpush.bf16.msra.mxu0 %v6688_v5 }
 0x425   :  { %2325 = vmatpush.bf16.msra.mxu3 %v6689_v30  ;;  %v6699_v30 = vld [vmem:[#allocation43_spill] sm:$0xff] }
 0x427   :  { %2300 = vmatpush.bf16.msrb.mxu1 %v6690_v45  ;;  %v6700_v45 = vld [vmem:[#allocation48_spill] sm:$0xff] }
 0x428   :  { %2340 = vmatpush.bf16.msra.mxu0 %v6691_v60 }
 0x429   :  { %2326 = vmatpush.bf16.msra.mxu3 %v6692_v18  ;;  %v6701_v18 = vld [vmem:[#allocation52_spill] sm:$0xff] }
 0x42b   :  { %2301 = vmatpush.bf16.msrb.mxu1 %v6693_v7  ;;  %v1973_v5 = vpop.f32.mrf.mxu0  ;;  %v6702_v7 = vld [vmem:[#allocation56_spill] sm:$0xff] }
 0x42c   :  { %2341 = vmatpush.bf16.msra.mxu0 %v6694_v40 }
 0x42d   :  { %2327 = vmatpush.bf16.msra.mxu3 %v6695_v11  ;;  %v6703_v11 = vld [vmem:[#allocation60_spill] sm:$0xff] }
 0x42f   :  { %2302 = vmatpush.bf16.msrb.mxu1 %v6696_v62  ;;  %v6704_v62 = vld [vmem:[#allocation64_spill] sm:$0xff] }
 0x431   :  { %2328 = vmatpush.bf16.msra.mxu3 %v6698_v0  ;;  %v1999_v60 = vpop.f32.mrf.mxu2  ;;  %v6705_v0 = vld [vmem:[#allocation68_spill] sm:$0xff] }
 0x433   :  { %2347 = vmatpush.bf16.msra.mxu1 %v6697_v24  ;;  %v1975_v38 = vpop.f32.mrf.mxu0 }
 0x437   :  { %2348 = vmatpush.bf16.msra.mxu1 %v6699_v30 }
 0x439   :  { %v2001_v40 = vpop.f32.mrf.mxu2 }
 0x43b   :  { %2349 = vmatpush.bf16.msra.mxu1 %v6700_v45  ;;  %v2025_v57 = vpop.f32.mrf.mxu0 }
 0x43f   :  { %2350 = vmatpush.bf16.msra.mxu1 %v6701_v18 }
 0x441   :  { %v2051_v24 = vpop.f32.mrf.mxu2 }
 0x443   :  { %2351 = vmatpush.bf16.msra.mxu1 %v6702_v7  ;;  %v2027_v46 = vpop.f32.mrf.mxu0 }
 0x447   :  { %2352 = vmatpush.bf16.msra.mxu1 %v6703_v11 }
 0x449   :  { %v2053_v13 = vpop.f32.mrf.mxu2 }
 0x44b   :  { %2353 = vmatpush.bf16.msra.mxu1 %v6704_v62  ;;  %v2077_v30 = vpop.f32.mrf.mxu0 }
 0x44f   :  { %2354 = vmatpush.bf16.msra.mxu1 %v6705_v0  ;;  %v1986_v1 = vpop.f32.mrf.mxu1 }
 0x450   :  { %v1987_v45 = vadd.f32 %v1986_v1, %v1973_v5 }
 0x451   :  { %v5498_v18 = vpop.f32.mrf.mxu2 }
 0x452   :  { %v2200_v38 = vadd.f32 %v1987_v45, %v6706_v49 }
 0x453   :  { %v2079_v22 = vpop.f32.mrf.mxu0 }
 0x454   :  { %v3916_v29 = vmul.f32 -1.442695, %v2200_v38 }
 0x455   :  { %v2012_v7 = vpop.f32.mrf.mxu3 }
 0x456   :  { %4168 = vpow2.f32 %v3916_v29  ;;  %v2013_v40 = vadd.f32 %v2012_v7, %v1999_v60 }
 0x457   :  { %v1988_v11 = vpop.f32.mrf.mxu1 }
 0x458   :  { %v2220_v62 = vadd.f32 %v2013_v40, %v6707_v63  ;;  %v6708_v11 = vld [vmem:[#allocation133_spill] sm:$0xff] }
 0x459   :  { %v2105_v0 = vpop.f32.mrf.mxu2 }
 0x45a   :  { %v3917_v58 = vmul.f32 -1.442695, %v2220_v62 }
 0x45c   :  { %v4169_v46 = vpop.eup %4168  ;;  %4170 = vpow2.f32 %v3917_v58 }
 0x45d   :  { %v2204_v13 = vadd.f32 1.0, %v4169_v46  ;;  %v2014_v8 = vpop.f32.mrf.mxu3 }
 0x45f   :  { %4172 = vrcp.f32 %v2204_v13  ;;  %v2038_v1 = vpop.f32.mrf.mxu1  ;;  %v2214_v63 = vand.u32 2147483647, %v2204_v13  ;;  %v2216_v62 = vand.u32 2147483648, %v2204_v13  ;;  %vm2210_vm15 = vweird.f32 %v2204_v13 }
 0x460   :  { %v2039_v40 = vadd.f32 %v2038_v1, %v2025_v57  ;;  %v5507_v57 = vld [vmem:[%s6077_s3] ss:$0 sm:$0xff] }
 0x461   :  { %v2217_v27 = vor.u32 1.1754944e-38, %v2216_v62  ;;  %vm2215_vm1 = vcmp.eq.f32.partialorder %v2214_v63, 8.507059e+37 }
 0x462   :  { %v4171_v5 = vpop.eup %4170  ;;  %v2240_v1 = vadd.f32 %v5507_v57, %v2039_v40 }
 0x463   :  { %v2224_v49 = vadd.f32 1.0, %v4171_v5 }
 0x465   :  { %v4173_v45 = vpop.eup %4172  ;;  %4174 = vrcp.f32 %v2224_v49  ;;  %v2064_v38 = vpop.f32.mrf.mxu3  ;;  %vm2230_vm4 = vweird.f32 %v2224_v49 }
 0x466   :  { %v2206_v42 = vmul.f32 %v4173_v45, %v2204_v13  ;;  %v2065_v29 = vadd.f32 %v2064_v38, %v2051_v24  ;;  %vm2211_vm5 = vweird.f32 %v4173_v45 }
 0x467   :  { %v2040_v7 = vpop.f32.mrf.mxu1  ;;  %vm2212_vm0 = vmor %vm2210_vm15, %vm2211_vm5 }
 0x468   :  { %v2207_v22 = vsub.f32 1.0, %v2206_v42  ;;  %v2146_v60 = vadd.f32 %v2065_v29, %v6708_v11  ;;  %v2236_v29 = vand.u32 2147483648, %v2224_v49 }
 0x46a   :  { %v2208_v58 = vmul.f32 %v4173_v45, %v2207_v22  ;;  %v3914_v0 = vmul.f32 -1.442695, %v2146_v60  ;;  %v2237_v11 = vor.u32 1.1754944e-38, %v2236_v29 }
 0x46b   :  { %v4175_v8 = vpop.eup %4174 }
 0x46c   :  { %v2226_v46 = vmul.f32 %v4175_v8, %v2224_v49  ;;  %v2209_v15 = vadd.f32 %v4173_v45, %v2208_v58  ;;  %4176 = vpow2.f32 %v3914_v0  ;;  %v5502_v5 = vpop.f32.mrf.mxu0  ;;  %vm2231_vm3 = vweird.f32 %v4175_v8 }
 0x46d   :  { %v2066_v24 = vpop.f32.mrf.mxu3  ;;  %v2234_v0 = vand.u32 2147483647, %v2224_v49  ;;  %vm2232_vm6 = vmor %vm2230_vm4, %vm2231_vm3 }
 0x46e   :  { %v2227_v38 = vsub.f32 1.0, %v2226_v46  ;;  %v2213_v42 = vsel %vm2212_vm0, %v4173_v45, %v2209_v15  ;;  %v6709_v15 = vld [vmem:[#allocation126_spill] sm:$0xff] }
 0x46f   :  { %v2218_v7 = vsel %vm2215_vm1, %v2217_v27, %v2213_v42  ;;  %v2090_v22 = vpop.f32.mrf.mxu1  ;;  %vm2235_vm10 = vcmp.eq.f32.partialorder %v2234_v0, 8.507059e+37 }
 0x470   :  { %v2228_v13 = vmul.f32 %v4175_v8, %v2227_v38  ;;  %v2241_v60 = vmul.f32 %v2240_v1, %v2218_v7  ;;  %v2091_v58 = vadd.f32 %v2090_v22, %v2077_v30  ;;  %v5512_v22 = vpop.permute.xlu0 %2250 }
 0x471   :  { %vm2252_vm11 = vcmp.eq.s32.totalorder %v5512_v22, 1  ;;  %v6795_v22 = vld [vmem:[#allocation74_spill] sm:$0xff] }
 0x472   :  { %v4177_v62 = vpop.eup %4176  ;;  %v2229_v24 = vadd.f32 %v4175_v8, %v2228_v13  ;;  %v2242_v45 = vadd.f32 %v2241_v60, %v6709_v15  ;;  %v2147_v63 = vadd.f32 %v2091_v58, %v4993_v19 }
 0x473   :  { %v2153_v46 = vadd.f32 1.0, %v4177_v62 }
 0x474   :  { %v2233_v14 = vsel %vm2232_vm6, %v4175_v8, %v2229_v24  ;;  %4178 = vtanh.f32 %v2242_v45  ;;  %v3915_v40 = vmul.f32 -1.442695, %v2147_v63  ;;  %v2131_v27 = vpop.f32.mrf.mxu0 }
 0x475   :  { %4180 = vrcp.f32 %v2153_v46  ;;  %v2238_v38 = vsel %vm2235_vm10, %v2237_v11, %v2233_v14  ;;  %v2165_v27 = vand.u32 2147483648, %v2153_v46  ;;  %vm2159_vm9 = vweird.f32 %v2153_v46 }
 0x476   :  { %4182 = vpow2.f32 %v3915_v40  ;;  %v2244_v1 = vsub.f32 1.0, %v2238_v38  ;;  %v2246_v60 = vmul.f32 %v2238_v38, %v5350_v3  ;;  %v2163_v38 = vand.u32 2147483647, %v2153_v46 }
 0x477   :  { %v2092_v42 = vpop.f32.mrf.mxu1 }
 0x478   :  { %vm2164_vm14 = vcmp.eq.f32.partialorder %v2163_v38, 8.507059e+37 }
 0x479   :  { %v2116_v30 = vpop.f32.mrf.mxu3 }
 0x47a   :  { %v4179_v7 = vpop.eup %4178 }
 0x47b   :  { %v4181_v49 = vpop.eup %4180  ;;  %v2245_v13 = vmul.f32 %v4179_v7, %v2244_v1  ;;  %v2117_v7 = vadd.f32 %v2116_v30, %v5498_v18 }
 0x47c   :  { %v4183_v58 = vpop.eup %4182  ;;  %v2155_v62 = vmul.f32 %v4181_v49, %v2153_v46  ;;  %vm2160_vm12 = vweird.f32 %v4181_v49 }
 0x47d   :  { %v2247_v29 = vadd.f32 %v2246_v60, %v2245_v13  ;;  %v2172_v8 = vadd.f32 1.0, %v4183_v58  ;;  %vm2161_vm13 = vmor %vm2159_vm9, %vm2160_vm12  ;;  %v2166_v58 = vor.u32 1.1754944e-38, %v2165_v27 }
 0x47e   :  { %v2156_v24 = vsub.f32 1.0, %v2155_v62 }
 0x47f   :  { %v5519_v14 = vsel %vm2252_vm11, %v2247_v29, %v5350_v3  ;;  %4184 = vrcp.f32 %v2172_v8  ;;  %vm2178_vm2 = vweird.f32 %v2172_v8  ;;  %v2182_v18 = vand.u32 2147483647, %v2172_v8 }
 0x480   :  { %v5523_v11 = vpack.c.bf16 %v5519_v14, %v5519_v14  ;;  %v2157_v45 = vmul.f32 %v4181_v49, %v2156_v24  ;;  %v2148_v24 = vadd.f32 %v2117_v7, %v5026_v61  ;;  %v6712_v7 = vld [vmem:[#allocation104_spill] sm:$0xff] }
 0x481   :  { %v2118_v0 = vpop.f32.mrf.mxu3  ;;  %vm2183_vm15 = vcmp.eq.f32.partialorder %v2182_v18, 8.507059e+37  ;;  %v6722_v18 = vld [vmem:[#allocation101_spill] sm:$0xff] }
 0x482   :  { %2264 = vmatmul.bf16.vlgmr.msra.gmra.mxu2 %v5523_v11  ;;  %2290 = vmatmul.bf16.vlgmr.msrb.gmra.mxu0 %v5523_v11  ;;  %v2158_v40 = vadd.f32 %v4181_v49, %v2157_v45  ;;  %v2184_v0 = vand.u32 2147483648, %v2172_v8 }
 0x483   :  { %2360 = vmatpush.bf16.msra.mxu2 %v6455_v37  ;;  %2386 = vmatpush.bf16.msrb.mxu0 %v6456_v17 }
 0x484   :  { %v2162_v60 = vsel %vm2161_vm13, %v4181_v49, %v2158_v40 }
 0x485   :  { %v4185_v15 = vpop.eup %4184  ;;  %v2167_v46 = vsel %vm2164_vm14, %v2166_v58, %v2162_v60  ;;  %v6714_v60 = vld [vmem:[#allocation97_spill] sm:$0xff] }
 0x486   :  { %v2174_v63 = vmul.f32 %v4185_v15, %v2172_v8  ;;  %vm2179_vm8 = vweird.f32 %v4185_v15  ;;  %v6715_v58 = vld [vmem:[#allocation25_spill] sm:$0xff] }
 0x487   :  { %2361 = vmatpush.bf16.msra.mxu2 %v6457_v16  ;;  %2387 = vmatpush.bf16.msrb.mxu0 %v6458_v36  ;;  %vm2180_vm5 = vmor %vm2178_vm2, %vm2179_vm8 }
 0x488   :  { %v2175_v3 = vsub.f32 1.0, %v2174_v63  ;;  %v2185_v63 = vor.u32 1.1754944e-38, %v2184_v0  ;;  %v6719_v0 = vld [vmem:[#allocation29_spill] sm:$0xff] }
 0x48a   :  { %v2176_v42 = vmul.f32 %v4185_v15, %v2175_v3 }
 0x48b   :  { %2362 = vmatpush.bf16.msra.mxu2 %v6459_v48  ;;  %2388 = vmatpush.bf16.msrb.mxu0 %v6539_v47 }
 0x48c   :  { %v2177_v62 = vadd.f32 %v4185_v15, %v2176_v42 }
 0x48e   :  { %v2181_v30 = vsel %vm2180_vm5, %v4185_v15, %v2177_v62  ;;  %v6717_v62 = vld [vmem:[#allocation76_spill] sm:$0xff] }
 0x48f   :  { %v2142_v1 = vpop.f32.mrf.mxu1  ;;  %2363 = vmatpush.bf16.msra.mxu2 %v6540_v43  ;;  %2389 = vmatpush.bf16.msrb.mxu0 %v6541_v32  ;;  %v2186_v3 = vsel %vm2183_vm15, %v2185_v63, %v2181_v30  ;;  %v6724_v30 = vld [vmem:[#allocation9_spill] sm:$0xff]  ;;  %v6726_v63 = vld [vmem:[#allocation108_spill] sm:$0xff] }
 0x490   :  { %v2143_v13 = vadd.f32 %v2142_v1, %v5502_v5  ;;  %v2191_v8 = vsub.f32 1.0, %v2186_v3  ;;  %v2193_v38 = vmul.f32 %v2186_v3, %v5385_v41  ;;  %v6727_v3 = vld [vmem:[#allocation85_spill] sm:$0xff] }
 0x492   :  { %v2149_v29 = vadd.f32 %v2143_v13, %v5023_v28  ;;  %2316 = vmatmul.bf16.vlgmr.msrb.gmra.mxu2 %v5523_v11  ;;  %2342 = vmatmul.bf16.vlgmr.msra.gmra.mxu0 %v5523_v11  ;;  %v6713_v13 = vld [vmem:[#allocation75_spill] sm:$0xff] }
 0x493   :  { %2364 = vmatpush.bf16.msra.mxu2 %v6542_v34  ;;  %2390 = vmatpush.bf16.msrb.mxu0 %v6543_v12 }
 0x494   :  { %v2188_v45 = vmul.f32 %v2167_v46, %v2149_v29  ;;  %v6716_v29 = vld [vmem:[#allocation105_spill] sm:$0xff]  ;;  %v6718_v46 = vld [vmem:[#allocation99_spill] sm:$0xff] }
 0x496   :  { %v2189_v5 = vadd.f32 %v2188_v45, %v2148_v24  ;;  %v6720_v24 = vld [vmem:[#allocation107_spill] sm:$0xff]  ;;  %v6721_v45 = vld [vmem:[#allocation81_spill] sm:$0xff] }
 0x497   :  { %v2144_v49 = vpop.f32.mrf.mxu1  ;;  %2365 = vmatpush.bf16.msra.mxu2 %v6544_v55  ;;  %2391 = vmatpush.bf16.msrb.mxu0 %v6545_v44 }
 0x498   :  { %4186 = vtanh.f32 %v2189_v5  ;;  %v6723_v5 = vld [vmem:[#allocation33_spill] sm:$0xff]  ;;  %v6725_v49 = vld [vmem:[#allocation11_spill] sm:$0xff] }
 0x49b   :  { %2366 = vmatpush.bf16.msra.mxu2 %v6466_v21  ;;  %2392 = vmatpush.bf16.msrb.mxu0 %v4792_v54 }
 0x49e   :  { %v4187_v40 = vpop.eup %4186 }
 0x49f   :  { %v2192_v27 = vmul.f32 %v4187_v40, %v2191_v8  ;;  %2367 = vmatpush.bf16.msra.mxu2 %v6467_v26  ;;  %2393 = vmatpush.bf16.msrb.mxu0 %v4804_v31  ;;  %v6728_v8 = vld [vmem:[#allocation109_spill] sm:$0xff]  ;;  %v6729_v40 = vld [vmem:[#allocation12_spill] sm:$0xff] }
 0x4a1   :  { %v2194_v42 = vadd.f32 %v2193_v38, %v2192_v27  ;;  %v6730_v27 = vld [vmem:[#allocation34_spill] sm:$0xff] }
 0x4a2   :  { %2368 = vmatmul.bf16.vlgmr.msra.gmra.mxu2 %v5523_v11  ;;  %2394 = vmatmul.bf16.vlgmr.msrb.gmra.mxu0 %v5523_v11  ;;  %v6731_v38 = vld [vmem:[#allocation14_spill] sm:$0xff] }
 0x4a3   :  { %v5553_v15 = vsel %vm1960_vm7, %v2194_v42, %v5385_v41  ;;  %2412 = vmatpush.bf16.msrb.mxu2 %v6468_v25  ;;  %2548 = vmatpush.bf16.msra.mxu0 %v4424_v9  ;;  %v6711_v41 = vld [vmem:[#allocation21_spill] sm:$0xff]  ;;  %v6732_v42 = vld [vmem:[#allocation110_spill] sm:$0xff] }
 0x4a4   :  { %v5559_v1 = vpack.c.bf16 %v5553_v15, %v5553_v15 }
 0x4a6   :  { %2277 = vmatmul.bf16.vlgmr.msrb.gmra.mxu3 %v5559_v1  ;;  %2303 = vmatmul.bf16.vlgmr.msrb.gmra.mxu1 %v5559_v1 }
 0x4a7   :  { %2373 = vmatpush.bf16.msrb.mxu3 %v4802_v33  ;;  %2399 = vmatpush.bf16.msrb.mxu1 %v6472_v39 }
 0x4a8   :  { %2413 = vmatpush.bf16.msrb.mxu2 %v6469_v6  ;;  %2549 = vmatpush.bf16.msra.mxu0 %v4438_v23 }
 0x4ab   :  { %2374 = vmatpush.bf16.msrb.mxu3 %v4814_v51  ;;  %2400 = vmatpush.bf16.msrb.mxu1 %v6474_v20 }
 0x4ac   :  { %2414 = vmatpush.bf16.msrb.mxu2 %v6470_v2  ;;  %2550 = vmatpush.bf16.msra.mxu0 %v4458_v35 }
 0x4af   :  { %2375 = vmatpush.bf16.msrb.mxu3 %v4828_v53  ;;  %2401 = vmatpush.bf16.msrb.mxu1 %v6475_v4 }
 0x4b0   :  { %2415 = vmatpush.bf16.msrb.mxu2 %v6471_v56  ;;  %2551 = vmatpush.bf16.msra.mxu0 %v4472_v50 }
 0x4b3   :  { %2376 = vmatpush.bf16.msrb.mxu3 %v4834_v52  ;;  %2402 = vmatpush.bf16.msrb.mxu1 %v6625_v10 }
 0x4b4   :  { %2416 = vmatpush.bf16.msrb.mxu2 %v6710_v59  ;;  %2552 = vmatpush.bf16.msra.mxu0 %v6711_v41 }
 0x4b6   :  { %2329 = vmatmul.bf16.vlgmr.msra.gmra.mxu3 %v5559_v1  ;;  %2355 = vmatmul.bf16.vlgmr.msra.gmra.mxu1 %v5559_v1 }
 0x4b7   :  { %2377 = vmatpush.bf16.msrb.mxu3 %v6712_v7  ;;  %2403 = vmatpush.bf16.msrb.mxu1 %v6713_v13 }
 0x4b8   :  { %2417 = vmatpush.bf16.msrb.mxu2 %v6714_v60  ;;  %2553 = vmatpush.bf16.msra.mxu0 %v6715_v58  ;;  %v6791_v58 = vld [vmem:[#allocation127_spill] sm:$0xff] }
 0x4bb   :  { %2378 = vmatpush.bf16.msrb.mxu3 %v6716_v29  ;;  %2404 = vmatpush.bf16.msrb.mxu1 %v6717_v62 }
 0x4bc   :  { %2418 = vmatpush.bf16.msrb.mxu2 %v6718_v46  ;;  %2554 = vmatpush.bf16.msra.mxu0 %v6719_v0 }
 0x4bf   :  { %2379 = vmatpush.bf16.msrb.mxu3 %v6720_v24  ;;  %2405 = vmatpush.bf16.msrb.mxu1 %v6721_v45 }
 0x4c0   :  { %2419 = vmatpush.bf16.msrb.mxu2 %v6722_v18  ;;  %2555 = vmatpush.bf16.msra.mxu0 %v6723_v5  ;;  %v6742_v5 = vld [vmem:[#allocation50_spill] sm:$0xff] }
 0x4c3   :  { %2380 = vmatpush.bf16.msrb.mxu3 %v6726_v63  ;;  %2420 = vmatmul.bf16.vlgmr.msrb.gmra.mxu2 %v5523_v11  ;;  %v6734_v63 = vld [vmem:[#allocation41_spill] sm:$0xff] }
 0x4c4   :  { %2574 = vmatpush.bf16.msra.mxu2 %v6724_v30  ;;  %2600 = vmatpush.bf16.msrb.mxu0 %v6725_v49  ;;  %v6733_v49 = vld [vmem:[#allocation15_spill] sm:$0xff]  ;;  %v6735_v11 = vld [vmem:[#allocation17_spill] sm:$0xff]  ;;  %v6740_v30 = vld [vmem:[#allocation114_spill] sm:$0xff] }
 0x4c5   :  { %2406 = vmatpush.bf16.msrb.mxu1 %v6727_v3  ;;  %v6736_v3 = vld [vmem:[#allocation112_spill] sm:$0xff] }
 0x4c6   :  { %2381 = vmatmul.bf16.vlgmr.msrb.gmra.mxu3 %v5559_v1 }
 0x4c7   :  { %2425 = vmatpush.bf16.msra.mxu3 %v6728_v8  ;;  %v6737_v8 = vld [vmem:[#allocation18_spill] sm:$0xff] }
 0x4c8   :  { %2575 = vmatpush.bf16.msra.mxu2 %v6729_v40  ;;  %2601 = vmatpush.bf16.msrb.mxu0 %v6731_v38  ;;  %v6738_v40 = vld [vmem:[#allocation45_spill] sm:$0xff]  ;;  %v6741_v38 = vld [vmem:[#allocation22_spill] sm:$0xff] }
 0x4c9   :  { %2561 = vmatpush.bf16.msra.mxu1 %v6730_v27  ;;  %v6739_v27 = vld [vmem:[#allocation20_spill] sm:$0xff] }
 0x4ca   :  { %2407 = vmatmul.bf16.vlgmr.msrb.gmra.mxu1 %v5559_v1 }
 0x4cb   :  { %2426 = vmatpush.bf16.msra.mxu3 %v6732_v42  ;;  %v6743_v42 = vld [vmem:[#allocation24_spill] sm:$0xff] }
 0x4cc   :  { %2576 = vmatpush.bf16.msra.mxu2 %v6733_v49  ;;  %2602 = vmatpush.bf16.msrb.mxu0 %v6735_v11  ;;  %v6744_v49 = vld [vmem:[#allocation116_spill] sm:$0xff]  ;;  %v6746_v11 = vld [vmem:[#allocation54_spill] sm:$0xff] }
 0x4cd   :  { %2562 = vmatpush.bf16.msra.mxu1 %v6734_v63  ;;  %v6745_v63 = vld [vmem:[#allocation26_spill] sm:$0xff] }
 0x4cf   :  { %2427 = vmatpush.bf16.msra.mxu3 %v6736_v3  ;;  %v6747_v3 = vld [vmem:[#allocation28_spill] sm:$0xff] }
 0x4d0   :  { %2577 = vmatpush.bf16.msra.mxu2 %v6737_v8  ;;  %2603 = vmatpush.bf16.msrb.mxu0 %v6739_v27  ;;  %v6748_v8 = vld [vmem:[#allocation118_spill] sm:$0xff] }
 0x4d1   :  { %2563 = vmatpush.bf16.msra.mxu1 %v6738_v40  ;;  %v6749_v40 = vld [vmem:[#allocation30_spill] sm:$0xff] }
 0x4d2   :  { %v6750_v27 = vld [vmem:[#allocation58_spill] sm:$0xff] }
 0x4d3   :  { %2428 = vmatpush.bf16.msra.mxu3 %v6740_v30  ;;  %v6751_v30 = vld [vmem:[#allocation32_spill] sm:$0xff] }
 0x4d4   :  { %2578 = vmatpush.bf16.msra.mxu2 %v6741_v38  ;;  %2604 = vmatpush.bf16.msrb.mxu0 %v6743_v42  ;;  %v6752_v38 = vld [vmem:[#allocation121_spill] sm:$0xff]  ;;  %v6754_v42 = vld [vmem:[#allocation62_spill] sm:$0xff] }
 0x4d5   :  { %2564 = vmatpush.bf16.msra.mxu1 %v6742_v5  ;;  %v6753_v5 = vld [vmem:[#allocation35_spill] sm:$0xff] }
 0x4d7   :  { %2429 = vmatpush.bf16.msra.mxu3 %v6744_v49  ;;  %v6755_v49 = vld [vmem:[#allocation38_spill] sm:$0xff] }
 0x4d8   :  { %2579 = vmatpush.bf16.msra.mxu2 %v6745_v63  ;;  %2605 = vmatpush.bf16.msrb.mxu0 %v6747_v3  ;;  %v6756_v63 = vld [vmem:[#allocation37_spill] sm:$0xff]  ;;  %v6758_v3 = vld [vmem:[#allocation10_spill] sm:$0xff] }
 0x4d9   :  { %2565 = vmatpush.bf16.msra.mxu1 %v6746_v11  ;;  %v6757_v11 = vld [vmem:[#allocation122_spill] sm:$0xff] }
 0x4db   :  { %2430 = vmatpush.bf16.msra.mxu3 %v6748_v8  ;;  %v6759_v8 = vld [vmem:[#allocation66_spill] sm:$0xff] }
 0x4dc   :  { %2580 = vmatpush.bf16.msra.mxu2 %v6749_v40  ;;  %2606 = vmatpush.bf16.msrb.mxu0 %v6751_v30  ;;  %v6760_v40 = vld [vmem:[#allocation42_spill] sm:$0xff] }
 0x4dd   :  { %2566 = vmatpush.bf16.msra.mxu1 %v6750_v27  ;;  %v6761_v27 = vld [vmem:[#allocation78_spill] sm:$0xff] }
 0x4df   :  { %2431 = vmatpush.bf16.msra.mxu3 %v6752_v38  ;;  %v6762_v38 = vld [vmem:[#allocation13_spill] sm:$0xff] }
 0x4e0   :  { %2581 = vmatpush.bf16.msra.mxu2 %v6753_v5  ;;  %2607 = vmatpush.bf16.msrb.mxu0 %v6756_v63  ;;  %v6763_v5 = vld [vmem:[#allocation46_spill] sm:$0xff]  ;;  %v6766_v63 = vld [vmem:[#allocation51_spill] sm:$0xff] }
 0x4e1   :  { %2567 = vmatpush.bf16.msra.mxu1 %v6754_v42  ;;  %v6764_v42 = vld [vmem:[#allocation82_spill] sm:$0xff] }
 0x4e3   :  { %2432 = vmatpush.bf16.msra.mxu3 %v6757_v11  ;;  %v6767_v11 = vld [vmem:[#allocation86_spill] sm:$0xff] }
 0x4e4   :  { %2626 = vmatpush.bf16.msrb.mxu2 %v6755_v49  ;;  %v6765_v49 = vld [vmem:[#allocation16_spill] sm:$0xff] }
 0x4e5   :  { %2568 = vmatpush.bf16.msra.mxu1 %v6759_v8  ;;  %v6769_v8 = vld [vmem:[#allocation55_spill] sm:$0xff] }
 0x4e6   :  { %2433 = vmatmul.bf16.vlgmr.msra.gmra.mxu3 %v5559_v1  ;;  %v6772_v1 = vld [vmem:[#allocation59_spill] sm:$0xff] }
 0x4e7   :  { %2587 = vmatpush.bf16.msrb.mxu3 %v6758_v3  ;;  %v6768_v3 = vld [vmem:[#allocation19_spill] sm:$0xff] }
 0x4e8   :  { %2627 = vmatpush.bf16.msrb.mxu2 %v6760_v40  ;;  %v6770_v40 = vld [vmem:[#allocation89_spill] sm:$0xff] }
 0x4e9   :  { %2613 = vmatpush.bf16.msrb.mxu1 %v6761_v27  ;;  %v6771_v27 = vld [vmem:[#allocation23_spill] sm:$0xff] }
 0x4eb   :  { %2588 = vmatpush.bf16.msrb.mxu3 %v6762_v38  ;;  %v6773_v38 = vld [vmem:[#allocation92_spill] sm:$0xff] }
 0x4ec   :  { %2628 = vmatpush.bf16.msrb.mxu2 %v6763_v5  ;;  %v6774_v5 = vld [vmem:[#allocation27_spill] sm:$0xff] }
 0x4ed   :  { %2614 = vmatpush.bf16.msrb.mxu1 %v6764_v42  ;;  %v6775_v42 = vld [vmem:[#allocation63_spill] sm:$0xff] }
 0x4ef   :  { %2589 = vmatpush.bf16.msrb.mxu3 %v6765_v49  ;;  %v6776_v49 = vld [vmem:[#allocation95_spill] sm:$0xff] }
 0x4f0   :  { %2629 = vmatpush.bf16.msrb.mxu2 %v6766_v63  ;;  %v6777_v63 = vld [vmem:[#allocation31_spill] sm:$0xff] }
 0x4f1   :  { %2615 = vmatpush.bf16.msrb.mxu1 %v6767_v11  ;;  %v6778_v11 = vld [vmem:[#allocation67_spill] sm:$0xff] }
 0x4f3   :  { %2590 = vmatpush.bf16.msrb.mxu3 %v6768_v3  ;;  %v6779_v3 = vld [vmem:[#allocation98_spill] sm:$0xff] }
 0x4f4   :  { %2630 = vmatpush.bf16.msrb.mxu2 %v6769_v8  ;;  %v6780_v8 = vld [vmem:[#allocation36_spill] sm:$0xff] }
 0x4f5   :  { %2616 = vmatpush.bf16.msrb.mxu1 %v6770_v40  ;;  %v6781_v40 = vld [vmem:[#allocation39_spill] sm:$0xff] }
 0x4f7   :  { %2591 = vmatpush.bf16.msrb.mxu3 %v6771_v27  ;;  %v6782_v27 = vld [vmem:[#allocation100_spill] sm:$0xff] }
 0x4f8   :  { %2631 = vmatpush.bf16.msrb.mxu2 %v6772_v1 }
 0x4f9   :  { %2617 = vmatpush.bf16.msrb.mxu1 %v6773_v38  ;;  %v6783_v38 = vld [vmem:[#allocation43_spill] sm:$0xff] }
 0x4fb   :  { %2592 = vmatpush.bf16.msrb.mxu3 %v6774_v5  ;;  %v6784_v5 = vld [vmem:[#allocation48_spill] sm:$0xff] }
 0x4fc   :  { %2632 = vmatpush.bf16.msrb.mxu2 %v6775_v42 }
 0x4fd   :  { %2618 = vmatpush.bf16.msrb.mxu1 %v6776_v49  ;;  %v6785_v49 = vld [vmem:[#allocation52_spill] sm:$0xff] }
 0x4ff   :  { %2593 = vmatpush.bf16.msrb.mxu3 %v6777_v63  ;;  %v2291_v1 = vpop.f32.mrf.mxu0  ;;  %v6786_v63 = vld [vmem:[#allocation56_spill] sm:$0xff] }
 0x500   :  { %2633 = vmatpush.bf16.msrb.mxu2 %v6778_v11 }
 0x501   :  { %2619 = vmatpush.bf16.msrb.mxu1 %v6779_v3  ;;  %v6787_v3 = vld [vmem:[#allocation60_spill] sm:$0xff] }
 0x503   :  { %2594 = vmatpush.bf16.msrb.mxu3 %v6780_v8  ;;  %v6788_v8 = vld [vmem:[#allocation64_spill] sm:$0xff] }
 0x505   :  { %2620 = vmatpush.bf16.msrb.mxu1 %v6782_v27  ;;  %v2265_v42 = vpop.f32.mrf.mxu2  ;;  %v6789_v27 = vld [vmem:[#allocation68_spill] sm:$0xff] }
 0x507   :  { %2639 = vmatpush.bf16.msra.mxu3 %v6781_v40  ;;  %v2293_v30 = vpop.f32.mrf.mxu0 }
 0x508   :  { %v6790_v30 = vld [vmem:[#allocation115_spill] sm:$0xff] }
 0x50b   :  { %2640 = vmatpush.bf16.msra.mxu3 %v6783_v38 }
 0x50d   :  { %v2267_v11 = vpop.f32.mrf.mxu2 }
 0x50f   :  { %2641 = vmatpush.bf16.msra.mxu3 %v6784_v5  ;;  %v2343_v18 = vpop.f32.mrf.mxu0 }
 0x513   :  { %2642 = vmatpush.bf16.msra.mxu3 %v6785_v49 }
 0x515   :  { %v2317_v40 = vpop.f32.mrf.mxu2 }
 0x517   :  { %2643 = vmatpush.bf16.msra.mxu3 %v6786_v63  ;;  %v2345_v45 = vpop.f32.mrf.mxu0 }
 0x51b   :  { %2644 = vmatpush.bf16.msra.mxu3 %v6787_v3 }
 0x51d   :  { %v2319_v24 = vpop.f32.mrf.mxu2 }
 0x51f   :  { %2645 = vmatpush.bf16.msra.mxu3 %v6788_v8  ;;  %v5665_v38 = vpop.f32.mrf.mxu0 }
 0x523   :  { %2646 = vmatpush.bf16.msra.mxu3 %v6789_v27  ;;  %v2304_v5 = vpop.f32.mrf.mxu1 }
 0x524   :  { %v2305_v0 = vadd.f32 %v2304_v5, %v2291_v1 }
 0x525   :  { %v2369_v62 = vpop.f32.mrf.mxu2 }
 0x526   :  { %v2512_v46 = vadd.f32 %v2305_v0, %v6790_v30 }
 0x527   :  { %v2397_v29 = vpop.f32.mrf.mxu0 }
 0x528   :  { %v3921_v49 = vmul.f32 -1.442695, %v2512_v46  ;;  %v6792_v46 = vld [vmem:[#allocation133_spill] sm:$0xff] }
 0x529   :  { %v2278_v63 = vpop.f32.mrf.mxu3 }
 0x52a   :  { %4188 = vpow2.f32 %v3921_v49  ;;  %v2279_v11 = vadd.f32 %v2278_v63, %v2265_v42 }
 0x52b   :  { %v2306_v3 = vpop.f32.mrf.mxu1 }
 0x52c   :  { %v2492_v8 = vadd.f32 %v2279_v11, %v6791_v58 }
 0x52d   :  { %v2371_v27 = vpop.f32.mrf.mxu2 }
 0x52e   :  { %v3920_v60 = vmul.f32 -1.442695, %v2492_v8 }
 0x530   :  { %v4189_v45 = vpop.eup %4188  ;;  %4190 = vpow2.f32 %v3920_v60 }
 0x531   :  { %v2516_v24 = vadd.f32 1.0, %v4189_v45  ;;  %v2280_v13 = vpop.f32.mrf.mxu3 }
 0x533   :  { %v2356_v7 = vpop.f32.mrf.mxu1  ;;  %4192 = vrcp.f32 %v2516_v24  ;;  %vm2522_vm6 = vweird.f32 %v2516_v24 }
 0x534   :  { %v2357_v5 = vadd.f32 %v2356_v7, %v2343_v18 }
 0x536   :  { %v4191_v1 = vpop.eup %4190  ;;  %v2438_v30 = vadd.f32 %v2357_v5, %v6792_v46 }
 0x537   :  { %v2496_v0 = vadd.f32 1.0, %v4191_v1 }
 0x538   :  { %v3918_v3 = vmul.f32 -1.442695, %v2438_v30 }
 0x539   :  { %4194 = vrcp.f32 %v2496_v0  ;;  %v2330_v49 = vpop.f32.mrf.mxu3  ;;  %v4193_v63 = vpop.eup %4192  ;;  %v2508_v13 = vand.u32 2147483648, %v2496_v0  ;;  %v2506_v7 = vand.u32 2147483647, %v2496_v0  ;;  %vm2502_vm0 = vweird.f32 %v2496_v0 }
 0x53a   :  { %v2518_v42 = vmul.f32 %v4193_v63, %v2516_v24  ;;  %4196 = vpow2.f32 %v3918_v3  ;;  %v2331_v45 = vadd.f32 %v2330_v49, %v2317_v40  ;;  %vm2523_vm4 = vweird.f32 %v4193_v63 }
 0x53b   :  { %v2358_v29 = vpop.f32.mrf.mxu1  ;;  %v2509_v30 = vor.u32 1.1754944e-38, %v2508_v13  ;;  %vm2507_vm3 = vcmp.eq.f32.partialorder %v2506_v7, 8.507059e+37  ;;  %vm2524_vm10 = vmor %vm2522_vm6, %vm2523_vm4 }
 0x53c   :  { %v2519_v60 = vsub.f32 1.0, %v2518_v42  ;;  %v2532_v42 = vadd.f32 %v5507_v57, %v2331_v45 }
 0x53e   :  { %v2520_v5 = vmul.f32 %v4193_v63, %v2519_v60  ;;  %v2526_v60 = vand.u32 2147483647, %v2516_v24 }
 0x53f   :  { %v4195_v58 = vpop.eup %4194 }
 0x540   :  { %v2498_v8 = vmul.f32 %v4195_v58, %v2496_v0  ;;  %vm2503_vm7 = vweird.f32 %v4195_v58  ;;  %v4197_v1 = vpop.eup %4196  ;;  %vm2527_vm12 = vcmp.eq.f32.partialorder %v2526_v60, 8.507059e+37 }
 0x541   :  { %v2332_v27 = vpop.f32.mrf.mxu3  ;;  %vm2504_vm1 = vmor %vm2502_vm0, %vm2503_vm7  ;;  %v2445_v40 = vadd.f32 1.0, %v4197_v1 }
 0x542   :  { %v2499_v11 = vsub.f32 1.0, %v2498_v8  ;;  %v2521_v8 = vadd.f32 %v4193_v63, %v2520_v5 }
 0x543   :  { %4198 = vrcp.f32 %v2445_v40  ;;  %vm2451_vm14 = vweird.f32 %v2445_v40 }
 0x544   :  { %v2500_v41 = vmul.f32 %v4195_v58, %v2499_v11  ;;  %v2528_v11 = vand.u32 2147483648, %v2516_v24  ;;  %v5677_v24 = vpop.permute.xlu1 %2542 }
 0x545   :  { %vm2544_vm9 = vcmp.eq.s32.totalorder %v5677_v24, 1  ;;  %v6880_v24 = vld [vmem:[#allocation94_spill] sm:$0xff] }
 0x546   :  { %v2501_v46 = vadd.f32 %v4195_v58, %v2500_v41  ;;  %v5672_v29 = vpop.f32.mrf.mxu2  ;;  %v6793_v41 = vld [vmem:[#allocation128_spill] sm:$0xff] }
 0x547   :  { %v5670_v18 = vpop.f32.mrf.mxu1 }
 0x548   :  { %v2505_v3 = vsel %vm2504_vm1, %v4195_v58, %v2501_v46  ;;  %v2525_v46 = vsel %vm2524_vm10, %v4193_v63, %v2521_v8  ;;  %v2529_v58 = vor.u32 1.1754944e-38, %v2528_v11 }
 0x549   :  { %v2510_v49 = vsel %vm2507_vm3, %v2509_v30, %v2505_v3  ;;  %v2382_v27 = vpop.f32.mrf.mxu3  ;;  %v4199_v1 = vpop.eup %4198 }
 0x54a   :  { %v2533_v59 = vmul.f32 %v2532_v42, %v2510_v49  ;;  %v2383_v10 = vadd.f32 %v2382_v27, %v2369_v62  ;;  %v2530_v7 = vsel %vm2527_vm12, %v2529_v58, %v2525_v46  ;;  %v2447_v63 = vmul.f32 %v4199_v1, %v2445_v40 }
 0x54b   :  { %v2536_v62 = vsub.f32 1.0, %v2530_v7  ;;  %vm2452_vm13 = vweird.f32 %v4199_v1  ;;  %v2455_v46 = vand.u32 2147483647, %v2445_v40 }
 0x54c   :  { %v2534_v0 = vadd.f32 %v2533_v59, %v6793_v41  ;;  %v2439_v52 = vadd.f32 %v2383_v10, %v4993_v19  ;;  %v2538_v59 = vmul.f32 %v2530_v7, %v5519_v14  ;;  %v2448_v27 = vsub.f32 1.0, %v2447_v63  ;;  %vm2453_vm8 = vmor %vm2451_vm14, %vm2452_vm13 }
 0x54d   :  { %vm2456_vm2 = vcmp.eq.f32.partialorder %v2455_v46, 8.507059e+37  ;;  %v6799_v46 = vld [vmem:[#allocation75_spill] sm:$0xff] }
 0x54e   :  { %4200 = vtanh.f32 %v2534_v0  ;;  %v3919_v57 = vmul.f32 -1.442695, %v2439_v52  ;;  %v2423_v45 = vpop.f32.mrf.mxu2  ;;  %v2449_v60 = vmul.f32 %v4199_v1, %v2448_v27 }
 0x54f   :  { %v2410_v13 = vpop.f32.mrf.mxu1  ;;  %v2409_v45 = vadd.f32 %v5670_v18, %v5665_v38 }
 0x550   :  { %4202 = vpow2.f32 %v3919_v57  ;;  %v2450_v0 = vadd.f32 %v4199_v1, %v2449_v60  ;;  %v2457_v13 = vand.u32 2147483648, %v2445_v40 }
 0x551   :  { %v2384_v5 = vpop.f32.mrf.mxu3 }
 0x552   :  { %v2454_v5 = vsel %vm2453_vm8, %v4199_v1, %v2450_v0 }
 0x554   :  { %v4201_v30 = vpop.eup %4200 }
 0x555   :  { %v2537_v3 = vmul.f32 %v4201_v30, %v2536_v62  ;;  %v2458_v62 = vor.u32 1.1754944e-38, %v2457_v13 }
 0x556   :  { %v4203_v10 = vpop.eup %4202 }
 0x557   :  { %v2539_v42 = vadd.f32 %v2538_v59, %v2537_v3  ;;  %v2464_v49 = vadd.f32 1.0, %v4203_v10  ;;  %v2459_v3 = vsel %vm2456_vm2, %v2458_v62, %v2454_v5  ;;  %v2440_v59 = vadd.f32 %v2409_v45, %v5026_v61  ;;  %v6803_v45 = vld [vmem:[#allocation76_spill] sm:$0xff]  ;;  %v6805_v5 = vld [vmem:[#allocation29_spill] sm:$0xff]  ;;  %v6806_v62 = vld [vmem:[#allocation107_spill] sm:$0xff] }
 0x559   :  { %v5684_v52 = vsel %vm2544_vm9, %v2539_v42, %v5519_v14  ;;  %4204 = vrcp.f32 %v2464_v49  ;;  %v2476_v10 = vand.u32 2147483648, %v2464_v49  ;;  %vm2470_vm15 = vweird.f32 %v2464_v49 }
 0x55a   :  { %v5688_v8 = vpack.c.bf16 %v5684_v52, %v5684_v52  ;;  %v2474_v38 = vand.u32 2147483647, %v2464_v49 }
 0x55b   :  { %v2477_v63 = vor.u32 1.1754944e-38, %v2476_v10  ;;  %v6811_v10 = vld [vmem:[#allocation11_spill] sm:$0xff] }
 0x55c   :  { %2556 = vmatmul.bf16.vlgmr.msra.gmra.mxu0 %v5688_v8  ;;  %2582 = vmatmul.bf16.vlgmr.msra.gmra.mxu2 %v5688_v8  ;;  %vm2475_vm0 = vcmp.eq.f32.partialorder %v2474_v38, 8.507059e+37  ;;  %v6813_v38 = vld [vmem:[#allocation85_spill] sm:$0xff] }
 0x55d   :  { %2652 = vmatpush.bf16.msra.mxu0 %v6455_v37  ;;  %2678 = vmatpush.bf16.msra.mxu2 %v6456_v17 }
 0x55f   :  { %v4205_v11 = vpop.eup %4204 }
 0x560   :  { %v2466_v41 = vmul.f32 %v4205_v11, %v2464_v49  ;;  %vm2471_vm5 = vweird.f32 %v4205_v11 }
 0x561   :  { %2653 = vmatpush.bf16.msra.mxu0 %v6457_v16  ;;  %2679 = vmatpush.bf16.msra.mxu2 %v6458_v36  ;;  %vm2472_vm7 = vmor %vm2470_vm15, %vm2471_vm5 }
 0x562   :  { %v2467_v14 = vsub.f32 1.0, %v2466_v41 }
 0x564   :  { %v2468_v58 = vmul.f32 %v4205_v11, %v2467_v14 }
 0x565   :  { %2654 = vmatpush.bf16.msra.mxu0 %v6459_v48  ;;  %2680 = vmatpush.bf16.msra.mxu2 %v6539_v47 }
 0x566   :  { %v2469_v40 = vadd.f32 %v4205_v11, %v2468_v58  ;;  %v6800_v58 = vld [vmem:[#allocation97_spill] sm:$0xff] }
 0x569   :  { %v2434_v57 = vpop.f32.mrf.mxu3  ;;  %2655 = vmatpush.bf16.msra.mxu0 %v6540_v43  ;;  %2681 = vmatpush.bf16.msra.mxu2 %v6541_v32 }
 0x56a   :  { %v2435_v7 = vadd.f32 %v2434_v57, %v5672_v29  ;;  %v2473_v29 = vsel %vm2472_vm7, %v4205_v11, %v2469_v40  ;;  %v6801_v57 = vld [vmem:[#allocation25_spill] sm:$0xff] }
 0x56b   :  { %v2478_v27 = vsel %vm2475_vm0, %v2477_v63, %v2473_v29  ;;  %v6808_v40 = vld [vmem:[#allocation101_spill] sm:$0xff]  ;;  %v6815_v29 = vld [vmem:[#allocation12_spill] sm:$0xff]  ;;  %v6817_v63 = vld [vmem:[#allocation14_spill] sm:$0xff] }
 0x56c   :  { %v2441_v30 = vadd.f32 %v2435_v7, %v5023_v28  ;;  %2608 = vmatmul.bf16.vlgmr.msrb.gmra.mxu0 %v5688_v8  ;;  %2634 = vmatmul.bf16.vlgmr.msrb.gmra.mxu2 %v5688_v8  ;;  %v2483_v49 = vsub.f32 1.0, %v2478_v27  ;;  %v2485_v14 = vmul.f32 %v2478_v27, %v5553_v15  ;;  %v6804_v7 = vld [vmem:[#allocation99_spill] sm:$0xff]  ;;  %v6818_v27 = vld [vmem:[#allocation110_spill] sm:$0xff] }
 0x56d   :  { %2656 = vmatpush.bf16.msra.mxu0 %v6542_v34  ;;  %2682 = vmatpush.bf16.msra.mxu2 %v6543_v12 }
 0x56e   :  { %v2480_v42 = vmul.f32 %v2459_v3, %v2441_v30  ;;  %v6807_v30 = vld [vmem:[#allocation81_spill] sm:$0xff] }
 0x56f   :  { %v6809_v3 = vld [vmem:[#allocation33_spill] sm:$0xff] }
 0x570   :  { %v2481_v18 = vadd.f32 %v2480_v42, %v2440_v59  ;;  %v6810_v59 = vld [vmem:[#allocation9_spill] sm:$0xff]  ;;  %v6812_v42 = vld [vmem:[#allocation108_spill] sm:$0xff] }
 0x571   :  { %v2436_v1 = vpop.f32.mrf.mxu3  ;;  %2657 = vmatpush.bf16.msra.mxu0 %v6544_v55  ;;  %2683 = vmatpush.bf16.msra.mxu2 %v6545_v44 }
 0x572   :  { %4206 = vtanh.f32 %v2481_v18  ;;  %v6814_v18 = vld [vmem:[#allocation109_spill] sm:$0xff]  ;;  %v6816_v1 = vld [vmem:[#allocation34_spill] sm:$0xff] }
 0x575   :  { %2658 = vmatpush.bf16.msra.mxu0 %v6466_v21  ;;  %2684 = vmatpush.bf16.msra.mxu2 %v4792_v54 }
 0x578   :  { %v4207_v60 = vpop.eup %4206 }
 0x579   :  { %v2484_v41 = vmul.f32 %v4207_v60, %v2483_v49  ;;  %2659 = vmatpush.bf16.msra.mxu0 %v6467_v26  ;;  %2685 = vmatpush.bf16.msra.mxu2 %v4804_v31  ;;  %v6819_v49 = vld [vmem:[#allocation15_spill] sm:$0xff]  ;;  %v6820_v60 = vld [vmem:[#allocation41_spill] sm:$0xff] }
 0x57b   :  { %v2486_v0 = vadd.f32 %v2485_v14, %v2484_v41  ;;  %v6822_v41 = vld [vmem:[#allocation112_spill] sm:$0xff]  ;;  %v6823_v14 = vld [vmem:[#allocation18_spill] sm:$0xff] }
 0x57c   :  { %2660 = vmatmul.bf16.vlgmr.msra.gmra.mxu0 %v5688_v8  ;;  %2686 = vmatmul.bf16.vlgmr.msra.gmra.mxu2 %v5688_v8 }
 0x57d   :  { %v5719_v11 = vsel %vm2252_vm11, %v2486_v0, %v5553_v15  ;;  %2704 = vmatpush.bf16.msrb.mxu0 %v6468_v25  ;;  %2840 = vmatpush.bf16.msrb.mxu2 %v4424_v9  ;;  %v6794_v9 = vld [vmem:[#allocation102_spill] sm:$0xff]  ;;  %v6797_v15 = vld [vmem:[#allocation21_spill] sm:$0xff] }
 0x57e   :  { %v5725_v13 = vpack.c.bf16 %v5719_v11, %v5719_v11  ;;  %v6824_v0 = vld [vmem:[#allocation45_spill] sm:$0xff] }
 0x580   :  { %2569 = vmatmul.bf16.vlgmr.msra.gmra.mxu1 %v5725_v13  ;;  %2595 = vmatmul.bf16.vlgmr.msrb.gmra.mxu3 %v5725_v13 }
 0x581   :  { %2665 = vmatpush.bf16.msra.mxu1 %v4802_v33  ;;  %2691 = vmatpush.bf16.msrb.mxu3 %v6472_v39 }
 0x582   :  { %2705 = vmatpush.bf16.msrb.mxu0 %v6469_v6  ;;  %2841 = vmatpush.bf16.msrb.mxu2 %v4438_v23  ;;  %v6796_v23 = vld [vmem:[#allocation94_spill] sm:$0xff] }
 0x585   :  { %2666 = vmatpush.bf16.msra.mxu1 %v4814_v51  ;;  %2692 = vmatpush.bf16.msrb.mxu3 %v6474_v20 }
 0x586   :  { %2706 = vmatpush.bf16.msrb.mxu0 %v6470_v2  ;;  %2842 = vmatpush.bf16.msrb.mxu2 %v4458_v35  ;;  %v6798_v35 = vld [vmem:[#allocation104_spill] sm:$0xff] }
 0x589   :  { %2667 = vmatpush.bf16.msra.mxu1 %v4828_v53  ;;  %2693 = vmatpush.bf16.msrb.mxu3 %v6475_v4 }
 0x58a   :  { %2707 = vmatpush.bf16.msrb.mxu0 %v6471_v56  ;;  %2843 = vmatpush.bf16.msrb.mxu2 %v4472_v50  ;;  %v6802_v50 = vld [vmem:[#allocation105_spill] sm:$0xff] }
 0x58d   :  { %2668 = vmatpush.bf16.msra.mxu1 %v6794_v9  ;;  %2694 = vmatpush.bf16.msrb.mxu3 %v6795_v22 }
 0x58e   :  { %2708 = vmatpush.bf16.msrb.mxu0 %v6796_v23  ;;  %2844 = vmatpush.bf16.msrb.mxu2 %v6797_v15  ;;  %v6825_v15 = vld [vmem:[#allocation20_spill] sm:$0xff] }
 0x590   :  { %2621 = vmatmul.bf16.vlgmr.msrb.gmra.mxu1 %v5725_v13  ;;  %2647 = vmatmul.bf16.vlgmr.msra.gmra.mxu3 %v5725_v13 }
 0x591   :  { %2669 = vmatpush.bf16.msra.mxu1 %v6798_v35  ;;  %2695 = vmatpush.bf16.msrb.mxu3 %v6799_v46 }
 0x592   :  { %2709 = vmatpush.bf16.msrb.mxu0 %v6800_v58  ;;  %2845 = vmatpush.bf16.msrb.mxu2 %v6801_v57  ;;  %v6826_v57 = vld [vmem:[#allocation114_spill] sm:$0xff] }
 0x595   :  { %2670 = vmatpush.bf16.msra.mxu1 %v6802_v50  ;;  %2696 = vmatpush.bf16.msrb.mxu3 %v6803_v45  ;;  %v6877_v50 = vld [vmem:[#allocation120_spill] sm:$0xff] }
 0x596   :  { %2710 = vmatpush.bf16.msrb.mxu0 %v6804_v7  ;;  %2846 = vmatpush.bf16.msrb.mxu2 %v6805_v5  ;;  %v6827_v5 = vld [vmem:[#allocation22_spill] sm:$0xff] }
 0x599   :  { %2671 = vmatpush.bf16.msra.mxu1 %v6806_v62  ;;  %2697 = vmatpush.bf16.msrb.mxu3 %v6807_v30 }
 0x59a   :  { %2711 = vmatpush.bf16.msrb.mxu0 %v6808_v40  ;;  %2847 = vmatpush.bf16.msrb.mxu2 %v6809_v3  ;;  %v6828_v3 = vld [vmem:[#allocation50_spill] sm:$0xff] }
 0x59d   :  { %2672 = vmatpush.bf16.msra.mxu1 %v6812_v42  ;;  %2712 = vmatmul.bf16.vlgmr.msrb.gmra.mxu0 %v5688_v8  ;;  %v6821_v8 = vld [vmem:[#allocation17_spill] sm:$0xff] }
 0x59e   :  { %2866 = vmatpush.bf16.msra.mxu0 %v6810_v59  ;;  %2892 = vmatpush.bf16.msra.mxu2 %v6811_v10  ;;  %v6829_v59 = vld [vmem:[#allocation24_spill] sm:$0xff] }
 0x59f   :  { %2698 = vmatpush.bf16.msrb.mxu3 %v6813_v38  ;;  %v6830_v10 = vld [vmem:[#allocation116_spill] sm:$0xff] }
 0x5a0   :  { %2673 = vmatmul.bf16.vlgmr.msra.gmra.mxu1 %v5725_v13 }
 0x5a1   :  { %2717 = vmatpush.bf16.msrb.mxu1 %v6814_v18 }
 0x5a2   :  { %2867 = vmatpush.bf16.msra.mxu0 %v6815_v29  ;;  %2893 = vmatpush.bf16.msra.mxu2 %v6817_v63  ;;  %v6831_v29 = vld [vmem:[#allocation26_spill] sm:$0xff]  ;;  %v6833_v63 = vld [vmem:[#allocation28_spill] sm:$0xff] }
 0x5a3   :  { %2853 = vmatpush.bf16.msra.mxu3 %v6816_v1  ;;  %v6832_v1 = vld [vmem:[#allocation54_spill] sm:$0xff] }
 0x5a4   :  { %2699 = vmatmul.bf16.vlgmr.msrb.gmra.mxu3 %v5725_v13 }
 0x5a5   :  { %2718 = vmatpush.bf16.msrb.mxu1 %v6818_v27 }
 0x5a6   :  { %2868 = vmatpush.bf16.msra.mxu0 %v6819_v49  ;;  %2894 = vmatpush.bf16.msra.mxu2 %v6821_v8  ;;  %v6834_v49 = vld [vmem:[#allocation118_spill] sm:$0xff] }
 0x5a7   :  { %2854 = vmatpush.bf16.msra.mxu3 %v6820_v60  ;;  %v6835_v60 = vld [vmem:[#allocation30_spill] sm:$0xff] }
 0x5a8   :  { %v6836_v8 = vld [vmem:[#allocation58_spill] sm:$0xff] }
 0x5a9   :  { %2719 = vmatpush.bf16.msrb.mxu1 %v6822_v41  ;;  %v6866_v41 = vld [vmem:[#allocation36_spill] sm:$0xff] }
 0x5aa   :  { %2869 = vmatpush.bf16.msra.mxu0 %v6823_v14  ;;  %2895 = vmatpush.bf16.msra.mxu2 %v6825_v15  ;;  %v6837_v14 = vld [vmem:[#allocation32_spill] sm:$0xff]  ;;  %v6839_v15 = vld [vmem:[#allocation35_spill] sm:$0xff] }
 0x5ab   :  { %2855 = vmatpush.bf16.msra.mxu3 %v6824_v0  ;;  %v6838_v0 = vld [vmem:[#allocation121_spill] sm:$0xff] }
 0x5ad   :  { %2720 = vmatpush.bf16.msrb.mxu1 %v6826_v57  ;;  %v6863_v57 = vld [vmem:[#allocation31_spill] sm:$0xff] }
 0x5ae   :  { %2870 = vmatpush.bf16.msra.mxu0 %v6827_v5  ;;  %2896 = vmatpush.bf16.msra.mxu2 %v6829_v59  ;;  %v6840_v5 = vld [vmem:[#allocation62_spill] sm:$0xff]  ;;  %v6842_v59 = vld [vmem:[#allocation37_spill] sm:$0xff] }
 0x5af   :  { %2856 = vmatpush.bf16.msra.mxu3 %v6828_v3  ;;  %v6841_v3 = vld [vmem:[#allocation38_spill] sm:$0xff] }
 0x5b1   :  { %2721 = vmatpush.bf16.msrb.mxu1 %v6830_v10  ;;  %v6860_v10 = vld [vmem:[#allocation27_spill] sm:$0xff] }
 0x5b2   :  { %2871 = vmatpush.bf16.msra.mxu0 %v6831_v29  ;;  %2897 = vmatpush.bf16.msra.mxu2 %v6833_v63  ;;  %v6843_v29 = vld [vmem:[#allocation122_spill] sm:$0xff] }
 0x5b3   :  { %2857 = vmatpush.bf16.msra.mxu3 %v6832_v1  ;;  %v6844_v1 = vld [vmem:[#allocation10_spill] sm:$0xff] }
 0x5b4   :  { %v6845_v63 = vld [vmem:[#allocation66_spill] sm:$0xff] }
 0x5b5   :  { %2722 = vmatpush.bf16.msrb.mxu1 %v6834_v49  ;;  %v6856_v49 = vld [vmem:[#allocation89_spill] sm:$0xff] }
 0x5b6   :  { %2872 = vmatpush.bf16.msra.mxu0 %v6835_v60  ;;  %2898 = vmatpush.bf16.msra.mxu2 %v6837_v14  ;;  %v6846_v60 = vld [vmem:[#allocation42_spill] sm:$0xff]  ;;  %v6848_v14 = vld [vmem:[#allocation13_spill] sm:$0xff] }
 0x5b7   :  { %2858 = vmatpush.bf16.msra.mxu3 %v6836_v8  ;;  %v6847_v8 = vld [vmem:[#allocation78_spill] sm:$0xff] }
 0x5b9   :  { %2723 = vmatpush.bf16.msrb.mxu1 %v6838_v0  ;;  %v6851_v0 = vld [vmem:[#allocation16_spill] sm:$0xff] }
 0x5ba   :  { %2873 = vmatpush.bf16.msra.mxu0 %v6839_v15  ;;  %2899 = vmatpush.bf16.msra.mxu2 %v6842_v59  ;;  %v6849_v15 = vld [vmem:[#allocation46_spill] sm:$0xff]  ;;  %v6852_v59 = vld [vmem:[#allocation51_spill] sm:$0xff] }
 0x5bb   :  { %2859 = vmatpush.bf16.msra.mxu3 %v6840_v5  ;;  %v6850_v5 = vld [vmem:[#allocation82_spill] sm:$0xff] }
 0x5bd   :  { %2724 = vmatpush.bf16.msrb.mxu1 %v6843_v29  ;;  %v6853_v29 = vld [vmem:[#allocation86_spill] sm:$0xff] }
 0x5be   :  { %2918 = vmatpush.bf16.msrb.mxu0 %v6841_v3 }
 0x5bf   :  { %2860 = vmatpush.bf16.msra.mxu3 %v6845_v63  ;;  %v6855_v63 = vld [vmem:[#allocation55_spill] sm:$0xff] }
 0x5c0   :  { %2725 = vmatmul.bf16.vlgmr.msrb.gmra.mxu1 %v5725_v13  ;;  %v6858_v13 = vld [vmem:[#allocation59_spill] sm:$0xff] }
 0x5c1   :  { %2879 = vmatpush.bf16.msra.mxu1 %v6844_v1  ;;  %v6854_v1 = vld [vmem:[#allocation19_spill] sm:$0xff] }
 0x5c2   :  { %2919 = vmatpush.bf16.msrb.mxu0 %v6846_v60 }
 0x5c3   :  { %2905 = vmatpush.bf16.msrb.mxu3 %v6847_v8  ;;  %v6857_v8 = vld [vmem:[#allocation23_spill] sm:$0xff] }
 0x5c5   :  { %2880 = vmatpush.bf16.msra.mxu1 %v6848_v14  ;;  %v6859_v14 = vld [vmem:[#allocation92_spill] sm:$0xff] }
 0x5c6   :  { %2920 = vmatpush.bf16.msrb.mxu0 %v6849_v15 }
 0x5c7   :  { %2906 = vmatpush.bf16.msrb.mxu3 %v6850_v5  ;;  %v6861_v5 = vld [vmem:[#allocation63_spill] sm:$0xff] }
 0x5c9   :  { %2881 = vmatpush.bf16.msra.mxu1 %v6851_v0  ;;  %v6862_v0 = vld [vmem:[#allocation95_spill] sm:$0xff] }
 0x5ca   :  { %2921 = vmatpush.bf16.msrb.mxu0 %v6852_v59 }
 0x5cb   :  { %2907 = vmatpush.bf16.msrb.mxu3 %v6853_v29  ;;  %v6864_v29 = vld [vmem:[#allocation67_spill] sm:$0xff] }
 0x5cd   :  { %2882 = vmatpush.bf16.msra.mxu1 %v6854_v1  ;;  %v6865_v1 = vld [vmem:[#allocation98_spill] sm:$0xff] }
 0x5ce   :  { %2922 = vmatpush.bf16.msrb.mxu0 %v6855_v63 }
 0x5cf   :  { %2908 = vmatpush.bf16.msrb.mxu3 %v6856_v49  ;;  %v6867_v49 = vld [vmem:[#allocation39_spill] sm:$0xff] }
 0x5d1   :  { %2883 = vmatpush.bf16.msra.mxu1 %v6857_v8  ;;  %v6868_v8 = vld [vmem:[#allocation100_spill] sm:$0xff] }
 0x5d2   :  { %2923 = vmatpush.bf16.msrb.mxu0 %v6858_v13 }
 0x5d3   :  { %2909 = vmatpush.bf16.msrb.mxu3 %v6859_v14  ;;  %v6869_v14 = vld [vmem:[#allocation43_spill] sm:$0xff] }
 0x5d5   :  { %2884 = vmatpush.bf16.msra.mxu1 %v6860_v10  ;;  %v6870_v10 = vld [vmem:[#allocation48_spill] sm:$0xff] }
 0x5d6   :  { %2924 = vmatpush.bf16.msrb.mxu0 %v6861_v5  ;;  %v6876_v5 = vld [vmem:[#allocation129_spill] sm:$0xff] }
 0x5d7   :  { %2910 = vmatpush.bf16.msrb.mxu3 %v6862_v0  ;;  %v6871_v0 = vld [vmem:[#allocation52_spill] sm:$0xff] }
 0x5d9   :  { %2885 = vmatpush.bf16.msra.mxu1 %v6863_v57  ;;  %v2557_v27 = vpop.f32.mrf.mxu0  ;;  %v6872_v57 = vld [vmem:[#allocation56_spill] sm:$0xff] }
 0x5da   :  { %2925 = vmatpush.bf16.msrb.mxu0 %v6864_v29 }
 0x5db   :  { %2911 = vmatpush.bf16.msrb.mxu3 %v6865_v1  ;;  %v6873_v1 = vld [vmem:[#allocation60_spill] sm:$0xff] }
 0x5dd   :  { %2886 = vmatpush.bf16.msra.mxu1 %v6866_v41  ;;  %v6874_v41 = vld [vmem:[#allocation64_spill] sm:$0xff] }
 0x5df   :  { %2912 = vmatpush.bf16.msrb.mxu3 %v6868_v8  ;;  %v2583_v18 = vpop.f32.mrf.mxu2  ;;  %v6875_v8 = vld [vmem:[#allocation68_spill] sm:$0xff] }
 0x5e1   :  { %2931 = vmatpush.bf16.msrb.mxu1 %v6867_v49  ;;  %v2559_v38 = vpop.f32.mrf.mxu0 }
 0x5e5   :  { %2932 = vmatpush.bf16.msrb.mxu1 %v6869_v14 }
 0x5e7   :  { %v2585_v42 = vpop.f32.mrf.mxu2 }
 0x5e9   :  { %2933 = vmatpush.bf16.msrb.mxu1 %v6870_v10  ;;  %v2609_v29 = vpop.f32.mrf.mxu0 }
 0x5ed   :  { %2934 = vmatpush.bf16.msrb.mxu1 %v6871_v0 }
 0x5ef   :  { %v2635_v49 = vpop.f32.mrf.mxu2 }
 0x5f1   :  { %2935 = vmatpush.bf16.msrb.mxu1 %v6872_v57  ;;  %v2611_v40 = vpop.f32.mrf.mxu0 }
 0x5f5   :  { %2936 = vmatpush.bf16.msrb.mxu1 %v6873_v1 }
 0x5f7   :  { %v2637_v30 = vpop.f32.mrf.mxu2 }
 0x5f9   :  { %2937 = vmatpush.bf16.msrb.mxu1 %v6874_v41  ;;  %v2661_v14 = vpop.f32.mrf.mxu0 }
 0x5fd   :  { %2938 = vmatpush.bf16.msrb.mxu1 %v6875_v8  ;;  %v2570_v62 = vpop.f32.mrf.mxu1 }
 0x5fe   :  { %v2571_v10 = vadd.f32 %v2570_v62, %v2557_v27 }
 0x5ff   :  { %v5832_v0 = vpop.f32.mrf.mxu2 }
 0x600   :  { %v2784_v38 = vadd.f32 %v2571_v10, %v6876_v5 }
 0x601   :  { %v2663_v45 = vpop.f32.mrf.mxu0 }
 0x602   :  { %v3924_v7 = vmul.f32 -1.442695, %v2784_v38 }
 0x603   :  { %v2596_v57 = vpop.f32.mrf.mxu3 }
 0x604   :  { %4208 = vpow2.f32 %v3924_v7  ;;  %v2597_v42 = vadd.f32 %v2596_v57, %v2583_v18  ;;  %v6878_v57 = vld [vmem:[#allocation133_spill] sm:$0xff] }
 0x605   :  { %v2572_v1 = vpop.f32.mrf.mxu1 }
 0x606   :  { %v2804_v41 = vadd.f32 %v2597_v42, %v6877_v50 }
 0x607   :  { %v2689_v8 = vpop.f32.mrf.mxu2 }
 0x608   :  { %v3925_v13 = vmul.f32 -1.442695, %v2804_v41 }
 0x60a   :  { %v4209_v40 = vpop.eup %4208  ;;  %4210 = vpow2.f32 %v3925_v13 }
 0x60b   :  { %v2788_v30 = vadd.f32 1.0, %v4209_v40  ;;  %v2598_v58 = vpop.f32.mrf.mxu3 }
 0x60d   :  { %4212 = vrcp.f32 %v2788_v30  ;;  %v2622_v62 = vpop.f32.mrf.mxu1  ;;  %v2798_v50 = vand.u32 2147483647, %v2788_v30  ;;  %v2800_v41 = vand.u32 2147483648, %v2788_v30  ;;  %vm2794_vm1 = vweird.f32 %v2788_v30 }
 0x60e   :  { %v2623_v42 = vadd.f32 %v2622_v62, %v2609_v29  ;;  %v5841_v29 = vld [vmem:[%s6077_s3] ss:$0 sm:$0xff] }
 0x60f   :  { %v2801_v63 = vor.u32 1.1754944e-38, %v2800_v41  ;;  %vm2799_vm4 = vcmp.eq.f32.partialorder %v2798_v50, 8.507059e+37 }
 0x610   :  { %v4211_v27 = vpop.eup %4210  ;;  %v2824_v62 = vadd.f32 %v5841_v29, %v2623_v42 }
 0x611   :  { %v2808_v5 = vadd.f32 1.0, %v4211_v27 }
 0x613   :  { %v4213_v10 = vpop.eup %4212  ;;  %4214 = vrcp.f32 %v2808_v5  ;;  %v2648_v38 = vpop.f32.mrf.mxu3  ;;  %vm2814_vm10 = vweird.f32 %v2808_v5 }
 0x614   :  { %v2790_v46 = vmul.f32 %v4213_v10, %v2788_v30  ;;  %v2649_v7 = vadd.f32 %v2648_v38, %v2635_v49  ;;  %vm2795_vm11 = vweird.f32 %v4213_v10 }
 0x615   :  { %v2624_v18 = vpop.f32.mrf.mxu1  ;;  %vm2796_vm3 = vmor %vm2794_vm1, %vm2795_vm11 }
 0x616   :  { %v2791_v45 = vsub.f32 1.0, %v2790_v46  ;;  %v2730_v1 = vadd.f32 %v2649_v7, %v6878_v57  ;;  %v2820_v7 = vand.u32 2147483648, %v2808_v5 }
 0x618   :  { %v2792_v13 = vmul.f32 %v4213_v10, %v2791_v45  ;;  %v3922_v8 = vmul.f32 -1.442695, %v2730_v1  ;;  %v2821_v57 = vor.u32 1.1754944e-38, %v2820_v7 }
 0x619   :  { %v4215_v58 = vpop.eup %4214 }
 0x61a   :  { %v2810_v40 = vmul.f32 %v4215_v58, %v2808_v5  ;;  %v2793_v35 = vadd.f32 %v4213_v10, %v2792_v13  ;;  %4216 = vpow2.f32 %v3922_v8  ;;  %v5836_v27 = vpop.f32.mrf.mxu0  ;;  %vm2815_vm6 = vweird.f32 %v4215_v58 }
 0x61b   :  { %v2650_v49 = vpop.f32.mrf.mxu3  ;;  %v2818_v8 = vand.u32 2147483647, %v2808_v5  ;;  %vm2816_vm12 = vmor %vm2814_vm10, %vm2815_vm6 }
 0x61c   :  { %v2811_v38 = vsub.f32 1.0, %v2810_v40  ;;  %v2797_v46 = vsel %vm2796_vm3, %v4213_v10, %v2793_v35  ;;  %v6879_v35 = vld [vmem:[#allocation130_spill] sm:$0xff] }
 0x61d   :  { %v2802_v18 = vsel %vm2799_vm4, %v2801_v63, %v2797_v46  ;;  %v2674_v45 = vpop.f32.mrf.mxu1  ;;  %vm2819_vm13 = vcmp.eq.f32.partialorder %v2818_v8, 8.507059e+37 }
 0x61e   :  { %v2812_v30 = vmul.f32 %v4215_v58, %v2811_v38  ;;  %v2825_v1 = vmul.f32 %v2824_v62, %v2802_v18  ;;  %v2675_v13 = vadd.f32 %v2674_v45, %v2661_v14  ;;  %v5846_v45 = vpop.permute.xlu2 %2834 }
 0x61f   :  { %vm2836_vm14 = vcmp.eq.s32.totalorder %v5846_v45, 1 }
 0x620   :  { %v4217_v41 = vpop.eup %4216  ;;  %v2813_v49 = vadd.f32 %v4215_v58, %v2812_v30  ;;  %v2826_v10 = vadd.f32 %v2825_v1, %v6879_v35  ;;  %v2731_v50 = vadd.f32 %v2675_v13, %v4993_v19 }
 0x621   :  { %v2737_v40 = vadd.f32 1.0, %v4217_v41 }
 0x622   :  { %v2817_v23 = vsel %vm2816_vm12, %v4215_v58, %v2813_v49  ;;  %4218 = vtanh.f32 %v2826_v10  ;;  %v3923_v42 = vmul.f32 -1.442695, %v2731_v50  ;;  %v2715_v63 = vpop.f32.mrf.mxu0 }
 0x623   :  { %4220 = vrcp.f32 %v2737_v40  ;;  %v2822_v38 = vsel %vm2819_vm13, %v2821_v57, %v2817_v23  ;;  %v2749_v63 = vand.u32 2147483648, %v2737_v40  ;;  %vm2743_vm2 = vweird.f32 %v2737_v40 }
 0x624   :  { %4222 = vpow2.f32 %v3923_v42  ;;  %v2828_v62 = vsub.f32 1.0, %v2822_v38  ;;  %v2830_v1 = vmul.f32 %v2822_v38, %v5684_v52  ;;  %v2747_v38 = vand.u32 2147483647, %v2737_v40 }
 0x625   :  { %v2676_v46 = vpop.f32.mrf.mxu1 }
 0x626   :  { %vm2748_vm15 = vcmp.eq.f32.partialorder %v2747_v38, 8.507059e+37 }
 0x627   :  { %v2700_v14 = vpop.f32.mrf.mxu3 }
 0x628   :  { %v4219_v18 = vpop.eup %4218 }
 0x629   :  { %v4221_v5 = vpop.eup %4220  ;;  %v2829_v30 = vmul.f32 %v4219_v18, %v2828_v62  ;;  %v2701_v18 = vadd.f32 %v2700_v14, %v5832_v0 }
 0x62a   :  { %v4223_v13 = vpop.eup %4222  ;;  %v2739_v41 = vmul.f32 %v4221_v5, %v2737_v40  ;;  %vm2744_vm8 = vweird.f32 %v4221_v5 }
 0x62b   :  { %v2831_v7 = vadd.f32 %v2830_v1, %v2829_v30  ;;  %v2756_v58 = vadd.f32 1.0, %v4223_v13  ;;  %vm2745_vm5 = vmor %vm2743_vm2, %vm2744_vm8  ;;  %v2750_v13 = vor.u32 1.1754944e-38, %v2749_v63 }
 0x62c   :  { %v2740_v49 = vsub.f32 1.0, %v2739_v41 }
 0x62d   :  { %v5853_v23 = vsel %vm2836_vm14, %v2831_v7, %v5684_v52  ;;  %4224 = vrcp.f32 %v2756_v58  ;;  %vm2762_vm0 = vweird.f32 %v2756_v58  ;;  %v2766_v0 = vand.u32 2147483647, %v2756_v58 }
 0x62e   :  { %v5857_v57 = vpack.c.bf16 %v5853_v23, %v5853_v23  ;;  %v2741_v10 = vmul.f32 %v4221_v5, %v2740_v49  ;;  %v2732_v49 = vadd.f32 %v2701_v18, %v5026_v61  ;;  %v6885_v18 = vld [vmem:[#allocation59_spill] sm:$0xff] }
 0x62f   :  { %v2702_v8 = vpop.f32.mrf.mxu3  ;;  %vm2767_vm1 = vcmp.eq.f32.partialorder %v2766_v0, 8.507059e+37  ;;  %v6896_v0 = vld [vmem:[#allocation109_spill] sm:$0xff] }
 0x630   :  { %2848 = vmatmul.bf16.vlgmr.msrb.gmra.mxu2 %v5857_v57  ;;  %2874 = vmatmul.bf16.vlgmr.msra.gmra.mxu0 %v5857_v57  ;;  %v2742_v42 = vadd.f32 %v4221_v5, %v2741_v10  ;;  %v2768_v8 = vand.u32 2147483648, %v2756_v58 }
 0x631   :  { %2944 = vmatpush.bf16.msrb.mxu2 %v6455_v37  ;;  %2970 = vmatpush.bf16.msra.mxu0 %v6456_v17 }
 0x632   :  { %v2746_v1 = vsel %vm2745_vm5, %v4221_v5, %v2742_v42 }
 0x633   :  { %v4225_v35 = vpop.eup %4224  ;;  %v2751_v40 = vsel %vm2748_vm15, %v2750_v13, %v2746_v1  ;;  %v6888_v1 = vld [vmem:[#allocation99_spill] sm:$0xff] }
 0x634   :  { %v2758_v50 = vmul.f32 %v4225_v35, %v2756_v58  ;;  %vm2763_vm7 = vweird.f32 %v4225_v35  ;;  %v6889_v13 = vld [vmem:[#allocation63_spill] sm:$0xff] }
 0x635   :  { %2945 = vmatpush.bf16.msrb.mxu2 %v6457_v16  ;;  %2971 = vmatpush.bf16.msra.mxu0 %v6458_v36  ;;  %vm2764_vm11 = vmor %vm2762_vm0, %vm2763_vm7 }
 0x636   :  { %v2759_v52 = vsub.f32 1.0, %v2758_v50  ;;  %v2769_v50 = vor.u32 1.1754944e-38, %v2768_v8  ;;  %v6893_v8 = vld [vmem:[#allocation67_spill] sm:$0xff] }
 0x638   :  { %v2760_v46 = vmul.f32 %v4225_v35, %v2759_v52 }
 0x639   :  { %2946 = vmatpush.bf16.msrb.mxu2 %v6459_v48  ;;  %2972 = vmatpush.bf16.msra.mxu0 %v6539_v47 }
 0x63a   :  { %v2761_v41 = vadd.f32 %v4225_v35, %v2760_v46 }
 0x63c   :  { %v2765_v14 = vsel %vm2764_vm11, %v4225_v35, %v2761_v41  ;;  %v6891_v41 = vld [vmem:[#allocation81_spill] sm:$0xff] }
 0x63d   :  { %v2726_v62 = vpop.f32.mrf.mxu1  ;;  %2947 = vmatpush.bf16.msrb.mxu2 %v6540_v43  ;;  %2973 = vmatpush.bf16.msra.mxu0 %v6541_v32  ;;  %v2770_v52 = vsel %vm2767_vm1, %v2769_v50, %v2765_v14  ;;  %v6902_v14 = vld [vmem:[#allocation114_spill] sm:$0xff] }
 0x63e   :  { %v2727_v30 = vadd.f32 %v2726_v62, %v5836_v27  ;;  %v2775_v58 = vsub.f32 1.0, %v2770_v52  ;;  %v2777_v38 = vmul.f32 %v2770_v52, %v5719_v11 }
 0x640   :  { %v2733_v7 = vadd.f32 %v2727_v30, %v5023_v28  ;;  %2900 = vmatmul.bf16.vlgmr.msra.gmra.mxu2 %v5857_v57  ;;  %2926 = vmatmul.bf16.vlgmr.msrb.gmra.mxu0 %v5857_v57  ;;  %v6887_v30 = vld [vmem:[#allocation76_spill] sm:$0xff] }
 0x641   :  { %2948 = vmatpush.bf16.msrb.mxu2 %v6542_v34  ;;  %2974 = vmatpush.bf16.msra.mxu0 %v6543_v12 }
 0x642   :  { %v2772_v10 = vmul.f32 %v2751_v40, %v2733_v7  ;;  %v6890_v7 = vld [vmem:[#allocation107_spill] sm:$0xff]  ;;  %v6892_v40 = vld [vmem:[#allocation101_spill] sm:$0xff] }
 0x644   :  { %v2773_v27 = vadd.f32 %v2772_v10, %v2732_v49  ;;  %v6894_v49 = vld [vmem:[#allocation108_spill] sm:$0xff]  ;;  %v6895_v10 = vld [vmem:[#allocation85_spill] sm:$0xff] }
 0x645   :  { %v2728_v5 = vpop.f32.mrf.mxu1  ;;  %2949 = vmatpush.bf16.msrb.mxu2 %v6544_v55  ;;  %2975 = vmatpush.bf16.msra.mxu0 %v6545_v44 }
 0x646   :  { %4226 = vtanh.f32 %v2773_v27  ;;  %v6897_v27 = vld [vmem:[#allocation39_spill] sm:$0xff] }
 0x649   :  { %2950 = vmatpush.bf16.msrb.mxu2 %v6466_v21  ;;  %2976 = vmatpush.bf16.msra.mxu0 %v4792_v54 }
 0x64c   :  { %v4227_v42 = vpop.eup %4226 }
 0x64d   :  { %v2776_v63 = vmul.f32 %v4227_v42, %v2775_v58  ;;  %2951 = vmatpush.bf16.msrb.mxu2 %v6467_v26  ;;  %2977 = vmatpush.bf16.msra.mxu0 %v4804_v31  ;;  %v6913_v58 = vld [vmem:[#allocation131_spill] sm:$0xff] }
 0x64f   :  { %v2778_v46 = vadd.f32 %v2777_v38, %v2776_v63 }
 0x650   :  { %2952 = vmatmul.bf16.vlgmr.msrb.gmra.mxu2 %v5857_v57  ;;  %2978 = vmatmul.bf16.vlgmr.msra.gmra.mxu0 %v5857_v57 }
 0x651   :  { %v5887_v35 = vsel %vm2544_vm9, %v2778_v46, %v5719_v11  ;;  %2996 = vmatpush.bf16.msra.mxu2 %v6468_v25  ;;  %3132 = vmatpush.bf16.msrb.mxu0 %v6841_v3  ;;  %v6881_v11 = vld [vmem:[#allocation55_spill] sm:$0xff]  ;;  %v6882_v3 = vld [vmem:[#allocation104_spill] sm:$0xff] }
 0x652   :  { %v5893_v62 = vpack.c.bf16 %v5887_v35, %v5887_v35 }
 0x654   :  { %2861 = vmatmul.bf16.vlgmr.msra.gmra.mxu3 %v5893_v62  ;;  %2887 = vmatmul.bf16.vlgmr.msra.gmra.mxu1 %v5893_v62 }
 0x655   :  { %2957 = vmatpush.bf16.msra.mxu3 %v4802_v33  ;;  %2983 = vmatpush.bf16.msra.mxu1 %v6472_v39 }
 0x656   :  { %2997 = vmatpush.bf16.msra.mxu2 %v6469_v6  ;;  %3133 = vmatpush.bf16.msrb.mxu0 %v6846_v60  ;;  %v6883_v60 = vld [vmem:[#allocation75_spill] sm:$0xff] }
 0x659   :  { %2958 = vmatpush.bf16.msra.mxu3 %v4814_v51  ;;  %2984 = vmatpush.bf16.msra.mxu1 %v6474_v20 }
 0x65a   :  { %2998 = vmatpush.bf16.msra.mxu2 %v6470_v2  ;;  %3134 = vmatpush.bf16.msrb.mxu0 %v6849_v15  ;;  %v6884_v15 = vld [vmem:[#allocation97_spill] sm:$0xff] }
 0x65d   :  { %2959 = vmatpush.bf16.msra.mxu3 %v4828_v53  ;;  %2985 = vmatpush.bf16.msra.mxu1 %v6475_v4 }
 0x65e   :  { %2999 = vmatpush.bf16.msra.mxu2 %v6471_v56  ;;  %3135 = vmatpush.bf16.msrb.mxu0 %v6852_v59  ;;  %v6886_v59 = vld [vmem:[#allocation105_spill] sm:$0xff] }
 0x661   :  { %2960 = vmatpush.bf16.msra.mxu3 %v6794_v9  ;;  %2986 = vmatpush.bf16.msra.mxu1 %v6795_v22 }
 0x662   :  { %3000 = vmatpush.bf16.msra.mxu2 %v6880_v24  ;;  %3136 = vmatpush.bf16.msrb.mxu0 %v6881_v11 }
 0x664   :  { %2913 = vmatmul.bf16.vlgmr.msrb.gmra.mxu3 %v5893_v62  ;;  %2939 = vmatmul.bf16.vlgmr.msrb.gmra.mxu1 %v5893_v62 }
 0x665   :  { %2961 = vmatpush.bf16.msra.mxu3 %v6882_v3  ;;  %2987 = vmatpush.bf16.msra.mxu1 %v6883_v60 }
 0x666   :  { %3001 = vmatpush.bf16.msra.mxu2 %v6884_v15  ;;  %3137 = vmatpush.bf16.msrb.mxu0 %v6885_v18  ;;  %v6914_v18 = vld [vmem:[#allocation133_spill] sm:$0xff] }
 0x669   :  { %2962 = vmatpush.bf16.msra.mxu3 %v6886_v59  ;;  %2988 = vmatpush.bf16.msra.mxu1 %v6887_v30 }
 0x66a   :  { %3002 = vmatpush.bf16.msra.mxu2 %v6888_v1  ;;  %3138 = vmatpush.bf16.msrb.mxu0 %v6889_v13 }
 0x66d   :  { %2963 = vmatpush.bf16.msra.mxu3 %v6890_v7  ;;  %2989 = vmatpush.bf16.msra.mxu1 %v6891_v41 }
 0x66e   :  { %3003 = vmatpush.bf16.msra.mxu2 %v6892_v40  ;;  %3139 = vmatpush.bf16.msrb.mxu0 %v6893_v8 }
 0x671   :  { %2964 = vmatpush.bf16.msra.mxu3 %v6894_v49  ;;  %3004 = vmatmul.bf16.vlgmr.msra.gmra.mxu2 %v5857_v57  ;;  %v6900_v57 = vld [vmem:[#allocation112_spill] sm:$0xff] }
 0x672   :  { %3158 = vmatpush.bf16.msrb.mxu2 %v6455_v37  ;;  %3184 = vmatpush.bf16.msra.mxu0 %v6456_v17  ;;  %v6898_v37 = vld [vmem:[#allocation110_spill] sm:$0xff]  ;;  %v6899_v17 = vld [vmem:[#allocation43_spill] sm:$0xff] }
 0x673   :  { %2990 = vmatpush.bf16.msra.mxu1 %v6895_v10 }
 0x674   :  { %2965 = vmatmul.bf16.vlgmr.msra.gmra.mxu3 %v5893_v62 }
 0x675   :  { %3009 = vmatpush.bf16.msrb.mxu3 %v6896_v0 }
 0x676   :  { %3159 = vmatpush.bf16.msrb.mxu2 %v6457_v16  ;;  %3185 = vmatpush.bf16.msra.mxu0 %v6458_v36  ;;  %v6901_v16 = vld [vmem:[#allocation48_spill] sm:$0xff] }
 0x677   :  { %3145 = vmatpush.bf16.msrb.mxu1 %v6897_v27  ;;  %v6903_v36 = vld [vmem:[#allocation52_spill] sm:$0xff] }
 0x678   :  { %2991 = vmatmul.bf16.vlgmr.msra.gmra.mxu1 %v5893_v62 }
 0x679   :  { %3010 = vmatpush.bf16.msrb.mxu3 %v6898_v37 }
 0x67a   :  { %3160 = vmatpush.bf16.msrb.mxu2 %v6459_v48  ;;  %3186 = vmatpush.bf16.msra.mxu0 %v6539_v47  ;;  %v6904_v48 = vld [vmem:[#allocation116_spill] sm:$0xff] }
 0x67b   :  { %3146 = vmatpush.bf16.msrb.mxu1 %v6899_v17  ;;  %v6905_v47 = vld [vmem:[#allocation56_spill] sm:$0xff] }
 0x67d   :  { %3011 = vmatpush.bf16.msrb.mxu3 %v6900_v57 }
 0x67e   :  { %3161 = vmatpush.bf16.msrb.mxu2 %v6540_v43  ;;  %3187 = vmatpush.bf16.msra.mxu0 %v6541_v32  ;;  %v6906_v43 = vld [vmem:[#allocation118_spill] sm:$0xff]  ;;  %v6907_v32 = vld [vmem:[#allocation60_spill] sm:$0xff] }
 0x67f   :  { %3147 = vmatpush.bf16.msrb.mxu1 %v6901_v16 }
 0x681   :  { %3012 = vmatpush.bf16.msrb.mxu3 %v6902_v14 }
 0x682   :  { %3162 = vmatpush.bf16.msrb.mxu2 %v6542_v34  ;;  %3188 = vmatpush.bf16.msra.mxu0 %v6543_v12  ;;  %v6908_v34 = vld [vmem:[#allocation121_spill] sm:$0xff]  ;;  %v6909_v12 = vld [vmem:[#allocation64_spill] sm:$0xff] }
 0x683   :  { %3148 = vmatpush.bf16.msrb.mxu1 %v6903_v36 }
 0x685   :  { %3013 = vmatpush.bf16.msrb.mxu3 %v6904_v48 }
 0x686   :  { %3163 = vmatpush.bf16.msrb.mxu2 %v6544_v55  ;;  %3189 = vmatpush.bf16.msra.mxu0 %v6545_v44  ;;  %v6910_v55 = vld [vmem:[#allocation122_spill] sm:$0xff]  ;;  %v6911_v44 = vld [vmem:[#allocation68_spill] sm:$0xff] }
 0x687   :  { %3149 = vmatpush.bf16.msrb.mxu1 %v6905_v47 }
 0x689   :  { %3014 = vmatpush.bf16.msrb.mxu3 %v6906_v43 }
 0x68a   :  { %3164 = vmatpush.bf16.msrb.mxu2 %v6466_v21  ;;  %3190 = vmatpush.bf16.msra.mxu0 %v4792_v54 }
 0x68b   :  { %3150 = vmatpush.bf16.msrb.mxu1 %v6907_v32 }
 0x68d   :  { %3015 = vmatpush.bf16.msrb.mxu3 %v6908_v34 }
 0x68e   :  { %3165 = vmatpush.bf16.msrb.mxu2 %v6467_v26  ;;  %3191 = vmatpush.bf16.msra.mxu0 %v4804_v31 }
 0x68f   :  { %3151 = vmatpush.bf16.msrb.mxu1 %v6909_v12 }
 0x691   :  { %3016 = vmatpush.bf16.msrb.mxu3 %v6910_v55 }
 0x692   :  { %3210 = vmatpush.bf16.msra.mxu2 %v6468_v25 }
 0x693   :  { %3152 = vmatpush.bf16.msrb.mxu1 %v6911_v44 }
 0x694   :  { %3017 = vmatmul.bf16.vlgmr.msrb.gmra.mxu3 %v5893_v62 }
 0x695   :  { %3171 = vmatpush.bf16.msra.mxu3 %v4802_v33 }
 0x696   :  { %3211 = vmatpush.bf16.msra.mxu2 %v6469_v6 }
 0x697   :  { %3197 = vmatpush.bf16.msra.mxu1 %v6472_v39  ;;  %v6912_v39 = vld [vmem:[#allocation124_spill] sm:$0xff] }
 0x699   :  { %3172 = vmatpush.bf16.msra.mxu3 %v4814_v51 }
 0x69a   :  { %3212 = vmatpush.bf16.msra.mxu2 %v6470_v2 }
 0x69b   :  { %3198 = vmatpush.bf16.msra.mxu1 %v6474_v20 }
 0x69d   :  { %3173 = vmatpush.bf16.msra.mxu3 %v4828_v53 }
 0x69e   :  { %3213 = vmatpush.bf16.msra.mxu2 %v6471_v56 }
 0x69f   :  { %3199 = vmatpush.bf16.msra.mxu1 %v6475_v4 }
 0x6a1   :  { %3174 = vmatpush.bf16.msra.mxu3 %v6794_v9 }
 0x6a2   :  { %3214 = vmatpush.bf16.msra.mxu2 %v6880_v24 }
 0x6a3   :  { %3200 = vmatpush.bf16.msra.mxu1 %v6795_v22 }
 0x6a5   :  { %3175 = vmatpush.bf16.msra.mxu3 %v6882_v3 }
 0x6a6   :  { %3215 = vmatpush.bf16.msra.mxu2 %v6884_v15 }
 0x6a7   :  { %3201 = vmatpush.bf16.msra.mxu1 %v6883_v60 }
 0x6a9   :  { %3176 = vmatpush.bf16.msra.mxu3 %v6886_v59 }
 0x6aa   :  { %3216 = vmatpush.bf16.msra.mxu2 %v6888_v1 }
 0x6ab   :  { %3202 = vmatpush.bf16.msra.mxu1 %v6887_v30 }
 0x6ad   :  { %3177 = vmatpush.bf16.msra.mxu3 %v6890_v7  ;;  %v2875_v54 = vpop.f32.mrf.mxu0 }
 0x6ae   :  { %3217 = vmatpush.bf16.msra.mxu2 %v6892_v40 }
 0x6af   :  { %3203 = vmatpush.bf16.msra.mxu1 %v6891_v41 }
 0x6b1   :  { %3178 = vmatpush.bf16.msra.mxu3 %v6894_v49 }
 0x6b3   :  { %3204 = vmatpush.bf16.msra.mxu1 %v6895_v10  ;;  %v2849_v33 = vpop.f32.mrf.mxu2 }
 0x6b5   :  { %3223 = vmatpush.bf16.msrb.mxu3 %v6896_v0  ;;  %v2877_v31 = vpop.f32.mrf.mxu0 }
 0x6b9   :  { %3224 = vmatpush.bf16.msrb.mxu3 %v6898_v37 }
 0x6bb   :  { %v2851_v51 = vpop.f32.mrf.mxu2 }
 0x6bd   :  { %3225 = vmatpush.bf16.msrb.mxu3 %v6900_v57  ;;  %v2927_v53 = vpop.f32.mrf.mxu0 }
 0x6c1   :  { %3226 = vmatpush.bf16.msrb.mxu3 %v6902_v14 }
 0x6c3   :  { %v2901_v21 = vpop.f32.mrf.mxu2 }
 0x6c5   :  { %3227 = vmatpush.bf16.msrb.mxu3 %v6904_v48  ;;  %v2929_v26 = vpop.f32.mrf.mxu0 }
 0x6c9   :  { %3228 = vmatpush.bf16.msrb.mxu3 %v6906_v43 }
 0x6cb   :  { %v2903_v25 = vpop.f32.mrf.mxu2 }
 0x6cd   :  { %3229 = vmatpush.bf16.msrb.mxu3 %v6908_v34  ;;  %v5999_v6 = vpop.f32.mrf.mxu0 }
 0x6d1   :  { %3230 = vmatpush.bf16.msrb.mxu3 %v6910_v55  ;;  %v2888_v2 = vpop.f32.mrf.mxu1 }
 0x6d2   :  { %v2889_v56 = vadd.f32 %v2888_v2, %v2875_v54 }
 0x6d3   :  { %v2953_v9 = vpop.f32.mrf.mxu2 }
 0x6d4   :  { %v3096_v20 = vadd.f32 %v2889_v56, %v6912_v39 }
 0x6d5   :  { %v2981_v50 = vpop.f32.mrf.mxu0 }
 0x6d6   :  { %v3929_v4 = vmul.f32 -1.442695, %v3096_v20 }
 0x6d7   :  { %v2862_v22 = vpop.f32.mrf.mxu3 }
 0x6d8   :  { %4228 = vpow2.f32 %v3929_v4  ;;  %v2863_v5 = vadd.f32 %v2862_v22, %v2849_v33 }
 0x6d9   :  { %v2890_v52 = vpop.f32.mrf.mxu1 }
 0x6da   :  { %v3076_v42 = vadd.f32 %v2863_v5, %v6913_v58 }
 0x6db   :  { %v2955_v46 = vpop.f32.mrf.mxu2 }
 0x6dc   :  { %v3928_v63 = vmul.f32 -1.442695, %v3076_v42 }
 0x6de   :  { %v4229_v38 = vpop.eup %4228  ;;  %4230 = vpow2.f32 %v3928_v63  ;;  %v6010_v63 = vpop.permute.xlu0 %3126 }
 0x6df   :  { %v3100_v62 = vadd.f32 1.0, %v4229_v38  ;;  %v2864_v24 = vpop.f32.mrf.mxu3  ;;  %vm3128_vm2 = vcmp.eq.s32.totalorder %v6010_v63, 1 }
 0x6e1   :  { %v2940_v11 = vpop.f32.mrf.mxu1  ;;  %4232 = vrcp.f32 %v3100_v62  ;;  %v3112_v33 = vand.u32 2147483648, %v3100_v62  ;;  %vm3106_vm12 = vweird.f32 %v3100_v62 }
 0x6e2   :  { %v2941_v3 = vadd.f32 %v2940_v11, %v2927_v53  ;;  %v3110_v53 = vand.u32 2147483647, %v3100_v62 }
 0x6e3   :  { %v3113_v39 = vor.u32 1.1754944e-38, %v3112_v33 }
 0x6e4   :  { %v4231_v60 = vpop.eup %4230  ;;  %v3022_v59 = vadd.f32 %v2941_v3, %v6914_v18  ;;  %vm3111_vm8 = vcmp.eq.f32.partialorder %v3110_v53, 8.507059e+37 }
 0x6e5   :  { %v3080_v15 = vadd.f32 1.0, %v4231_v60 }
 0x6e6   :  { %v3926_v7 = vmul.f32 -1.442695, %v3022_v59 }
 0x6e7   :  { %4234 = vrcp.f32 %v3080_v15  ;;  %v2914_v30 = vpop.f32.mrf.mxu3  ;;  %v4233_v1 = vpop.eup %4232  ;;  %v3092_v27 = vand.u32 2147483648, %v3080_v15  ;;  %v3090_v57 = vand.u32 2147483647, %v3080_v15  ;;  %vm3086_vm3 = vweird.f32 %v3080_v15 }
 0x6e8   :  { %v3102_v41 = vmul.f32 %v4233_v1, %v3100_v62  ;;  %4236 = vpow2.f32 %v3926_v7  ;;  %v2915_v37 = vadd.f32 %v2914_v30, %v2901_v21  ;;  %vm3107_vm10 = vweird.f32 %v4233_v1  ;;  %v6915_v21 = vld [vmem:[#allocation132_spill] sm:$0xff] }
 0x6e9   :  { %v2942_v13 = vpop.f32.mrf.mxu1  ;;  %v3093_v43 = vor.u32 1.1754944e-38, %v3092_v27  ;;  %vm3091_vm6 = vcmp.eq.f32.partialorder %v3090_v57, 8.507059e+37  ;;  %vm3108_vm13 = vmor %vm3106_vm12, %vm3107_vm10 }
 0x6ea   :  { %v3103_v49 = vsub.f32 1.0, %v3102_v41  ;;  %v3116_v34 = vadd.f32 %v5841_v29, %v2915_v37 }
 0x6ec   :  { %v3104_v14 = vmul.f32 %v4233_v1, %v3103_v49 }
 0x6ed   :  { %v4235_v40 = vpop.eup %4234 }
 0x6ee   :  { %v3082_v8 = vmul.f32 %v4235_v40, %v3080_v15  ;;  %vm3087_vm9 = vweird.f32 %v4235_v40  ;;  %v4237_v36 = vpop.eup %4236  ;;  %v3105_v12 = vadd.f32 %v4233_v1, %v3104_v14 }
 0x6ef   :  { %v2916_v10 = vpop.f32.mrf.mxu3  ;;  %vm3088_vm4 = vmor %vm3086_vm3, %vm3087_vm9  ;;  %v3029_v55 = vadd.f32 1.0, %v4237_v36 }
 0x6f0   :  { %v3083_v0 = vsub.f32 1.0, %v3082_v8  ;;  %v3109_v56 = vsel %vm3108_vm13, %v4233_v1, %v3105_v12 }
 0x6f1   :  { %4238 = vrcp.f32 %v3029_v55  ;;  %v3114_v4 = vsel %vm3111_vm8, %v3113_v39, %v3109_v56  ;;  %v3041_v13 = vand.u32 2147483648, %v3029_v55  ;;  %vm3035_vm15 = vweird.f32 %v3029_v55  ;;  %v4081_v56 = vld [vmem:[%s6080_s6 + $0x28] sm:$0xff] }
 0x6f2   :  { %v3084_v17 = vmul.f32 %v4235_v40, %v3083_v0  ;;  %v3122_v58 = vmul.f32 %v3114_v4, %v5853_v23  ;;  %v3039_v7 = vand.u32 2147483647, %v3029_v55 }
 0x6f3   :  { %v3042_v10 = vor.u32 1.1754944e-38, %v3041_v13 }
 0x6f4   :  { %v3085_v48 = vadd.f32 %v4235_v40, %v3084_v17  ;;  %v3005_v47 = vpop.f32.mrf.mxu2  ;;  %vm3040_vm0 = vcmp.eq.f32.partialorder %v3039_v7, 8.507059e+37 }
 0x6f5   :  { %v6004_v16 = vpop.f32.mrf.mxu1 }
 0x6f6   :  { %v3089_v32 = vsel %vm3088_vm4, %v4235_v40, %v3085_v48 }
 0x6f7   :  { %v3094_v44 = vsel %vm3091_vm6, %v3093_v43, %v3089_v32  ;;  %v2966_v54 = vpop.f32.mrf.mxu3  ;;  %v4239_v5 = vpop.eup %4238 }
 0x6f8   :  { %v3117_v31 = vmul.f32 %v3116_v34, %v3094_v44  ;;  %v2967_v51 = vadd.f32 %v2966_v54, %v2953_v9  ;;  %v3120_v9 = vsub.f32 1.0, %v3114_v4  ;;  %v3031_v62 = vmul.f32 %v4239_v5, %v3029_v55 }
 0x6f9   :  { %vm3036_vm5 = vweird.f32 %v4239_v5 }
 0x6fa   :  { %v3118_v26 = vadd.f32 %v3117_v31, %v6915_v21  ;;  %v3023_v25 = vadd.f32 %v2967_v51, %v4993_v19  ;;  %v3032_v3 = vsub.f32 1.0, %v3031_v62  ;;  %vm3037_vm7 = vmor %vm3035_vm15, %vm3036_vm5  ;;  %vm3369_vm15 = vcmask 64512  }
 0x6fc   :  { %4240 = vtanh.f32 %v3118_v26  ;;  %v3927_v29 = vmul.f32 -1.442695, %v3023_v25  ;;  %v3007_v20 = vpop.f32.mrf.mxu2  ;;  %v3033_v15 = vmul.f32 %v4239_v5, %v3032_v3  ;;  %v4083_v25 = vld [vmem:[%s6080_s6 + $0x38] sm:$0xff] }
 0x6fd   :  { %v2994_v2 = vpop.f32.mrf.mxu1 }
 0x6fe   :  { %4242 = vpow2.f32 %v3927_v29  ;;  %v3034_v1 = vadd.f32 %v4239_v5, %v3033_v15  ;;  %v4080_v29 = vld [vmem:[%s6080_s6 + $0x20] sm:$0xff] }
 0x6ff   :  { %v2968_v22 = vpop.f32.mrf.mxu3 }
 0x700   :  { %v3038_v49 = vsel %vm3037_vm7, %v4239_v5, %v3034_v1  ;;  %v4079_v22 = vld [vmem:[%s6080_s6 + $0x18] sm:$0xff] }
 0x701   :  { %v3043_v37 = vsel %vm3040_vm0, %v3042_v10, %v3038_v49 }
 0x702   :  { %v4241_v50 = vpop.eup %4240 }
 0x703   :  { %v3121_v52 = vmul.f32 %v4241_v50, %v3120_v9 }
 0x704   :  { %v4243_v42 = vpop.eup %4242 }
 0x705   :  { %v3123_v38 = vadd.f32 %v3122_v58, %v3121_v52  ;;  %v3048_v46 = vadd.f32 1.0, %v4243_v42  ;;  %v4078_v52 = vld [vmem:[%s6080_s6 + $0x10] sm:$0xff] }
 0x707   :  { %4244 = vrcp.f32 %v3048_v46  ;;  %v6016_v24 = vsel %vm3128_vm2, %v3123_v38, %v5853_v23  ;;  %v2993_v23 = vadd.f32 %v6004_v16, %v5999_v6  ;;  %v3060_v57 = vand.u32 2147483648, %v3048_v46 }
 0x708   :  { %v3130_v11 = vpack.c.bf16 %v6016_v24, %v6016_v24  ;;  %vm3054_vm1 = vweird.f32 %v3048_v46  ;;  %v3058_v36 = vand.u32 2147483647, %v3048_v46 }
 0x709   :  { %v3024_v17 = vadd.f32 %v2993_v23, %v5026_v61 }
 0x70a   :  { %3140 = vmatmul.bf16.vlgmr.msrb.gmra.mxu0 %v3130_v11  ;;  %3166 = vmatmul.bf16.vlgmr.msrb.gmra.mxu2 %v3130_v11  ;;  %vm3059_vm3 = vcmp.eq.f32.partialorder %v3058_v36, 8.507059e+37 }
 0x70b   :  { %3355 = vmatpush.bf16.msrb.mxu0 %v4083_v25 }
 0x70d   :  { %v4245_v60 = vpop.eup %4244 }
 0x70e   :  { %v3050_v59 = vmul.f32 %v4245_v60, %v3048_v46  ;;  %vm3055_vm11 = vweird.f32 %v4245_v60  ;;  %v4077_v46 = vld [vmem:[%s6080_s6 + $0x8] sm:$0xff] }
 0x70f   :  { %vm3056_vm9 = vmor %vm3054_vm1, %vm3055_vm11 }
 0x710   :  { %v3051_v30 = vsub.f32 1.0, %v3050_v59 }
 0x712   :  { %v3052_v41 = vmul.f32 %v4245_v60, %v3051_v30 }
 0x714   :  { %v3053_v27 = vadd.f32 %v4245_v60, %v3052_v41 }
 0x716   :  { %v3057_v6 = vsel %vm3056_vm9, %v4245_v60, %v3053_v27  ;;  %v4076_v60 = vld [vmem:[%s6080_s6] sm:$0xff] }
 0x717   :  { %v3018_v40 = vpop.f32.mrf.mxu3 }
 0x718   :  { %v3019_v8 = vadd.f32 %v3018_v40, %v3005_v47  ;;  %v3061_v47 = vor.u32 1.1754944e-38, %v3060_v57 }
 0x71a   :  { %v3025_v0 = vadd.f32 %v3019_v8, %v5023_v28  ;;  %3192 = vmatmul.bf16.vlgmr.msra.gmra.mxu0 %v3130_v11  ;;  %3218 = vmatmul.bf16.vlgmr.msra.gmra.mxu2 %v3130_v11  ;;  %v3062_v43 = vsel %vm3059_vm3, %v3061_v47, %v3057_v6 }
 0x71b   :  { %v3067_v32 = vsub.f32 1.0, %v3062_v43  ;;  %v3069_v55 = vmul.f32 %v3062_v43, %v5887_v35 }
 0x71c   :  { %v3064_v14 = vmul.f32 %v3043_v37, %v3025_v0 }
 0x71e   :  { %v3065_v48 = vadd.f32 %v3064_v14, %v3024_v17 }
 0x71f   :  { %v3020_v16 = vpop.f32.mrf.mxu3 }
 0x720   :  { %4246 = vtanh.f32 %v3065_v48 }
 0x726   :  { %v4247_v34 = vpop.eup %4246 }
 0x727   :  { %v3068_v12 = vmul.f32 %v4247_v34, %v3067_v32 }
 0x729   :  { %v3070_v44 = vadd.f32 %v3069_v55, %v3068_v12 }
 0x72b   :  { %v6028_v54 = vsel %vm2836_vm14, %v3070_v44, %v5887_v35  ;;  %v4082_v35 = vld [vmem:[%s6080_s6 + $0x30] sm:$0xff] }
 0x72c   :  { %v3131_v33 = vpack.c.bf16 %v6028_v54, %v6028_v54  ;;  %3356 = vmatpush.bf16.msrb.mxu0 %v4082_v35 }
 0x72e   :  { %3153 = vmatmul.bf16.vlgmr.msrb.gmra.mxu1 %v3131_v33  ;;  %3179 = vmatmul.bf16.vlgmr.msra.gmra.mxu3 %v3131_v33 }
 0x730   :  { %3357 = vmatpush.bf16.msrb.mxu0 %v4081_v56 }
 0x734   :  { %3358 = vmatpush.bf16.msrb.mxu0 %v4080_v29 }
 0x738   :  { %3359 = vmatpush.bf16.msrb.mxu0 %v4079_v22 }
 0x73c   :  { %3360 = vmatpush.bf16.msrb.mxu0 %v4078_v52 }
 0x73e   :  { %3205 = vmatmul.bf16.vlgmr.msra.gmra.mxu1 %v3131_v33  ;;  %3231 = vmatmul.bf16.vlgmr.msrb.gmra.mxu3 %v3131_v33 }
 0x740   :  { %3361 = vmatpush.bf16.msrb.mxu0 %v4077_v46 }
 0x744   :  { %3362 = vmatpush.bf16.msrb.mxu0 %v4076_v60 }
 0x787   :  { %v3141_v31 = vpop.f32.mrf.mxu0 }
 0x78d   :  { %v3167_v51 = vpop.f32.mrf.mxu2 }
 0x78f   :  { %v3143_v53 = vpop.f32.mrf.mxu0 }
 0x795   :  { %v3169_v21 = vpop.f32.mrf.mxu2 }
 0x797   :  { %v3193_v26 = vpop.f32.mrf.mxu0 }
 0x79d   :  { %v3219_v45 = vpop.f32.mrf.mxu2 }
 0x79f   :  { %v3195_v2 = vpop.f32.mrf.mxu0 }
 0x7a5   :  { %v3221_v39 = vpop.f32.mrf.mxu2 }
 0x7ab   :  { %v3154_v20 = vpop.f32.mrf.mxu1 }
 0x7ac   :  { %v3155_v4 = vadd.f32 %v3154_v20, %v3141_v31 }
 0x7ae   :  { %v3236_v5 = vadd.f32 %v3155_v4, %v6914_v18 }
 0x7b0   :  { %v3930_v9 = vmul.f32 -1.442695, %v3236_v5 }
 0x7b1   :  { %v3180_v50 = vpop.f32.mrf.mxu3 }
 0x7b2   :  { %4248 = vpow2.f32 %v3930_v9  ;;  %v3181_v58 = vadd.f32 %v3180_v50, %v3167_v51 }
 0x7b3   :  { %v3156_v42 = vpop.f32.mrf.mxu1 }
 0x7b4   :  { %v3237_v38 = vadd.f32 %v3181_v58, %v4993_v19 }
 0x7b6   :  { %v3931_v62 = vmul.f32 -1.442695, %v3237_v38 }
 0x7b8   :  { %v4249_v18 = vpop.eup %4248  ;;  %4250 = vpow2.f32 %v3931_v62 }
 0x7b9   :  { %v3243_v11 = vadd.f32 1.0, %v4249_v18  ;;  %v3182_v3 = vpop.f32.mrf.mxu3 }
 0x7bb   :  { %4252 = vrcp.f32 %v3243_v11  ;;  %v3206_v15 = vpop.f32.mrf.mxu1  ;;  %v3255_v40 = vand.u32 2147483648, %v3243_v11  ;;  %v3253_v49 = vand.u32 2147483647, %v3243_v11  ;;  %vm3249_vm4 = vweird.f32 %v3243_v11 }
 0x7bc   :  { %v3207_v0 = vadd.f32 %v3206_v15, %v3193_v26 }
 0x7bd   :  { %v3256_v17 = vor.u32 1.1754944e-38, %v3255_v40  ;;  %vm3254_vm10 = vcmp.eq.f32.partialorder %v3253_v49, 8.507059e+37 }
 0x7be   :  { %v4251_v59 = vpop.eup %4250  ;;  %v3238_v6 = vadd.f32 %v3207_v0, %v5026_v61 }
 0x7bf   :  { %v3262_v30 = vadd.f32 1.0, %v4251_v59 }
 0x7c1   :  { %v4253_v19 = vpop.eup %4252  ;;  %4254 = vrcp.f32 %v3262_v30  ;;  %v3232_v1 = vpop.f32.mrf.mxu3  ;;  %v3274_v43 = vand.u32 2147483648, %v3262_v30  ;;  %v3272_v34 = vand.u32 2147483647, %v3262_v30  ;;  %vm3268_vm13 = vweird.f32 %v3262_v30 }
 0x7c2   :  { %v3245_v13 = vmul.f32 %v4253_v19, %v3243_v11  ;;  %v3233_v23 = vadd.f32 %v3232_v1, %v3219_v45  ;;  %vm3250_vm14 = vweird.f32 %v4253_v19  ;;  %v4097_v45 = vld [vmem:[%s6081_s7] ss:$0 sm:$0xff] }
 0x7c3   :  { %v3208_v7 = vpop.f32.mrf.mxu1  ;;  %vm3251_vm6 = vmor %vm3249_vm4, %vm3250_vm14  ;;  %v3275_v44 = vor.u32 1.1754944e-38, %v3274_v43  ;;  %vm3273_vm5 = vcmp.eq.f32.partialorder %v3272_v34, 8.507059e+37 }
 0x7c4   :  { %v3246_v41 = vsub.f32 1.0, %v3245_v13  ;;  %v3239_v36 = vadd.f32 %v3233_v23, %v5023_v28 }
 0x7c6   :  { %v3247_v8 = vmul.f32 %v4253_v19, %v3246_v41 }
 0x7c7   :  { %v4255_v10 = vpop.eup %4254 }
 0x7c8   :  { %v3264_v27 = vmul.f32 %v4255_v10, %v3262_v30  ;;  %v3248_v37 = vadd.f32 %v4253_v19, %v3247_v8  ;;  %vm3269_vm12 = vweird.f32 %v4255_v10 }
 0x7c9   :  { %v3234_v57 = vpop.f32.mrf.mxu3  ;;  %vm3270_vm8 = vmor %vm3268_vm13, %vm3269_vm12 }
 0x7ca   :  { %v3265_v14 = vsub.f32 1.0, %v3264_v27  ;;  %v3252_v48 = vsel %vm3251_vm6, %v4253_v19, %v3248_v37 }
 0x7cb   :  { %v3257_v16 = vsel %vm3254_vm10, %v3256_v17, %v3252_v48 }
 0x7cc   :  { %v3266_v47 = vmul.f32 %v4255_v10, %v3265_v14  ;;  %v3278_v32 = vmul.f32 %v3257_v16, %v3239_v36 }
 0x7ce   :  { %v3267_v12 = vadd.f32 %v4255_v10, %v3266_v47  ;;  %v3279_v55 = vadd.f32 %v3278_v32, %v3238_v6 }
 0x7d0   :  { %v3271_v33 = vsel %vm3270_vm8, %v4255_v10, %v3267_v12  ;;  %4256 = vtanh.f32 %v3279_v55 }
 0x7d1   :  { %v3276_v31 = vsel %vm3273_vm5, %v3275_v44, %v3271_v33 }
 0x7d2   :  { %v3281_v28 = vsub.f32 1.0, %v3276_v31  ;;  %v3283_v61 = vmul.f32 %v3276_v31, %v6028_v54 }
 0x7d6   :  { %v4257_v51 = vpop.eup %4256 }
 0x7d7   :  { %v3282_v53 = vmul.f32 %v4257_v51, %v3281_v28 }
 0x7d9   :  { %v3284_v21 = vadd.f32 %v3283_v61, %v3282_v53 }
 0x7db   :  { %v3285_v26 = vsel %vm3128_vm2, %v3284_v21, %v6028_v54 }
 0x7dc   :  { %v3286_v25 = vpack.c.bf16 %v3285_v26, %v6016_v24 }
 0x7de   :  { %3363 = vmatmul.bf16.vlgmr.msrb.gmra.mxu0 %v3286_v25 }
 0x85b   :  { %v3364_v35 = vpop.f32.mrf.mxu0 }
 0x85c   :  { %v3365_v2 = vadd.f32 %v4097_v45, %v3364_v35 }
 0x85e   :  { %3370 = vst.msk [vmem:[%s6082_s8] sm:$0xff] %vm3369_vm15, %v3365_v2 }
 0x863   :  { %v3366_v56 = vpop.f32.mrf.mxu0 }
 0x864   :  { %v3367_v39 = vadd.f32 %v4097_v45, %v3366_v56 }
 0x866   :  { %3371 = vst.msk [vmem:[%s6082_s8 + $0x8] sm:$0xff] %vm3369_vm15, %v3367_v39 }
 0x867   :  { %3376 = vsyncpa [#allocation4], 1 }
 0x868   :  { %3377 = vsyncpa [#allocation6], 1 }

</bundles_post_ra>
